<compile_context>
chip_gen: v5e
topology: v5e:2x2
jax: 0.10.0
libtpu: 0.0.40
codegen_flags: <defaults>
</compile_context>

<pallas_src>
import jax
import jax.numpy as jnp
from jax import lax
from jax.experimental import pallas as pl
from jax.experimental.pallas import tpu as pltpu


_NEG = -1e9

_PARAM_ORDER = ("w_sa_in", "b_sa_in", "w_sa_out", "b_sa_out", "ln1_w", "ln1_b",
                "w_ca_q", "b_ca_q", "w_ca_kv", "b_ca_kv", "w_ca_out", "b_ca_out",
                "ln2_w", "ln2_b",
                "w_ff1", "b_ff1", "w_ff2", "b_ff2", "ln3_w", "ln3_b")


# ----------------------------- fused decoder-layer kernel -------------------

def _make_layer_kernel(B, T, S, D, nhead, eps, has_tgt_mask, causal_tgt,
                       has_mem_mask, fuse_final_ln):
    dh = D // nhead

    def kernel(*refs):
        it = iter(refs)
        x_ref = next(it)                               # (B*T, D) f32
        mem_ref = next(it)                             # (B*S, D) f32
        tm_ref = next(it) if has_tgt_mask else None    # (T, T) additive f32
        mm_ref = next(it) if has_mem_mask else None    # (T, S) additive f32
        w_sa_in = next(it); b_sa_in = next(it)
        w_sa_out = next(it); b_sa_out = next(it)
        ln1_w = next(it); ln1_b = next(it)
        w_ca_q = next(it); b_ca_q = next(it)
        w_ca_kv = next(it); b_ca_kv = next(it)
        w_ca_out = next(it); b_ca_out = next(it)
        ln2_w = next(it); ln2_b = next(it)
        w_ff1 = next(it); b_ff1 = next(it)
        w_ff2 = next(it); b_ff2 = next(it)
        ln3_w = next(it); ln3_b = next(it)
        if fuse_final_ln:
            lnf_w = next(it); lnf_b = next(it)
        out_ref = next(it)                             # (B*T, D) f32
        attn_ref = next(it)                            # (B, T, S) f32
        head_scr = next(it)                            # VMEM (B, T, D) f32 scratch

        def dot_bf16(a, w_ref):
            # bf16 operands, f32 accumulation (MXU-native on v5e/v6e/v7x).
            return jnp.dot(a.astype(jnp.bfloat16), w_ref[...],
                           preferred_element_type=jnp.float32)

        def layer_norm(h, g_ref, b_ref):
            mu = jnp.mean(h, axis=-1, keepdims=True)
            var = jnp.mean(jnp.square(h - mu), axis=-1, keepdims=True)
            return (h - mu) * lax.rsqrt(var + eps) * g_ref[...] + b_ref[...]

        def add_ln(res, y, g_ref, b_ref):
            return layer_norm(res + y, g_ref, b_ref)

        x = x_ref[...]      # (B*T, D) f32
        mem = mem_ref[...]  # (B*S, D) f32

        # ---- masks (additive, f32) ----
        if causal_tgt:
            r = lax.broadcasted_iota(jnp.int32, (T, T), 0)
            c = lax.broadcasted_iota(jnp.int32, (T, T), 1)
            tgt_mask = jnp.where(c > r, _NEG, 0.0).astype(jnp.float32)
        elif has_tgt_mask:
            tgt_mask = tm_ref[...]
        else:
            tgt_mask = None
        mem_mask = mm_ref[...] if has_mem_mask else None

        def attention(q_flat, k_flat, v_flat, Lq, Lk, mask, need_weights):
            # q_flat: (B*Lq, D); k_flat/v_flat: (B*Lk, D).  1/sqrt(dh) already folded
            # into the q projection weights.  Batched over B per head; head outputs go
            # into the VMEM scratch slab (no live concatenate).
            q3 = q_flat.reshape(B, Lq, D)
            k3 = k_flat.reshape(B, Lk, D)
            v3 = v_flat.reshape(B, Lk, D)
            p_acc = None
            for h in range(nhead):
                sl = slice(h * dh, (h + 1) * dh)
                qh = q3[:, :, sl].astype(jnp.bfloat16)          # (B, Lq, dh)
                kh = k3[:, :, sl].astype(jnp.bfloat16)          # (B, Lk, dh)
                vh = v3[:, :, sl].astype(jnp.bfloat16)          # (B, Lk, dh)
                s = jnp.einsum('bqd,bkd->bqk', qh, kh,
                               preferred_element_type=jnp.float32)
                if mask is not None:
                    s = s + mask[None, :, :]
                s = s - jnp.max(s, axis=-1, keepdims=True)
                e = jnp.exp(s)
                den = jnp.sum(e, axis=-1, keepdims=True)
                if need_weights:
                    p = e / den                    # exact (returned to caller)
                else:
                    p = e * pl.reciprocal(den, approx=True)
                o_h = jnp.einsum('bqk,bkd->bqd', p.astype(jnp.bfloat16), vh,
                                 preferred_element_type=jnp.float32)
                head_scr[:, :, sl] = o_h
                if need_weights:
                    p_acc = p if p_acc is None else p_acc + p
            o = head_scr[...].reshape(B * Lq, D)
            if need_weights:
                p_acc = p_acc * (1.0 / nhead)      # head-averaged weights
            return o, p_acc

        # ---- self-attention (fused QKV projection, probs never materialized) ----
        qkv = dot_bf16(x, w_sa_in) + b_sa_in[...]              # (B*T, 3D)
        sa_o, _ = attention(qkv[:, :D], qkv[:, D:2 * D], qkv[:, 2 * D:],
                            T, T, tgt_mask, need_weights=False)
        sa_o = dot_bf16(sa_o, w_sa_out) + b_sa_out[...]
        h1 = add_ln(x, sa_o, ln1_w, ln1_b)

        # ---- cross-attention (fused KV projection; in-kernel head averaging) ----
        qc = dot_bf16(h1, w_ca_q) + b_ca_q[...]                # (B*T, D)
        kv = dot_bf16(mem, w_ca_kv) + b_ca_kv[...]             # (B*S, 2D)
        ca_o, p_avg = attention(qc, kv[:, :D], kv[:, D:],
                                T, S, mem_mask, need_weights=True)
        attn_ref[...] = p_avg.astype(attn_ref.dtype)           # (B, T, S)
        ca_o = dot_bf16(ca_o, w_ca_out) + b_ca_out[...]
        h2 = add_ln(h1, ca_o, ln2_w, ln2_b)

        # ---- feed-forward (ReLU) + optional fused final LayerNorm ----
        f = jnp.maximum(dot_bf16(h2, w_ff1) + b_ff1[...], 0.0)
        f = dot_bf16(f, w_ff2) + b_ff2[...]
        y = add_ln(h2, f, ln3_w, ln3_b)
        if fuse_final_ln:
            y = layer_norm(y, lnf_w, lnf_b)
        out_ref[...] = y.astype(out_ref.dtype)

    return kernel


# ----------------------------- wrappers --------------------------------------

def _full_spec(a):
    nd = a.ndim
    return pl.BlockSpec(a.shape, lambda i, _nd=nd: (0,) * _nd)


def decoder_layer(x, memory, p, nhead, tgt_mask=None, tgt_is_causal=False,
                  memory_mask=None, final_norm=None, eps=1e-5,
                  vmem_limit_bytes=None):
    """One fused decoder layer. x: (B, T, D), memory: (B, S, D)."""
    B, T, D = x.shape
    S = memory.shape[1]
    has_tm = (tgt_mask is not None) and (not tgt_is_causal)
    has_mm = memory_mask is not None
    fuse_final = final_norm is not None

    kernel = _make_layer_kernel(B, T, S, D, nhead, eps,
                                has_tgt_mask=has_tm, causal_tgt=tgt_is_causal,
                                has_mem_mask=has_mm, fuse_final_ln=fuse_final)

    inputs = [x.reshape(B * T, D), memory.reshape(B * S, D)]
    if has_tm:
        inputs.append(tgt_mask)
    if has_mm:
        inputs.append(memory_mask)
    for name in _PARAM_ORDER:
        inputs.append(p[name])
    if fuse_final:
        inputs.append(final_norm["w"].reshape(1, D))
        inputs.append(final_norm["b"].reshape(1, D))

    in_specs = [_full_spec(a) for a in inputs]
    out_specs = (pl.BlockSpec((B * T, D), lambda i: (0, 0)),
                 pl.BlockSpec((B, T, S), lambda i: (0, 0, 0)))

    cp_kwargs = dict(dimension_semantics=("arbitrary",))
    if vmem_limit_bytes is not None:
        cp_kwargs["vmem_limit_bytes"] = vmem_limit_bytes

    out_flat, attn = pl.pallas_call(
        kernel,
        grid=(1,),
        out_shape=(jax.ShapeDtypeStruct((B * T, D), jnp.float32),
                   jax.ShapeDtypeStruct((B, T, S), jnp.float32)),
        in_specs=in_specs,
        out_specs=out_specs,
        scratch_shapes=[pltpu.VMEM((B, T, D), jnp.float32)],
        compiler_params=pltpu.CompilerParams(**cp_kwargs),
    )(*inputs)
    return out_flat.reshape(B, T, D), attn


def transformer_decoder(tgt, memory, layer_params, nhead,
                        tgt_mask=None, tgt_is_causal=False, memory_mask=None,
                        norm_params=None):
    """TransformerDecoderCustom.forward.

    tgt: (T, B, D), memory: (S, B, D) (torch seq-first). Returns
    (output (T, B, D), [per-layer head-averaged cross-attn weights (B, T, S)]).
    """
    x = jnp.transpose(tgt, (1, 0, 2))       # (B, T, D) — once per forward
    mem = jnp.transpose(memory, (1, 0, 2))  # (B, S, D)
    attentions = []
    n = len(layer_params)
    for li, p in enumerate(layer_params):
        fn = norm_params if (norm_params is not None and li == n - 1) else None
        x, attn = decoder_layer(x, mem, p, nhead, tgt_mask=tgt_mask,
                                tgt_is_causal=tgt_is_causal,
                                memory_mask=memory_mask, final_norm=fn)
        attentions.append(attn)
    return jnp.transpose(x, (1, 0, 2)), attentions


# ----------------------------- parameters ------------------------------------

def init_mha_params(key, d_model):
    k1, k2 = jax.random.split(key, 2)
    return {
        "in_proj_weight": 0.05 * jax.random.normal(k1, (3 * d_model, d_model), jnp.float32),
        "in_proj_bias": jnp.zeros((3 * d_model,), jnp.float32),
        "out_proj_weight": 0.05 * jax.random.normal(k2, (d_model, d_model), jnp.float32),
        "out_proj_bias": jnp.zeros((d_model,), jnp.float32),
    }


def init_layer_params(key, d_model, dim_ff):
    """Parameters in PyTorch layout."""
    ks = jax.random.split(key, 4)
    return {
        "self_attn": init_mha_params(ks[0], d_model),
        "cross_attn": init_mha_params(ks[1], d_model),
        "linear1_w": 0.05 * jax.random.normal(ks[2], (dim_ff, d_model), jnp.float32),
        "linear1_b": jnp.zeros((dim_ff,), jnp.float32),
        "linear2_w": 0.05 * jax.random.normal(ks[3], (d_model, dim_ff), jnp.float32),
        "linear2_b": jnp.zeros((d_model,), jnp.float32),
        "norm1_w": jnp.ones((d_model,), jnp.float32),
        "norm1_b": jnp.zeros((d_model,), jnp.float32),
        "norm2_w": jnp.ones((d_model,), jnp.float32),
        "norm2_b": jnp.zeros((d_model,), jnp.float32),
        "norm3_w": jnp.ones((d_model,), jnp.float32),
        "norm3_b": jnp.zeros((d_model,), jnp.float32),
    }


def prepare_layer_params(p, d_model, nhead):
    """Torch-layout params -> kernel layout ONCE: pre-transposed, fused QKV/KV,
    1/sqrt(dh) folded into q weights+bias, weights cast to bf16."""
    D = d_model
    dh = D // nhead
    scale = 1.0 / float(dh) ** 0.5
    sa, ca = p["self_attn"], p["cross_attn"]

    # self-attn fused in-projection: columns = q | k | v ; fold scale into q part.
    w_sa_in = jnp.transpose(sa["in_proj_weight"])                  # (D, 3D)
    col_scale = jnp.concatenate([jnp.full((D,), scale, jnp.float32),
                                 jnp.ones((2 * D,), jnp.float32)])
    w_sa_in = w_sa_in * col_scale[None, :]
    b_sa_in = sa["in_proj_bias"] * col_scale

    w_ca_q = jnp.transpose(ca["in_proj_weight"][:D]) * scale       # (D, D)
    b_ca_q = ca["in_proj_bias"][:D] * scale
    w_ca_kv = jnp.transpose(ca["in_proj_weight"][D:])              # (D, 2D): cols k|v
    b_ca_kv = ca["in_proj_bias"][D:]

    bf16 = jnp.bfloat16
    return {
        "w_sa_in": w_sa_in.astype(bf16),
        "b_sa_in": b_sa_in.reshape(1, 3 * D),
        "w_sa_out": jnp.transpose(sa["out_proj_weight"]).astype(bf16),   # (D, D)
        "b_sa_out": sa["out_proj_bias"].reshape(1, D),
        "ln1_w": p["norm1_w"].reshape(1, D),
        "ln1_b": p["norm1_b"].reshape(1, D),
        "w_ca_q": w_ca_q.astype(bf16),
        "b_ca_q": b_ca_q.reshape(1, D),
        "w_ca_kv": w_ca_kv.astype(bf16),
        "b_ca_kv": b_ca_kv.reshape(1, 2 * D),
        "w_ca_out": jnp.transpose(ca["out_proj_weight"]).astype(bf16),
        "b_ca_out": ca["out_proj_bias"].reshape(1, D),
        "ln2_w": p["norm2_w"].reshape(1, D),
        "ln2_b": p["norm2_b"].reshape(1, D),
        "w_ff1": jnp.transpose(p["linear1_w"]).astype(bf16),             # (D, FF)
        "b_ff1": p["linear1_b"].reshape(1, -1),
        "w_ff2": jnp.transpose(p["linear2_w"]).astype(bf16),             # (FF, D)
        "b_ff2": p["linear2_b"].reshape(1, D),
        "ln3_w": p["norm3_w"].reshape(1, D),
        "ln3_b": p["norm3_b"].reshape(1, D),
    }


# ----------------------------- main -------------------------------------------

if __name__ == "__main__":
    T, S, B = 8, 8, 2          # tgt len, memory len, batch
    D, H, FF = 32, 4, 64       # d_model, nhead, dim_feedforward
    NUM_LAYERS = 2

    root = jax.random.PRNGKey(0)
    k_tgt, k_mem, k_par = jax.random.split(root, 3)

    tgt = jax.random.normal(k_tgt, (T, B, D), jnp.float32)
    memory = jax.random.normal(k_mem, (S, B, D), jnp.float32)

    layer_keys = jax.random.split(k_par, NUM_LAYERS)
    torch_layout_params = [init_layer_params(k, D, FF) for k in layer_keys]
    layer_params = [prepare_layer_params(p, D, H) for p in torch_layout_params]
    norm_params = {"w": jnp.ones((D,), jnp.float32), "b": jnp.zeros((D,), jnp.float32)}

    forward = jax.jit(transformer_decoder,
                      static_argnames=("nhead", "tgt_is_causal"))
    # Causal target mask is generated inside the kernel (tgt_is_causal=True):
    # equivalent to passing torch's generate_square_subsequent_mask additive mask.
    out, attentions = forward(tgt, memory, layer_params, nhead=H,
                              tgt_is_causal=True, memory_mask=None,
                              norm_params=norm_params)

    out = jax.block_until_ready(out)
    attentions = [jax.block_until_ready(a) for a in attentions]

    assert out.shape == (T, B, D)
    assert len(attentions) == NUM_LAYERS
    assert all(a.shape == (B, T, S) for a in attentions)
    assert bool(jnp.all(jnp.isfinite(out)))
    print("KERNEL_OK")
</pallas_src>

<mosaic_0001>
module attributes {stable_mosaic.version = 11 : i64} {
  func.func @kernel(%arg0: i32, %arg1: memref<16x32xf32, #tpu.memory_space<vmem>>, %arg2: memref<16x32xf32, #tpu.memory_space<vmem>>, %arg3: memref<32x96xbf16, #tpu.memory_space<vmem>>, %arg4: memref<1x96xf32, #tpu.memory_space<vmem>>, %arg5: memref<32x32xbf16, #tpu.memory_space<vmem>>, %arg6: memref<1x32xf32, #tpu.memory_space<vmem>>, %arg7: memref<1x32xf32, #tpu.memory_space<vmem>>, %arg8: memref<1x32xf32, #tpu.memory_space<vmem>>, %arg9: memref<32x32xbf16, #tpu.memory_space<vmem>>, %arg10: memref<1x32xf32, #tpu.memory_space<vmem>>, %arg11: memref<32x64xbf16, #tpu.memory_space<vmem>>, %arg12: memref<1x64xf32, #tpu.memory_space<vmem>>, %arg13: memref<32x32xbf16, #tpu.memory_space<vmem>>, %arg14: memref<1x32xf32, #tpu.memory_space<vmem>>, %arg15: memref<1x32xf32, #tpu.memory_space<vmem>>, %arg16: memref<1x32xf32, #tpu.memory_space<vmem>>, %arg17: memref<32x64xbf16, #tpu.memory_space<vmem>>, %arg18: memref<1x64xf32, #tpu.memory_space<vmem>>, %arg19: memref<64x32xbf16, #tpu.memory_space<vmem>>, %arg20: memref<1x32xf32, #tpu.memory_space<vmem>>, %arg21: memref<1x32xf32, #tpu.memory_space<vmem>>, %arg22: memref<1x32xf32, #tpu.memory_space<vmem>>, %arg23: memref<16x32xf32, #tpu.memory_space<vmem>>, %arg24: memref<2x8x8xf32, #tpu.memory_space<vmem>>, %arg25: memref<2x8x32xf32, #tpu.memory_space<vmem>>) attributes {dimension_semantics = [#tpu.dimension_semantics<arbitrary>], iteration_bounds = array<i64: 1>, scalar_prefetch = 0 : i64, scratch_operands = 1 : i64, tpu.core_type = #tpu.core_type<tc>, window_params = [{pipeline_mode = #tpu.pipeline_mode<synchronous>, transform_indices = @transform_0, window_bounds = array<i64: 16, 32>}, {pipeline_mode = #tpu.pipeline_mode<synchronous>, transform_indices = @transform_1, window_bounds = array<i64: 16, 32>}, {pipeline_mode = #tpu.pipeline_mode<synchronous>, transform_indices = @transform_2, window_bounds = array<i64: 32, 96>}, {pipeline_mode = #tpu.pipeline_mode<synchronous>, transform_indices = @transform_3, window_bounds = array<i64: 1, 96>}, {pipeline_mode = #tpu.pipeline_mode<synchronous>, transform_indices = @transform_4, window_bounds = array<i64: 32, 32>}, {pipeline_mode = #tpu.pipeline_mode<synchronous>, transform_indices = @transform_5, window_bounds = array<i64: 1, 32>}, {pipeline_mode = #tpu.pipeline_mode<synchronous>, transform_indices = @transform_6, window_bounds = array<i64: 1, 32>}, {pipeline_mode = #tpu.pipeline_mode<synchronous>, transform_indices = @transform_7, window_bounds = array<i64: 1, 32>}, {pipeline_mode = #tpu.pipeline_mode<synchronous>, transform_indices = @transform_8, window_bounds = array<i64: 32, 32>}, {pipeline_mode = #tpu.pipeline_mode<synchronous>, transform_indices = @transform_9, window_bounds = array<i64: 1, 32>}, {pipeline_mode = #tpu.pipeline_mode<synchronous>, transform_indices = @transform_10, window_bounds = array<i64: 32, 64>}, {pipeline_mode = #tpu.pipeline_mode<synchronous>, transform_indices = @transform_11, window_bounds = array<i64: 1, 64>}, {pipeline_mode = #tpu.pipeline_mode<synchronous>, transform_indices = @transform_12, window_bounds = array<i64: 32, 32>}, {pipeline_mode = #tpu.pipeline_mode<synchronous>, transform_indices = @transform_13, window_bounds = array<i64: 1, 32>}, {pipeline_mode = #tpu.pipeline_mode<synchronous>, transform_indices = @transform_14, window_bounds = array<i64: 1, 32>}, {pipeline_mode = #tpu.pipeline_mode<synchronous>, transform_indices = @transform_15, window_bounds = array<i64: 1, 32>}, {pipeline_mode = #tpu.pipeline_mode<synchronous>, transform_indices = @transform_16, window_bounds = array<i64: 32, 64>}, {pipeline_mode = #tpu.pipeline_mode<synchronous>, transform_indices = @transform_17, window_bounds = array<i64: 1, 64>}, {pipeline_mode = #tpu.pipeline_mode<synchronous>, transform_indices = @transform_18, window_bounds = array<i64: 64, 32>}, {pipeline_mode = #tpu.pipeline_mode<synchronous>, transform_indices = @transform_19, window_bounds = array<i64: 1, 32>}, {pipeline_mode = #tpu.pipeline_mode<synchronous>, transform_indices = @transform_20, window_bounds = array<i64: 1, 32>}, {pipeline_mode = #tpu.pipeline_mode<synchronous>, transform_indices = @transform_21, window_bounds = array<i64: 1, 32>}, {pipeline_mode = #tpu.pipeline_mode<synchronous>, transform_indices = @transform_22, window_bounds = array<i64: 16, 32>}, {pipeline_mode = #tpu.pipeline_mode<synchronous>, transform_indices = @transform_23, window_bounds = array<i64: 2, 8, 8>}]} {
    %c0 = arith.constant 0 : index
    %c0_0 = arith.constant 0 : index
    %0 = vector.load %arg1[%c0, %c0_0] : memref<16x32xf32, #tpu.memory_space<vmem>>, vector<16x32xf32>
    %c0_1 = arith.constant 0 : index
    %c0_2 = arith.constant 0 : index
    %1 = vector.load %arg2[%c0_1, %c0_2] : memref<16x32xf32, #tpu.memory_space<vmem>>, vector<16x32xf32>
    %2 = tpu.iota {dimensions = array<i32: 0>} : vector<8x8xi32>
    %3 = tpu.iota {dimensions = array<i32: 1>} : vector<8x8xi32>
    %4 = arith.cmpi sgt, %3, %2 : vector<8x8xi32>
    %cst = arith.constant -1.000000e+09 : f32
    %cst_3 = arith.constant 0.000000e+00 : f32
    %5 = vector.broadcast %cst : f32 to vector<8x8xf32>
    %6 = vector.broadcast %cst_3 : f32 to vector<8x8xf32>
    %7 = arith.select %4, %5, %6 : vector<8x8xi1>, vector<8x8xf32>
    %8 = arith.truncf %0 : vector<16x32xf32> to vector<16x32xbf16>
    %c0_4 = arith.constant 0 : index
    %c0_5 = arith.constant 0 : index
    %9 = vector.load %arg3[%c0_4, %c0_5] : memref<32x96xbf16, #tpu.memory_space<vmem>>, vector<32x96xbf16>
    %cst_6 = arith.constant dense<0.000000e+00> : vector<16x96xf32>
    %10 = tpu.matmul %8, %9, %cst_6 {dimension_numbers = #tpu.dot_dimension_numbers<[1], [0], [0], [1], [0, 0, 1, 1], [], []>} : vector<16x32xbf16>, vector<32x96xbf16>, vector<16x96xf32> -> vector<16x96xf32>
    %c0_7 = arith.constant 0 : index
    %c0_8 = arith.constant 0 : index
    %11 = vector.load %arg4[%c0_7, %c0_8] : memref<1x96xf32, #tpu.memory_space<vmem>>, vector<1x96xf32>
    %12 = vector.broadcast %11 : vector<1x96xf32> to vector<16x96xf32>
    %13 = arith.addf %10, %12 : vector<16x96xf32>
    %14 = vector.extract_strided_slice %13 {offsets = [0, 0], sizes = [16, 32], strides = [1, 1]} : vector<16x96xf32> to vector<16x32xf32>
    %15 = vector.extract_strided_slice %13 {offsets = [0, 32], sizes = [16, 32], strides = [1, 1]} : vector<16x96xf32> to vector<16x32xf32>
    %16 = vector.extract_strided_slice %13 {offsets = [0, 64], sizes = [16, 32], strides = [1, 1]} : vector<16x96xf32> to vector<16x32xf32>
    %17 = vector.shape_cast %14 : vector<16x32xf32> to vector<2x8x32xf32>
    %18 = vector.shape_cast %15 : vector<16x32xf32> to vector<2x8x32xf32>
    %19 = vector.shape_cast %16 : vector<16x32xf32> to vector<2x8x32xf32>
    %20 = vector.extract_strided_slice %17 {offsets = [0, 0, 0], sizes = [2, 8, 8], strides = [1, 1, 1]} : vector<2x8x32xf32> to vector<2x8x8xf32>
    %21 = arith.truncf %20 : vector<2x8x8xf32> to vector<2x8x8xbf16>
    %22 = vector.extract_strided_slice %18 {offsets = [0, 0, 0], sizes = [2, 8, 8], strides = [1, 1, 1]} : vector<2x8x32xf32> to vector<2x8x8xf32>
    %23 = arith.truncf %22 : vector<2x8x8xf32> to vector<2x8x8xbf16>
    %24 = vector.extract_strided_slice %19 {offsets = [0, 0, 0], sizes = [2, 8, 8], strides = [1, 1, 1]} : vector<2x8x32xf32> to vector<2x8x8xf32>
    %25 = arith.truncf %24 : vector<2x8x8xf32> to vector<2x8x8xbf16>
    "tpu.trace_start"() <{level = 10 : i32, message = "bqd,bkd->bqk"}> : () -> ()
    %cst_9 = arith.constant dense<0.000000e+00> : vector<2x8x8xf32>
    %26 = tpu.matmul %21, %23, %cst_9 {dimension_numbers = #tpu.dot_dimension_numbers<[2], [2], [1], [1], [0, 0, 0, 1, 1, 1], [0], [0]>} : vector<2x8x8xbf16>, vector<2x8x8xbf16>, vector<2x8x8xf32> -> vector<2x8x8xf32>
    "tpu.trace_stop"() : () -> ()
    %27 = vector.shape_cast %7 : vector<8x8xf32> to vector<1x8x8xf32>
    %28 = vector.broadcast %27 : vector<1x8x8xf32> to vector<2x8x8xf32>
    %29 = arith.addf %26, %28 : vector<2x8x8xf32>
    %cst_10 = arith.constant dense<0xFF800000> : vector<2x8xf32>
    %30 = vector.multi_reduction <maximumf>, %29, %cst_10 [2] : vector<2x8x8xf32> to vector<2x8xf32>
    %31 = vector.shape_cast %30 : vector<2x8xf32> to vector<2x8x1xf32>
    %32 = vector.broadcast %31 : vector<2x8x1xf32> to vector<2x8x8xf32>
    %33 = arith.subf %29, %32 : vector<2x8x8xf32>
    %34 = math.exp %33 : vector<2x8x8xf32>
    %cst_11 = arith.constant dense<0.000000e+00> : vector<2x8xf32>
    %35 = vector.multi_reduction <add>, %34, %cst_11 [2] : vector<2x8x8xf32> to vector<2x8xf32>
    %36 = vector.shape_cast %35 : vector<2x8xf32> to vector<2x8x1xf32>
    %37 = tpu.reciprocal %36 {approx = true} : vector<2x8x1xf32> -> vector<2x8x1xf32>
    %38 = vector.broadcast %37 : vector<2x8x1xf32> to vector<2x8x8xf32>
    %39 = arith.mulf %34, %38 : vector<2x8x8xf32>
    %40 = arith.truncf %39 : vector<2x8x8xf32> to vector<2x8x8xbf16>
    "tpu.trace_start"() <{level = 10 : i32, message = "bqk,bkd->bqd"}> : () -> ()
    %cst_12 = arith.constant dense<0.000000e+00> : vector<2x8x8xf32>
    %41 = tpu.matmul %40, %25, %cst_12 {dimension_numbers = #tpu.dot_dimension_numbers<[2], [1], [1], [2], [0, 0, 0, 1, 1, 2], [0], [0]>} : vector<2x8x8xbf16>, vector<2x8x8xbf16>, vector<2x8x8xf32> -> vector<2x8x8xf32>
    "tpu.trace_stop"() : () -> ()
    %c0_13 = arith.constant 0 : index
    %c0_14 = arith.constant 0 : index
    %c0_15 = arith.constant 0 : index
    %42 = vector.load %arg25[%c0_13, %c0_14, %c0_15] : memref<2x8x32xf32, #tpu.memory_space<vmem>>, vector<2x8x8xf32>
    tpu.vector_store %arg25[%c0_13, %c0_14, %c0_15], %41 {strides = array<i32>} : memref<2x8x32xf32, #tpu.memory_space<vmem>>, vector<2x8x8xf32>,
    %43 = vector.extract_strided_slice %17 {offsets = [0, 0, 8], sizes = [2, 8, 8], strides = [1, 1, 1]} : vector<2x8x32xf32> to vector<2x8x8xf32>
    %44 = arith.truncf %43 : vector<2x8x8xf32> to vector<2x8x8xbf16>
    %45 = vector.extract_strided_slice %18 {offsets = [0, 0, 8], sizes = [2, 8, 8], strides = [1, 1, 1]} : vector<2x8x32xf32> to vector<2x8x8xf32>
    %46 = arith.truncf %45 : vector<2x8x8xf32> to vector<2x8x8xbf16>
    %47 = vector.extract_strided_slice %19 {offsets = [0, 0, 8], sizes = [2, 8, 8], strides = [1, 1, 1]} : vector<2x8x32xf32> to vector<2x8x8xf32>
    %48 = arith.truncf %47 : vector<2x8x8xf32> to vector<2x8x8xbf16>
    "tpu.trace_start"() <{level = 10 : i32, message = "bqd,bkd->bqk"}> : () -> ()
    %cst_16 = arith.constant dense<0.000000e+00> : vector<2x8x8xf32>
    %49 = tpu.matmul %44, %46, %cst_16 {dimension_numbers = #tpu.dot_dimension_numbers<[2], [2], [1], [1], [0, 0, 0, 1, 1, 1], [0], [0]>} : vector<2x8x8xbf16>, vector<2x8x8xbf16>, vector<2x8x8xf32> -> vector<2x8x8xf32>
    "tpu.trace_stop"() : () -> ()
    %50 = vector.shape_cast %7 : vector<8x8xf32> to vector<1x8x8xf32>
    %51 = vector.broadcast %50 : vector<1x8x8xf32> to vector<2x8x8xf32>
    %52 = arith.addf %49, %51 : vector<2x8x8xf32>
    %cst_17 = arith.constant dense<0xFF800000> : vector<2x8xf32>
    %53 = vector.multi_reduction <maximumf>, %52, %cst_17 [2] : vector<2x8x8xf32> to vector<2x8xf32>
    %54 = vector.shape_cast %53 : vector<2x8xf32> to vector<2x8x1xf32>
    %55 = vector.broadcast %54 : vector<2x8x1xf32> to vector<2x8x8xf32>
    %56 = arith.subf %52, %55 : vector<2x8x8xf32>
    %57 = math.exp %56 : vector<2x8x8xf32>
    %cst_18 = arith.constant dense<0.000000e+00> : vector<2x8xf32>
    %58 = vector.multi_reduction <add>, %57, %cst_18 [2] : vector<2x8x8xf32> to vector<2x8xf32>
    %59 = vector.shape_cast %58 : vector<2x8xf32> to vector<2x8x1xf32>
    %60 = tpu.reciprocal %59 {approx = true} : vector<2x8x1xf32> -> vector<2x8x1xf32>
    %61 = vector.broadcast %60 : vector<2x8x1xf32> to vector<2x8x8xf32>
    %62 = arith.mulf %57, %61 : vector<2x8x8xf32>
    %63 = arith.truncf %62 : vector<2x8x8xf32> to vector<2x8x8xbf16>
    "tpu.trace_start"() <{level = 10 : i32, message = "bqk,bkd->bqd"}> : () -> ()
    %cst_19 = arith.constant dense<0.000000e+00> : vector<2x8x8xf32>
    %64 = tpu.matmul %63, %48, %cst_19 {dimension_numbers = #tpu.dot_dimension_numbers<[2], [1], [1], [2], [0, 0, 0, 1, 1, 2], [0], [0]>} : vector<2x8x8xbf16>, vector<2x8x8xbf16>, vector<2x8x8xf32> -> vector<2x8x8xf32>
    "tpu.trace_stop"() : () -> ()
    %c0_20 = arith.constant 0 : index
    %c0_21 = arith.constant 0 : index
    %c8 = arith.constant 8 : index
    %65 = vector.load %arg25[%c0_20, %c0_21, %c8] : memref<2x8x32xf32, #tpu.memory_space<vmem>>, vector<2x8x8xf32>
    tpu.vector_store %arg25[%c0_20, %c0_21, %c8], %64 {strides = array<i32>} : memref<2x8x32xf32, #tpu.memory_space<vmem>>, vector<2x8x8xf32>,
    %66 = vector.extract_strided_slice %17 {offsets = [0, 0, 16], sizes = [2, 8, 8], strides = [1, 1, 1]} : vector<2x8x32xf32> to vector<2x8x8xf32>
    %67 = arith.truncf %66 : vector<2x8x8xf32> to vector<2x8x8xbf16>
    %68 = vector.extract_strided_slice %18 {offsets = [0, 0, 16], sizes = [2, 8, 8], strides = [1, 1, 1]} : vector<2x8x32xf32> to vector<2x8x8xf32>
    %69 = arith.truncf %68 : vector<2x8x8xf32> to vector<2x8x8xbf16>
    %70 = vector.extract_strided_slice %19 {offsets = [0, 0, 16], sizes = [2, 8, 8], strides = [1, 1, 1]} : vector<2x8x32xf32> to vector<2x8x8xf32>
    %71 = arith.truncf %70 : vector<2x8x8xf32> to vector<2x8x8xbf16>
    "tpu.trace_start"() <{level = 10 : i32, message = "bqd,bkd->bqk"}> : () -> ()
    %cst_22 = arith.constant dense<0.000000e+00> : vector<2x8x8xf32>
    %72 = tpu.matmul %67, %69, %cst_22 {dimension_numbers = #tpu.dot_dimension_numbers<[2], [2], [1], [1], [0, 0, 0, 1, 1, 1], [0], [0]>} : vector<2x8x8xbf16>, vector<2x8x8xbf16>, vector<2x8x8xf32> -> vector<2x8x8xf32>
    "tpu.trace_stop"() : () -> ()
    %73 = vector.shape_cast %7 : vector<8x8xf32> to vector<1x8x8xf32>
    %74 = vector.broadcast %73 : vector<1x8x8xf32> to vector<2x8x8xf32>
    %75 = arith.addf %72, %74 : vector<2x8x8xf32>
    %cst_23 = arith.constant dense<0xFF800000> : vector<2x8xf32>
    %76 = vector.multi_reduction <maximumf>, %75, %cst_23 [2] : vector<2x8x8xf32> to vector<2x8xf32>
    %77 = vector.shape_cast %76 : vector<2x8xf32> to vector<2x8x1xf32>
    %78 = vector.broadcast %77 : vector<2x8x1xf32> to vector<2x8x8xf32>
    %79 = arith.subf %75, %78 : vector<2x8x8xf32>
    %80 = math.exp %79 : vector<2x8x8xf32>
    %cst_24 = arith.constant dense<0.000000e+00> : vector<2x8xf32>
    %81 = vector.multi_reduction <add>, %80, %cst_24 [2] : vector<2x8x8xf32> to vector<2x8xf32>
    %82 = vector.shape_cast %81 : vector<2x8xf32> to vector<2x8x1xf32>
    %83 = tpu.reciprocal %82 {approx = true} : vector<2x8x1xf32> -> vector<2x8x1xf32>
    %84 = vector.broadcast %83 : vector<2x8x1xf32> to vector<2x8x8xf32>
    %85 = arith.mulf %80, %84 : vector<2x8x8xf32>
    %86 = arith.truncf %85 : vector<2x8x8xf32> to vector<2x8x8xbf16>
    "tpu.trace_start"() <{level = 10 : i32, message = "bqk,bkd->bqd"}> : () -> ()
    %cst_25 = arith.constant dense<0.000000e+00> : vector<2x8x8xf32>
    %87 = tpu.matmul %86, %71, %cst_25 {dimension_numbers = #tpu.dot_dimension_numbers<[2], [1], [1], [2], [0, 0, 0, 1, 1, 2], [0], [0]>} : vector<2x8x8xbf16>, vector<2x8x8xbf16>, vector<2x8x8xf32> -> vector<2x8x8xf32>
    "tpu.trace_stop"() : () -> ()
    %c0_26 = arith.constant 0 : index
    %c0_27 = arith.constant 0 : index
    %c16 = arith.constant 16 : index
    %88 = vector.load %arg25[%c0_26, %c0_27, %c16] : memref<2x8x32xf32, #tpu.memory_space<vmem>>, vector<2x8x8xf32>
    tpu.vector_store %arg25[%c0_26, %c0_27, %c16], %87 {strides = array<i32>} : memref<2x8x32xf32, #tpu.memory_space<vmem>>, vector<2x8x8xf32>,
    %89 = vector.extract_strided_slice %17 {offsets = [0, 0, 24], sizes = [2, 8, 8], strides = [1, 1, 1]} : vector<2x8x32xf32> to vector<2x8x8xf32>
    %90 = arith.truncf %89 : vector<2x8x8xf32> to vector<2x8x8xbf16>
    %91 = vector.extract_strided_slice %18 {offsets = [0, 0, 24], sizes = [2, 8, 8], strides = [1, 1, 1]} : vector<2x8x32xf32> to vector<2x8x8xf32>
    %92 = arith.truncf %91 : vector<2x8x8xf32> to vector<2x8x8xbf16>
    %93 = vector.extract_strided_slice %19 {offsets = [0, 0, 24], sizes = [2, 8, 8], strides = [1, 1, 1]} : vector<2x8x32xf32> to vector<2x8x8xf32>
    %94 = arith.truncf %93 : vector<2x8x8xf32> to vector<2x8x8xbf16>
    "tpu.trace_start"() <{level = 10 : i32, message = "bqd,bkd->bqk"}> : () -> ()
    %cst_28 = arith.constant dense<0.000000e+00> : vector<2x8x8xf32>
    %95 = tpu.matmul %90, %92, %cst_28 {dimension_numbers = #tpu.dot_dimension_numbers<[2], [2], [1], [1], [0, 0, 0, 1, 1, 1], [0], [0]>} : vector<2x8x8xbf16>, vector<2x8x8xbf16>, vector<2x8x8xf32> -> vector<2x8x8xf32>
    "tpu.trace_stop"() : () -> ()
    %96 = vector.shape_cast %7 : vector<8x8xf32> to vector<1x8x8xf32>
    %97 = vector.broadcast %96 : vector<1x8x8xf32> to vector<2x8x8xf32>
    %98 = arith.addf %95, %97 : vector<2x8x8xf32>
    %cst_29 = arith.constant dense<0xFF800000> : vector<2x8xf32>
    %99 = vector.multi_reduction <maximumf>, %98, %cst_29 [2] : vector<2x8x8xf32> to vector<2x8xf32>
    %100 = vector.shape_cast %99 : vector<2x8xf32> to vector<2x8x1xf32>
    %101 = vector.broadcast %100 : vector<2x8x1xf32> to vector<2x8x8xf32>
    %102 = arith.subf %98, %101 : vector<2x8x8xf32>
    %103 = math.exp %102 : vector<2x8x8xf32>
    %cst_30 = arith.constant dense<0.000000e+00> : vector<2x8xf32>
    %104 = vector.multi_reduction <add>, %103, %cst_30 [2] : vector<2x8x8xf32> to vector<2x8xf32>
    %105 = vector.shape_cast %104 : vector<2x8xf32> to vector<2x8x1xf32>
    %106 = tpu.reciprocal %105 {approx = true} : vector<2x8x1xf32> -> vector<2x8x1xf32>
    %107 = vector.broadcast %106 : vector<2x8x1xf32> to vector<2x8x8xf32>
    %108 = arith.mulf %103, %107 : vector<2x8x8xf32>
    %109 = arith.truncf %108 : vector<2x8x8xf32> to vector<2x8x8xbf16>
    "tpu.trace_start"() <{level = 10 : i32, message = "bqk,bkd->bqd"}> : () -> ()
    %cst_31 = arith.constant dense<0.000000e+00> : vector<2x8x8xf32>
    %110 = tpu.matmul %109, %94, %cst_31 {dimension_numbers = #tpu.dot_dimension_numbers<[2], [1], [1], [2], [0, 0, 0, 1, 1, 2], [0], [0]>} : vector<2x8x8xbf16>, vector<2x8x8xbf16>, vector<2x8x8xf32> -> vector<2x8x8xf32>
    "tpu.trace_stop"() : () -> ()
    %c0_32 = arith.constant 0 : index
    %c0_33 = arith.constant 0 : index
    %c24 = arith.constant 24 : index
    %111 = vector.load %arg25[%c0_32, %c0_33, %c24] : memref<2x8x32xf32, #tpu.memory_space<vmem>>, vector<2x8x8xf32>
    tpu.vector_store %arg25[%c0_32, %c0_33, %c24], %110 {strides = array<i32>} : memref<2x8x32xf32, #tpu.memory_space<vmem>>, vector<2x8x8xf32>,
    %c0_34 = arith.constant 0 : index
    %c0_35 = arith.constant 0 : index
    %c0_36 = arith.constant 0 : index
    %112 = vector.load %arg25[%c0_34, %c0_35, %c0_36] : memref<2x8x32xf32, #tpu.memory_space<vmem>>, vector<2x8x32xf32>
    %113 = vector.shape_cast %112 : vector<2x8x32xf32> to vector<16x32xf32>
    %114 = arith.truncf %113 : vector<16x32xf32> to vector<16x32xbf16>
    %c0_37 = arith.constant 0 : index
    %c0_38 = arith.constant 0 : index
    %115 = vector.load %arg5[%c0_37, %c0_38] : memref<32x32xbf16, #tpu.memory_space<vmem>>, vector<32x32xbf16>
    %cst_39 = arith.constant dense<0.000000e+00> : vector<16x32xf32>
    %116 = tpu.matmul %114, %115, %cst_39 {dimension_numbers = #tpu.dot_dimension_numbers<[1], [0], [0], [1], [0, 0, 1, 1], [], []>} : vector<16x32xbf16>, vector<32x32xbf16>, vector<16x32xf32> -> vector<16x32xf32>
    %c0_40 = arith.constant 0 : index
    %c0_41 = arith.constant 0 : index
    %117 = vector.load %arg6[%c0_40, %c0_41] : memref<1x32xf32, #tpu.memory_space<vmem>>, vector<1x32xf32>
    %118 = vector.broadcast %117 : vector<1x32xf32> to vector<16x32xf32>
    %119 = arith.addf %116, %118 : vector<16x32xf32>
    %120 = arith.addf %0, %119 : vector<16x32xf32>
    %cst_42 = arith.constant dense<0.000000e+00> : vector<16xf32>
    %121 = vector.multi_reduction <add>, %120, %cst_42 [1] : vector<16x32xf32> to vector<16xf32>
    %122 = vector.shape_cast %121 : vector<16xf32> to vector<16x1xf32>
    %cst_43 = arith.constant 3.200000e+01 : f32
    %123 = vector.broadcast %cst_43 : f32 to vector<16x1xf32>
    %124 = arith.divf %122, %123 : vector<16x1xf32>
    %125 = vector.broadcast %124 : vector<16x1xf32> to vector<16x32xf32>
    %126 = arith.subf %120, %125 : vector<16x32xf32>
    %127 = arith.mulf %126, %126 : vector<16x32xf32>
    %cst_44 = arith.constant dense<0.000000e+00> : vector<16xf32>
    %128 = vector.multi_reduction <add>, %127, %cst_44 [1] : vector<16x32xf32> to vector<16xf32>
    %129 = vector.shape_cast %128 : vector<16xf32> to vector<16x1xf32>
    %cst_45 = arith.constant 3.200000e+01 : f32
    %130 = vector.broadcast %cst_45 : f32 to vector<16x1xf32>
    %131 = arith.divf %129, %130 : vector<16x1xf32>
    %132 = vector.broadcast %124 : vector<16x1xf32> to vector<16x32xf32>
    %133 = arith.subf %120, %132 : vector<16x32xf32>
    %cst_46 = arith.constant 9.99999974E-6 : f32
    %134 = vector.broadcast %cst_46 : f32 to vector<16x1xf32>
    %135 = arith.addf %131, %134 : vector<16x1xf32>
    %136 = math.rsqrt %135 : vector<16x1xf32>
    %137 = vector.broadcast %136 : vector<16x1xf32> to vector<16x32xf32>
    %138 = arith.mulf %133, %137 : vector<16x32xf32>
    %c0_47 = arith.constant 0 : index
    %c0_48 = arith.constant 0 : index
    %139 = vector.load %arg7[%c0_47, %c0_48] : memref<1x32xf32, #tpu.memory_space<vmem>>, vector<1x32xf32>
    %140 = vector.broadcast %139 : vector<1x32xf32> to vector<16x32xf32>
    %141 = arith.mulf %138, %140 : vector<16x32xf32>
    %c0_49 = arith.constant 0 : index
    %c0_50 = arith.constant 0 : index
    %142 = vector.load %arg8[%c0_49, %c0_50] : memref<1x32xf32, #tpu.memory_space<vmem>>, vector<1x32xf32>
    %143 = vector.broadcast %142 : vector<1x32xf32> to vector<16x32xf32>
    %144 = arith.addf %141, %143 : vector<16x32xf32>
    %145 = arith.truncf %144 : vector<16x32xf32> to vector<16x32xbf16>
    %c0_51 = arith.constant 0 : index
    %c0_52 = arith.constant 0 : index
    %146 = vector.load %arg9[%c0_51, %c0_52] : memref<32x32xbf16, #tpu.memory_space<vmem>>, vector<32x32xbf16>
    %cst_53 = arith.constant dense<0.000000e+00> : vector<16x32xf32>
    %147 = tpu.matmul %145, %146, %cst_53 {dimension_numbers = #tpu.dot_dimension_numbers<[1], [0], [0], [1], [0, 0, 1, 1], [], []>} : vector<16x32xbf16>, vector<32x32xbf16>, vector<16x32xf32> -> vector<16x32xf32>
    %c0_54 = arith.constant 0 : index
    %c0_55 = arith.constant 0 : index
    %148 = vector.load %arg10[%c0_54, %c0_55] : memref<1x32xf32, #tpu.memory_space<vmem>>, vector<1x32xf32>
    %149 = vector.broadcast %148 : vector<1x32xf32> to vector<16x32xf32>
    %150 = arith.addf %147, %149 : vector<16x32xf32>
    %151 = arith.truncf %1 : vector<16x32xf32> to vector<16x32xbf16>
    %c0_56 = arith.constant 0 : index
    %c0_57 = arith.constant 0 : index
    %152 = vector.load %arg11[%c0_56, %c0_57] : memref<32x64xbf16, #tpu.memory_space<vmem>>, vector<32x64xbf16>
    %cst_58 = arith.constant dense<0.000000e+00> : vector<16x64xf32>
    %153 = tpu.matmul %151, %152, %cst_58 {dimension_numbers = #tpu.dot_dimension_numbers<[1], [0], [0], [1], [0, 0, 1, 1], [], []>} : vector<16x32xbf16>, vector<32x64xbf16>, vector<16x64xf32> -> vector<16x64xf32>
    %c0_59 = arith.constant 0 : index
    %c0_60 = arith.constant 0 : index
    %154 = vector.load %arg12[%c0_59, %c0_60] : memref<1x64xf32, #tpu.memory_space<vmem>>, vector<1x64xf32>
    %155 = vector.broadcast %154 : vector<1x64xf32> to vector<16x64xf32>
    %156 = arith.addf %153, %155 : vector<16x64xf32>
    %157 = vector.extract_strided_slice %156 {offsets = [0, 0], sizes = [16, 32], strides = [1, 1]} : vector<16x64xf32> to vector<16x32xf32>
    %158 = vector.extract_strided_slice %156 {offsets = [0, 32], sizes = [16, 32], strides = [1, 1]} : vector<16x64xf32> to vector<16x32xf32>
    %159 = vector.shape_cast %150 : vector<16x32xf32> to vector<2x8x32xf32>
    %160 = vector.shape_cast %157 : vector<16x32xf32> to vector<2x8x32xf32>
    %161 = vector.shape_cast %158 : vector<16x32xf32> to vector<2x8x32xf32>
    %162 = vector.extract_strided_slice %159 {offsets = [0, 0, 0], sizes = [2, 8, 8], strides = [1, 1, 1]} : vector<2x8x32xf32> to vector<2x8x8xf32>
    %163 = arith.truncf %162 : vector<2x8x8xf32> to vector<2x8x8xbf16>
    %164 = vector.extract_strided_slice %160 {offsets = [0, 0, 0], sizes = [2, 8, 8], strides = [1, 1, 1]} : vector<2x8x32xf32> to vector<2x8x8xf32>
    %165 = arith.truncf %164 : vector<2x8x8xf32> to vector<2x8x8xbf16>
    %166 = vector.extract_strided_slice %161 {offsets = [0, 0, 0], sizes = [2, 8, 8], strides = [1, 1, 1]} : vector<2x8x32xf32> to vector<2x8x8xf32>
    %167 = arith.truncf %166 : vector<2x8x8xf32> to vector<2x8x8xbf16>
    "tpu.trace_start"() <{level = 10 : i32, message = "bqd,bkd->bqk"}> : () -> ()
    %cst_61 = arith.constant dense<0.000000e+00> : vector<2x8x8xf32>
    %168 = tpu.matmul %163, %165, %cst_61 {dimension_numbers = #tpu.dot_dimension_numbers<[2], [2], [1], [1], [0, 0, 0, 1, 1, 1], [0], [0]>} : vector<2x8x8xbf16>, vector<2x8x8xbf16>, vector<2x8x8xf32> -> vector<2x8x8xf32>
    "tpu.trace_stop"() : () -> ()
    %cst_62 = arith.constant dense<0xFF800000> : vector<2x8xf32>
    %169 = vector.multi_reduction <maximumf>, %168, %cst_62 [2] : vector<2x8x8xf32> to vector<2x8xf32>
    %170 = vector.shape_cast %169 : vector<2x8xf32> to vector<2x8x1xf32>
    %171 = vector.broadcast %170 : vector<2x8x1xf32> to vector<2x8x8xf32>
    %172 = arith.subf %168, %171 : vector<2x8x8xf32>
    %173 = math.exp %172 : vector<2x8x8xf32>
    %cst_63 = arith.constant dense<0.000000e+00> : vector<2x8xf32>
    %174 = vector.multi_reduction <add>, %173, %cst_63 [2] : vector<2x8x8xf32> to vector<2x8xf32>
    %175 = vector.shape_cast %174 : vector<2x8xf32> to vector<2x8x1xf32>
    %176 = vector.broadcast %175 : vector<2x8x1xf32> to vector<2x8x8xf32>
    %177 = arith.divf %173, %176 : vector<2x8x8xf32>
    %178 = arith.truncf %177 : vector<2x8x8xf32> to vector<2x8x8xbf16>
    "tpu.trace_start"() <{level = 10 : i32, message = "bqk,bkd->bqd"}> : () -> ()
    %cst_64 = arith.constant dense<0.000000e+00> : vector<2x8x8xf32>
    %179 = tpu.matmul %178, %167, %cst_64 {dimension_numbers = #tpu.dot_dimension_numbers<[2], [1], [1], [2], [0, 0, 0, 1, 1, 2], [0], [0]>} : vector<2x8x8xbf16>, vector<2x8x8xbf16>, vector<2x8x8xf32> -> vector<2x8x8xf32>
    "tpu.trace_stop"() : () -> ()
    %c0_65 = arith.constant 0 : index
    %c0_66 = arith.constant 0 : index
    %c0_67 = arith.constant 0 : index
    %180 = vector.load %arg25[%c0_65, %c0_66, %c0_67] : memref<2x8x32xf32, #tpu.memory_space<vmem>>, vector<2x8x8xf32>
    tpu.vector_store %arg25[%c0_65, %c0_66, %c0_67], %179 {strides = array<i32>} : memref<2x8x32xf32, #tpu.memory_space<vmem>>, vector<2x8x8xf32>,
    %181 = vector.extract_strided_slice %159 {offsets = [0, 0, 8], sizes = [2, 8, 8], strides = [1, 1, 1]} : vector<2x8x32xf32> to vector<2x8x8xf32>
    %182 = arith.truncf %181 : vector<2x8x8xf32> to vector<2x8x8xbf16>
    %183 = vector.extract_strided_slice %160 {offsets = [0, 0, 8], sizes = [2, 8, 8], strides = [1, 1, 1]} : vector<2x8x32xf32> to vector<2x8x8xf32>
    %184 = arith.truncf %183 : vector<2x8x8xf32> to vector<2x8x8xbf16>
    %185 = vector.extract_strided_slice %161 {offsets = [0, 0, 8], sizes = [2, 8, 8], strides = [1, 1, 1]} : vector<2x8x32xf32> to vector<2x8x8xf32>
    %186 = arith.truncf %185 : vector<2x8x8xf32> to vector<2x8x8xbf16>
    "tpu.trace_start"() <{level = 10 : i32, message = "bqd,bkd->bqk"}> : () -> ()
    %cst_68 = arith.constant dense<0.000000e+00> : vector<2x8x8xf32>
    %187 = tpu.matmul %182, %184, %cst_68 {dimension_numbers = #tpu.dot_dimension_numbers<[2], [2], [1], [1], [0, 0, 0, 1, 1, 1], [0], [0]>} : vector<2x8x8xbf16>, vector<2x8x8xbf16>, vector<2x8x8xf32> -> vector<2x8x8xf32>
    "tpu.trace_stop"() : () -> ()
    %cst_69 = arith.constant dense<0xFF800000> : vector<2x8xf32>
    %188 = vector.multi_reduction <maximumf>, %187, %cst_69 [2] : vector<2x8x8xf32> to vector<2x8xf32>
    %189 = vector.shape_cast %188 : vector<2x8xf32> to vector<2x8x1xf32>
    %190 = vector.broadcast %189 : vector<2x8x1xf32> to vector<2x8x8xf32>
    %191 = arith.subf %187, %190 : vector<2x8x8xf32>
    %192 = math.exp %191 : vector<2x8x8xf32>
    %cst_70 = arith.constant dense<0.000000e+00> : vector<2x8xf32>
    %193 = vector.multi_reduction <add>, %192, %cst_70 [2] : vector<2x8x8xf32> to vector<2x8xf32>
    %194 = vector.shape_cast %193 : vector<2x8xf32> to vector<2x8x1xf32>
    %195 = vector.broadcast %194 : vector<2x8x1xf32> to vector<2x8x8xf32>
    %196 = arith.divf %192, %195 : vector<2x8x8xf32>
    %197 = arith.truncf %196 : vector<2x8x8xf32> to vector<2x8x8xbf16>
    "tpu.trace_start"() <{level = 10 : i32, message = "bqk,bkd->bqd"}> : () -> ()
    %cst_71 = arith.constant dense<0.000000e+00> : vector<2x8x8xf32>
    %198 = tpu.matmul %197, %186, %cst_71 {dimension_numbers = #tpu.dot_dimension_numbers<[2], [1], [1], [2], [0, 0, 0, 1, 1, 2], [0], [0]>} : vector<2x8x8xbf16>, vector<2x8x8xbf16>, vector<2x8x8xf32> -> vector<2x8x8xf32>
    "tpu.trace_stop"() : () -> ()
    %c0_72 = arith.constant 0 : index
    %c0_73 = arith.constant 0 : index
    %c8_74 = arith.constant 8 : index
    %199 = vector.load %arg25[%c0_72, %c0_73, %c8_74] : memref<2x8x32xf32, #tpu.memory_space<vmem>>, vector<2x8x8xf32>
    tpu.vector_store %arg25[%c0_72, %c0_73, %c8_74], %198 {strides = array<i32>} : memref<2x8x32xf32, #tpu.memory_space<vmem>>, vector<2x8x8xf32>,
    %200 = arith.addf %177, %196 : vector<2x8x8xf32>
    %201 = vector.extract_strided_slice %159 {offsets = [0, 0, 16], sizes = [2, 8, 8], strides = [1, 1, 1]} : vector<2x8x32xf32> to vector<2x8x8xf32>
    %202 = arith.truncf %201 : vector<2x8x8xf32> to vector<2x8x8xbf16>
    %203 = vector.extract_strided_slice %160 {offsets = [0, 0, 16], sizes = [2, 8, 8], strides = [1, 1, 1]} : vector<2x8x32xf32> to vector<2x8x8xf32>
    %204 = arith.truncf %203 : vector<2x8x8xf32> to vector<2x8x8xbf16>
    %205 = vector.extract_strided_slice %161 {offsets = [0, 0, 16], sizes = [2, 8, 8], strides = [1, 1, 1]} : vector<2x8x32xf32> to vector<2x8x8xf32>
    %206 = arith.truncf %205 : vector<2x8x8xf32> to vector<2x8x8xbf16>
    "tpu.trace_start"() <{level = 10 : i32, message = "bqd,bkd->bqk"}> : () -> ()
    %cst_75 = arith.constant dense<0.000000e+00> : vector<2x8x8xf32>
    %207 = tpu.matmul %202, %204, %cst_75 {dimension_numbers = #tpu.dot_dimension_numbers<[2], [2], [1], [1], [0, 0, 0, 1, 1, 1], [0], [0]>} : vector<2x8x8xbf16>, vector<2x8x8xbf16>, vector<2x8x8xf32> -> vector<2x8x8xf32>
    "tpu.trace_stop"() : () -> ()
    %cst_76 = arith.constant dense<0xFF800000> : vector<2x8xf32>
    %208 = vector.multi_reduction <maximumf>, %207, %cst_76 [2] : vector<2x8x8xf32> to vector<2x8xf32>
    %209 = vector.shape_cast %208 : vector<2x8xf32> to vector<2x8x1xf32>
    %210 = vector.broadcast %209 : vector<2x8x1xf32> to vector<2x8x8xf32>
    %211 = arith.subf %207, %210 : vector<2x8x8xf32>
    %212 = math.exp %211 : vector<2x8x8xf32>
    %cst_77 = arith.constant dense<0.000000e+00> : vector<2x8xf32>
    %213 = vector.multi_reduction <add>, %212, %cst_77 [2] : vector<2x8x8xf32> to vector<2x8xf32>
    %214 = vector.shape_cast %213 : vector<2x8xf32> to vector<2x8x1xf32>
    %215 = vector.broadcast %214 : vector<2x8x1xf32> to vector<2x8x8xf32>
    %216 = arith.divf %212, %215 : vector<2x8x8xf32>
    %217 = arith.truncf %216 : vector<2x8x8xf32> to vector<2x8x8xbf16>
    "tpu.trace_start"() <{level = 10 : i32, message = "bqk,bkd->bqd"}> : () -> ()
    %cst_78 = arith.constant dense<0.000000e+00> : vector<2x8x8xf32>
    %218 = tpu.matmul %217, %206, %cst_78 {dimension_numbers = #tpu.dot_dimension_numbers<[2], [1], [1], [2], [0, 0, 0, 1, 1, 2], [0], [0]>} : vector<2x8x8xbf16>, vector<2x8x8xbf16>, vector<2x8x8xf32> -> vector<2x8x8xf32>
    "tpu.trace_stop"() : () -> ()
    %c0_79 = arith.constant 0 : index
    %c0_80 = arith.constant 0 : index
    %c16_81 = arith.constant 16 : index
    %219 = vector.load %arg25[%c0_79, %c0_80, %c16_81] : memref<2x8x32xf32, #tpu.memory_space<vmem>>, vector<2x8x8xf32>
    tpu.vector_store %arg25[%c0_79, %c0_80, %c16_81], %218 {strides = array<i32>} : memref<2x8x32xf32, #tpu.memory_space<vmem>>, vector<2x8x8xf32>,
    %220 = arith.addf %200, %216 : vector<2x8x8xf32>
    %221 = vector.extract_strided_slice %159 {offsets = [0, 0, 24], sizes = [2, 8, 8], strides = [1, 1, 1]} : vector<2x8x32xf32> to vector<2x8x8xf32>
    %222 = arith.truncf %221 : vector<2x8x8xf32> to vector<2x8x8xbf16>
    %223 = vector.extract_strided_slice %160 {offsets = [0, 0, 24], sizes = [2, 8, 8], strides = [1, 1, 1]} : vector<2x8x32xf32> to vector<2x8x8xf32>
    %224 = arith.truncf %223 : vector<2x8x8xf32> to vector<2x8x8xbf16>
    %225 = vector.extract_strided_slice %161 {offsets = [0, 0, 24], sizes = [2, 8, 8], strides = [1, 1, 1]} : vector<2x8x32xf32> to vector<2x8x8xf32>
    %226 = arith.truncf %225 : vector<2x8x8xf32> to vector<2x8x8xbf16>
    "tpu.trace_start"() <{level = 10 : i32, message = "bqd,bkd->bqk"}> : () -> ()
    %cst_82 = arith.constant dense<0.000000e+00> : vector<2x8x8xf32>
    %227 = tpu.matmul %222, %224, %cst_82 {dimension_numbers = #tpu.dot_dimension_numbers<[2], [2], [1], [1], [0, 0, 0, 1, 1, 1], [0], [0]>} : vector<2x8x8xbf16>, vector<2x8x8xbf16>, vector<2x8x8xf32> -> vector<2x8x8xf32>
    "tpu.trace_stop"() : () -> ()
    %cst_83 = arith.constant dense<0xFF800000> : vector<2x8xf32>
    %228 = vector.multi_reduction <maximumf>, %227, %cst_83 [2] : vector<2x8x8xf32> to vector<2x8xf32>
    %229 = vector.shape_cast %228 : vector<2x8xf32> to vector<2x8x1xf32>
    %230 = vector.broadcast %229 : vector<2x8x1xf32> to vector<2x8x8xf32>
    %231 = arith.subf %227, %230 : vector<2x8x8xf32>
    %232 = math.exp %231 : vector<2x8x8xf32>
    %cst_84 = arith.constant dense<0.000000e+00> : vector<2x8xf32>
    %233 = vector.multi_reduction <add>, %232, %cst_84 [2] : vector<2x8x8xf32> to vector<2x8xf32>
    %234 = vector.shape_cast %233 : vector<2x8xf32> to vector<2x8x1xf32>
    %235 = vector.broadcast %234 : vector<2x8x1xf32> to vector<2x8x8xf32>
    %236 = arith.divf %232, %235 : vector<2x8x8xf32>
    %237 = arith.truncf %236 : vector<2x8x8xf32> to vector<2x8x8xbf16>
    "tpu.trace_start"() <{level = 10 : i32, message = "bqk,bkd->bqd"}> : () -> ()
    %cst_85 = arith.constant dense<0.000000e+00> : vector<2x8x8xf32>
    %238 = tpu.matmul %237, %226, %cst_85 {dimension_numbers = #tpu.dot_dimension_numbers<[2], [1], [1], [2], [0, 0, 0, 1, 1, 2], [0], [0]>} : vector<2x8x8xbf16>, vector<2x8x8xbf16>, vector<2x8x8xf32> -> vector<2x8x8xf32>
    "tpu.trace_stop"() : () -> ()
    %c0_86 = arith.constant 0 : index
    %c0_87 = arith.constant 0 : index
    %c24_88 = arith.constant 24 : index
    %239 = vector.load %arg25[%c0_86, %c0_87, %c24_88] : memref<2x8x32xf32, #tpu.memory_space<vmem>>, vector<2x8x8xf32>
    tpu.vector_store %arg25[%c0_86, %c0_87, %c24_88], %238 {strides = array<i32>} : memref<2x8x32xf32, #tpu.memory_space<vmem>>, vector<2x8x8xf32>,
    %240 = arith.addf %220, %236 : vector<2x8x8xf32>
    %c0_89 = arith.constant 0 : index
    %c0_90 = arith.constant 0 : index
    %c0_91 = arith.constant 0 : index
    %241 = vector.load %arg25[%c0_89, %c0_90, %c0_91] : memref<2x8x32xf32, #tpu.memory_space<vmem>>, vector<2x8x32xf32>
    %242 = vector.shape_cast %241 : vector<2x8x32xf32> to vector<16x32xf32>
    %cst_92 = arith.constant 2.500000e-01 : f32
    %243 = vector.broadcast %cst_92 : f32 to vector<2x8x8xf32>
    %244 = arith.mulf %240, %243 : vector<2x8x8xf32>
    %c0_93 = arith.constant 0 : index
    %c0_94 = arith.constant 0 : index
    %c0_95 = arith.constant 0 : index
    %245 = vector.load %arg24[%c0_93, %c0_94, %c0_95] : memref<2x8x8xf32, #tpu.memory_space<vmem>>, vector<2x8x8xf32>
    tpu.vector_store %arg24[%c0_93, %c0_94, %c0_95], %244 {strides = array<i32>} : memref<2x8x8xf32, #tpu.memory_space<vmem>>, vector<2x8x8xf32>,
    %246 = arith.truncf %242 : vector<16x32xf32> to vector<16x32xbf16>
    %c0_96 = arith.constant 0 : index
    %c0_97 = arith.constant 0 : index
    %247 = vector.load %arg13[%c0_96, %c0_97] : memref<32x32xbf16, #tpu.memory_space<vmem>>, vector<32x32xbf16>
    %cst_98 = arith.constant dense<0.000000e+00> : vector<16x32xf32>
    %248 = tpu.matmul %246, %247, %cst_98 {dimension_numbers = #tpu.dot_dimension_numbers<[1], [0], [0], [1], [0, 0, 1, 1], [], []>} : vector<16x32xbf16>, vector<32x32xbf16>, vector<16x32xf32> -> vector<16x32xf32>
    %c0_99 = arith.constant 0 : index
    %c0_100 = arith.constant 0 : index
    %249 = vector.load %arg14[%c0_99, %c0_100] : memref<1x32xf32, #tpu.memory_space<vmem>>, vector<1x32xf32>
    %250 = vector.broadcast %249 : vector<1x32xf32> to vector<16x32xf32>
    %251 = arith.addf %248, %250 : vector<16x32xf32>
    %252 = arith.addf %144, %251 : vector<16x32xf32>
    %cst_101 = arith.constant dense<0.000000e+00> : vector<16xf32>
    %253 = vector.multi_reduction <add>, %252, %cst_101 [1] : vector<16x32xf32> to vector<16xf32>
    %254 = vector.shape_cast %253 : vector<16xf32> to vector<16x1xf32>
    %cst_102 = arith.constant 3.200000e+01 : f32
    %255 = vector.broadcast %cst_102 : f32 to vector<16x1xf32>
    %256 = arith.divf %254, %255 : vector<16x1xf32>
    %257 = vector.broadcast %256 : vector<16x1xf32> to vector<16x32xf32>
    %258 = arith.subf %252, %257 : vector<16x32xf32>
    %259 = arith.mulf %258, %258 : vector<16x32xf32>
    %cst_103 = arith.constant dense<0.000000e+00> : vector<16xf32>
    %260 = vector.multi_reduction <add>, %259, %cst_103 [1] : vector<16x32xf32> to vector<16xf32>
    %261 = vector.shape_cast %260 : vector<16xf32> to vector<16x1xf32>
    %cst_104 = arith.constant 3.200000e+01 : f32
    %262 = vector.broadcast %cst_104 : f32 to vector<16x1xf32>
    %263 = arith.divf %261, %262 : vector<16x1xf32>
    %264 = vector.broadcast %256 : vector<16x1xf32> to vector<16x32xf32>
    %265 = arith.subf %252, %264 : vector<16x32xf32>
    %cst_105 = arith.constant 9.99999974E-6 : f32
    %266 = vector.broadcast %cst_105 : f32 to vector<16x1xf32>
    %267 = arith.addf %263, %266 : vector<16x1xf32>
    %268 = math.rsqrt %267 : vector<16x1xf32>
    %269 = vector.broadcast %268 : vector<16x1xf32> to vector<16x32xf32>
    %270 = arith.mulf %265, %269 : vector<16x32xf32>
    %c0_106 = arith.constant 0 : index
    %c0_107 = arith.constant 0 : index
    %271 = vector.load %arg15[%c0_106, %c0_107] : memref<1x32xf32, #tpu.memory_space<vmem>>, vector<1x32xf32>
    %272 = vector.broadcast %271 : vector<1x32xf32> to vector<16x32xf32>
    %273 = arith.mulf %270, %272 : vector<16x32xf32>
    %c0_108 = arith.constant 0 : index
    %c0_109 = arith.constant 0 : index
    %274 = vector.load %arg16[%c0_108, %c0_109] : memref<1x32xf32, #tpu.memory_space<vmem>>, vector<1x32xf32>
    %275 = vector.broadcast %274 : vector<1x32xf32> to vector<16x32xf32>
    %276 = arith.addf %273, %275 : vector<16x32xf32>
    %277 = arith.truncf %276 : vector<16x32xf32> to vector<16x32xbf16>
    %c0_110 = arith.constant 0 : index
    %c0_111 = arith.constant 0 : index
    %278 = vector.load %arg17[%c0_110, %c0_111] : memref<32x64xbf16, #tpu.memory_space<vmem>>, vector<32x64xbf16>
    %cst_112 = arith.constant dense<0.000000e+00> : vector<16x64xf32>
    %279 = tpu.matmul %277, %278, %cst_112 {dimension_numbers = #tpu.dot_dimension_numbers<[1], [0], [0], [1], [0, 0, 1, 1], [], []>} : vector<16x32xbf16>, vector<32x64xbf16>, vector<16x64xf32> -> vector<16x64xf32>
    %c0_113 = arith.constant 0 : index
    %c0_114 = arith.constant 0 : index
    %280 = vector.load %arg18[%c0_113, %c0_114] : memref<1x64xf32, #tpu.memory_space<vmem>>, vector<1x64xf32>
    %281 = vector.broadcast %280 : vector<1x64xf32> to vector<16x64xf32>
    %282 = arith.addf %279, %281 : vector<16x64xf32>
    %cst_115 = arith.constant 0.000000e+00 : f32
    %283 = vector.broadcast %cst_115 : f32 to vector<16x64xf32>
    %284 = arith.maximumf %282, %283 : vector<16x64xf32>
    %285 = arith.truncf %284 : vector<16x64xf32> to vector<16x64xbf16>
    %c0_116 = arith.constant 0 : index
    %c0_117 = arith.constant 0 : index
    %286 = vector.load %arg19[%c0_116, %c0_117] : memref<64x32xbf16, #tpu.memory_space<vmem>>, vector<64x32xbf16>
    %cst_118 = arith.constant dense<0.000000e+00> : vector<16x32xf32>
    %287 = tpu.matmul %285, %286, %cst_118 {dimension_numbers = #tpu.dot_dimension_numbers<[1], [0], [0], [1], [0, 0, 1, 1], [], []>} : vector<16x64xbf16>, vector<64x32xbf16>, vector<16x32xf32> -> vector<16x32xf32>
    %c0_119 = arith.constant 0 : index
    %c0_120 = arith.constant 0 : index
    %288 = vector.load %arg20[%c0_119, %c0_120] : memref<1x32xf32, #tpu.memory_space<vmem>>, vector<1x32xf32>
    %289 = vector.broadcast %288 : vector<1x32xf32> to vector<16x32xf32>
    %290 = arith.addf %287, %289 : vector<16x32xf32>
    %291 = arith.addf %276, %290 : vector<16x32xf32>
    %cst_121 = arith.constant dense<0.000000e+00> : vector<16xf32>
    %292 = vector.multi_reduction <add>, %291, %cst_121 [1] : vector<16x32xf32> to vector<16xf32>
    %293 = vector.shape_cast %292 : vector<16xf32> to vector<16x1xf32>
    %cst_122 = arith.constant 3.200000e+01 : f32
    %294 = vector.broadcast %cst_122 : f32 to vector<16x1xf32>
    %295 = arith.divf %293, %294 : vector<16x1xf32>
    %296 = vector.broadcast %295 : vector<16x1xf32> to vector<16x32xf32>
    %297 = arith.subf %291, %296 : vector<16x32xf32>
    %298 = arith.mulf %297, %297 : vector<16x32xf32>
    %cst_123 = arith.constant dense<0.000000e+00> : vector<16xf32>
    %299 = vector.multi_reduction <add>, %298, %cst_123 [1] : vector<16x32xf32> to vector<16xf32>
    %300 = vector.shape_cast %299 : vector<16xf32> to vector<16x1xf32>
    %cst_124 = arith.constant 3.200000e+01 : f32
    %301 = vector.broadcast %cst_124 : f32 to vector<16x1xf32>
    %302 = arith.divf %300, %301 : vector<16x1xf32>
    %303 = vector.broadcast %295 : vector<16x1xf32> to vector<16x32xf32>
    %304 = arith.subf %291, %303 : vector<16x32xf32>
    %cst_125 = arith.constant 9.99999974E-6 : f32
    %305 = vector.broadcast %cst_125 : f32 to vector<16x1xf32>
    %306 = arith.addf %302, %305 : vector<16x1xf32>
    %307 = math.rsqrt %306 : vector<16x1xf32>
    %308 = vector.broadcast %307 : vector<16x1xf32> to vector<16x32xf32>
    %309 = arith.mulf %304, %308 : vector<16x32xf32>
    %c0_126 = arith.constant 0 : index
    %c0_127 = arith.constant 0 : index
    %310 = vector.load %arg21[%c0_126, %c0_127] : memref<1x32xf32, #tpu.memory_space<vmem>>, vector<1x32xf32>
    %311 = vector.broadcast %310 : vector<1x32xf32> to vector<16x32xf32>
    %312 = arith.mulf %309, %311 : vector<16x32xf32>
    %c0_128 = arith.constant 0 : index
    %c0_129 = arith.constant 0 : index
    %313 = vector.load %arg22[%c0_128, %c0_129] : memref<1x32xf32, #tpu.memory_space<vmem>>, vector<1x32xf32>
    %314 = vector.broadcast %313 : vector<1x32xf32> to vector<16x32xf32>
    %315 = arith.addf %312, %314 : vector<16x32xf32>
    %c0_130 = arith.constant 0 : index
    %c0_131 = arith.constant 0 : index
    %316 = vector.load %arg23[%c0_130, %c0_131] : memref<16x32xf32, #tpu.memory_space<vmem>>, vector<16x32xf32>
    tpu.vector_store %arg23[%c0_130, %c0_131], %315 {strides = array<i32>} : memref<16x32xf32, #tpu.memory_space<vmem>>, vector<16x32xf32>,
    return
  }
  func.func @transform_0(%arg0: i32) -> (i32, i32) {
    %c0_i32 = arith.constant 0 : i32
    %c0_i32_0 = arith.constant 0 : i32
    %c0_i32_1 = arith.constant 0 : i32
    return %c0_i32, %c0_i32_0 : i32, i32
  }
  func.func @transform_1(%arg0: i32) -> (i32, i32) {
    %c0_i32 = arith.constant 0 : i32
    %c0_i32_0 = arith.constant 0 : i32
    %c0_i32_1 = arith.constant 0 : i32
    return %c0_i32, %c0_i32_0 : i32, i32
  }
  func.func @transform_2(%arg0: i32) -> (i32, i32) {
    %c0_i32 = arith.constant 0 : i32
    %c0_i32_0 = arith.constant 0 : i32
    %c0_i32_1 = arith.constant 0 : i32
    return %c0_i32, %c0_i32_0 : i32, i32
  }
  func.func @transform_3(%arg0: i32) -> (i32, i32) {
    %c0_i32 = arith.constant 0 : i32
    %c0_i32_0 = arith.constant 0 : i32
    %c0_i32_1 = arith.constant 0 : i32
    return %c0_i32, %c0_i32_0 : i32, i32
  }
  func.func @transform_4(%arg0: i32) -> (i32, i32) {
    %c0_i32 = arith.constant 0 : i32
    %c0_i32_0 = arith.constant 0 : i32
    %c0_i32_1 = arith.constant 0 : i32
    return %c0_i32, %c0_i32_0 : i32, i32
  }
  func.func @transform_5(%arg0: i32) -> (i32, i32) {
    %c0_i32 = arith.constant 0 : i32
    %c0_i32_0 = arith.constant 0 : i32
    %c0_i32_1 = arith.constant 0 : i32
    return %c0_i32, %c0_i32_0 : i32, i32
  }
  func.func @transform_6(%arg0: i32) -> (i32, i32) {
    %c0_i32 = arith.constant 0 : i32
    %c0_i32_0 = arith.constant 0 : i32
    %c0_i32_1 = arith.constant 0 : i32
    return %c0_i32, %c0_i32_0 : i32, i32
  }
  func.func @transform_7(%arg0: i32) -> (i32, i32) {
    %c0_i32 = arith.constant 0 : i32
    %c0_i32_0 = arith.constant 0 : i32
    %c0_i32_1 = arith.constant 0 : i32
    return %c0_i32, %c0_i32_0 : i32, i32
  }
  func.func @transform_8(%arg0: i32) -> (i32, i32) {
    %c0_i32 = arith.constant 0 : i32
    %c0_i32_0 = arith.constant 0 : i32
    %c0_i32_1 = arith.constant 0 : i32
    return %c0_i32, %c0_i32_0 : i32, i32
  }
  func.func @transform_9(%arg0: i32) -> (i32, i32) {
    %c0_i32 = arith.constant 0 : i32
    %c0_i32_0 = arith.constant 0 : i32
    %c0_i32_1 = arith.constant 0 : i32
    return %c0_i32, %c0_i32_0 : i32, i32
  }
  func.func @transform_10(%arg0: i32) -> (i32, i32) {
    %c0_i32 = arith.constant 0 : i32
    %c0_i32_0 = arith.constant 0 : i32
    %c0_i32_1 = arith.constant 0 : i32
    return %c0_i32, %c0_i32_0 : i32, i32
  }
  func.func @transform_11(%arg0: i32) -> (i32, i32) {
    %c0_i32 = arith.constant 0 : i32
    %c0_i32_0 = arith.constant 0 : i32
    %c0_i32_1 = arith.constant 0 : i32
    return %c0_i32, %c0_i32_0 : i32, i32
  }
  func.func @transform_12(%arg0: i32) -> (i32, i32) {
    %c0_i32 = arith.constant 0 : i32
    %c0_i32_0 = arith.constant 0 : i32
    %c0_i32_1 = arith.constant 0 : i32
    return %c0_i32, %c0_i32_0 : i32, i32
  }
  func.func @transform_13(%arg0: i32) -> (i32, i32) {
    %c0_i32 = arith.constant 0 : i32
    %c0_i32_0 = arith.constant 0 : i32
    %c0_i32_1 = arith.constant 0 : i32
    return %c0_i32, %c0_i32_0 : i32, i32
  }
  func.func @transform_14(%arg0: i32) -> (i32, i32) {
    %c0_i32 = arith.constant 0 : i32
    %c0_i32_0 = arith.constant 0 : i32
    %c0_i32_1 = arith.constant 0 : i32
    return %c0_i32, %c0_i32_0 : i32, i32
  }
  func.func @transform_15(%arg0: i32) -> (i32, i32) {
    %c0_i32 = arith.constant 0 : i32
    %c0_i32_0 = arith.constant 0 : i32
    %c0_i32_1 = arith.constant 0 : i32
    return %c0_i32, %c0_i32_0 : i32, i32
  }
  func.func @transform_16(%arg0: i32) -> (i32, i32) {
    %c0_i32 = arith.constant 0 : i32
    %c0_i32_0 = arith.constant 0 : i32
    %c0_i32_1 = arith.constant 0 : i32
    return %c0_i32, %c0_i32_0 : i32, i32
  }
  func.func @transform_17(%arg0: i32) -> (i32, i32) {
    %c0_i32 = arith.constant 0 : i32
    %c0_i32_0 = arith.constant 0 : i32
    %c0_i32_1 = arith.constant 0 : i32
    return %c0_i32, %c0_i32_0 : i32, i32
  }
  func.func @transform_18(%arg0: i32) -> (i32, i32) {
    %c0_i32 = arith.constant 0 : i32
    %c0_i32_0 = arith.constant 0 : i32
    %c0_i32_1 = arith.constant 0 : i32
    return %c0_i32, %c0_i32_0 : i32, i32
  }
  func.func @transform_19(%arg0: i32) -> (i32, i32) {
    %c0_i32 = arith.constant 0 : i32
    %c0_i32_0 = arith.constant 0 : i32
    %c0_i32_1 = arith.constant 0 : i32
    return %c0_i32, %c0_i32_0 : i32, i32
  }
  func.func @transform_20(%arg0: i32) -> (i32, i32) {
    %c0_i32 = arith.constant 0 : i32
    %c0_i32_0 = arith.constant 0 : i32
    %c0_i32_1 = arith.constant 0 : i32
    return %c0_i32, %c0_i32_0 : i32, i32
  }
  func.func @transform_21(%arg0: i32) -> (i32, i32) {
    %c0_i32 = arith.constant 0 : i32
    %c0_i32_0 = arith.constant 0 : i32
    %c0_i32_1 = arith.constant 0 : i32
    return %c0_i32, %c0_i32_0 : i32, i32
  }
  func.func @transform_22(%arg0: i32) -> (i32, i32) {
    %c0_i32 = arith.constant 0 : i32
    %c0_i32_0 = arith.constant 0 : i32
    %c0_i32_1 = arith.constant 0 : i32
    return %c0_i32, %c0_i32_0 : i32, i32
  }
  func.func @transform_23(%arg0: i32) -> (i32, i32, i32) {
    %c0_i32 = arith.constant 0 : i32
    %c0_i32_0 = arith.constant 0 : i32
    %c0_i32_1 = arith.constant 0 : i32
    %c0_i32_2 = arith.constant 0 : i32
    return %c0_i32, %c0_i32_0, %c0_i32_1 : i32, i32, i32
  }
}

module attributes {stable_mosaic.version = 11 : i64} {
  func.func @kernel(%arg0: i32, %arg1: memref<16x32xf32, #tpu.memory_space<vmem>>, %arg2: memref<16x32xf32, #tpu.memory_space<vmem>>, %arg3: memref<32x96xbf16, #tpu.memory_space<vmem>>, %arg4: memref<1x96xf32, #tpu.memory_space<vmem>>, %arg5: memref<32x32xbf16, #tpu.memory_space<vmem>>, %arg6: memref<1x32xf32, #tpu.memory_space<vmem>>, %arg7: memref<1x32xf32, #tpu.memory_space<vmem>>, %arg8: memref<1x32xf32, #tpu.memory_space<vmem>>, %arg9: memref<32x32xbf16, #tpu.memory_space<vmem>>, %arg10: memref<1x32xf32, #tpu.memory_space<vmem>>, %arg11: memref<32x64xbf16, #tpu.memory_space<vmem>>, %arg12: memref<1x64xf32, #tpu.memory_space<vmem>>, %arg13: memref<32x32xbf16, #tpu.memory_space<vmem>>, %arg14: memref<1x32xf32, #tpu.memory_space<vmem>>, %arg15: memref<1x32xf32, #tpu.memory_space<vmem>>, %arg16: memref<1x32xf32, #tpu.memory_space<vmem>>, %arg17: memref<32x64xbf16, #tpu.memory_space<vmem>>, %arg18: memref<1x64xf32, #tpu.memory_space<vmem>>, %arg19: memref<64x32xbf16, #tpu.memory_space<vmem>>, %arg20: memref<1x32xf32, #tpu.memory_space<vmem>>, %arg21: memref<1x32xf32, #tpu.memory_space<vmem>>, %arg22: memref<1x32xf32, #tpu.memory_space<vmem>>, %arg23: memref<1x32xf32, #tpu.memory_space<vmem>>, %arg24: memref<1x32xf32, #tpu.memory_space<vmem>>, %arg25: memref<16x32xf32, #tpu.memory_space<vmem>>, %arg26: memref<2x8x8xf32, #tpu.memory_space<vmem>>, %arg27: memref<2x8x32xf32, #tpu.memory_space<vmem>>) attributes {dimension_semantics = [#tpu.dimension_semantics<arbitrary>], iteration_bounds = array<i64: 1>, scalar_prefetch = 0 : i64, scratch_operands = 1 : i64, tpu.core_type = #tpu.core_type<tc>, window_params = [{pipeline_mode = #tpu.pipeline_mode<synchronous>, transform_indices = @transform_0, window_bounds = array<i64: 16, 32>}, {pipeline_mode = #tpu.pipeline_mode<synchronous>, transform_indices = @transform_1, window_bounds = array<i64: 16, 32>}, {pipeline_mode = #tpu.pipeline_mode<synchronous>, transform_indices = @transform_2, window_bounds = array<i64: 32, 96>}, {pipeline_mode = #tpu.pipeline_mode<synchronous>, transform_indices = @transform_3, window_bounds = array<i64: 1, 96>}, {pipeline_mode = #tpu.pipeline_mode<synchronous>, transform_indices = @transform_4, window_bounds = array<i64: 32, 32>}, {pipeline_mode = #tpu.pipeline_mode<synchronous>, transform_indices = @transform_5, window_bounds = array<i64: 1, 32>}, {pipeline_mode = #tpu.pipeline_mode<synchronous>, transform_indices = @transform_6, window_bounds = array<i64: 1, 32>}, {pipeline_mode = #tpu.pipeline_mode<synchronous>, transform_indices = @transform_7, window_bounds = array<i64: 1, 32>}, {pipeline_mode = #tpu.pipeline_mode<synchronous>, transform_indices = @transform_8, window_bounds = array<i64: 32, 32>}, {pipeline_mode = #tpu.pipeline_mode<synchronous>, transform_indices = @transform_9, window_bounds = array<i64: 1, 32>}, {pipeline_mode = #tpu.pipeline_mode<synchronous>, transform_indices = @transform_10, window_bounds = array<i64: 32, 64>}, {pipeline_mode = #tpu.pipeline_mode<synchronous>, transform_indices = @transform_11, window_bounds = array<i64: 1, 64>}, {pipeline_mode = #tpu.pipeline_mode<synchronous>, transform_indices = @transform_12, window_bounds = array<i64: 32, 32>}, {pipeline_mode = #tpu.pipeline_mode<synchronous>, transform_indices = @transform_13, window_bounds = array<i64: 1, 32>}, {pipeline_mode = #tpu.pipeline_mode<synchronous>, transform_indices = @transform_14, window_bounds = array<i64: 1, 32>}, {pipeline_mode = #tpu.pipeline_mode<synchronous>, transform_indices = @transform_15, window_bounds = array<i64: 1, 32>}, {pipeline_mode = #tpu.pipeline_mode<synchronous>, transform_indices = @transform_16, window_bounds = array<i64: 32, 64>}, {pipeline_mode = #tpu.pipeline_mode<synchronous>, transform_indices = @transform_17, window_bounds = array<i64: 1, 64>}, {pipeline_mode = #tpu.pipeline_mode<synchronous>, transform_indices = @transform_18, window_bounds = array<i64: 64, 32>}, {pipeline_mode = #tpu.pipeline_mode<synchronous>, transform_indices = @transform_19, window_bounds = array<i64: 1, 32>}, {pipeline_mode = #tpu.pipeline_mode<synchronous>, transform_indices = @transform_20, window_bounds = array<i64: 1, 32>}, {pipeline_mode = #tpu.pipeline_mode<synchronous>, transform_indices = @transform_21, window_bounds = array<i64: 1, 32>}, {pipeline_mode = #tpu.pipeline_mode<synchronous>, transform_indices = @transform_22, window_bounds = array<i64: 1, 32>}, {pipeline_mode = #tpu.pipeline_mode<synchronous>, transform_indices = @transform_23, window_bounds = array<i64: 1, 32>}, {pipeline_mode = #tpu.pipeline_mode<synchronous>, transform_indices = @transform_24, window_bounds = array<i64: 16, 32>}, {pipeline_mode = #tpu.pipeline_mode<synchronous>, transform_indices = @transform_25, window_bounds = array<i64: 2, 8, 8>}]} {
    %c0 = arith.constant 0 : index
    %c0_0 = arith.constant 0 : index
    %0 = vector.load %arg1[%c0, %c0_0] : memref<16x32xf32, #tpu.memory_space<vmem>>, vector<16x32xf32>
    %c0_1 = arith.constant 0 : index
    %c0_2 = arith.constant 0 : index
    %1 = vector.load %arg2[%c0_1, %c0_2] : memref<16x32xf32, #tpu.memory_space<vmem>>, vector<16x32xf32>
    %2 = tpu.iota {dimensions = array<i32: 0>} : vector<8x8xi32>
    %3 = tpu.iota {dimensions = array<i32: 1>} : vector<8x8xi32>
    %4 = arith.cmpi sgt, %3, %2 : vector<8x8xi32>
    %cst = arith.constant -1.000000e+09 : f32
    %cst_3 = arith.constant 0.000000e+00 : f32
    %5 = vector.broadcast %cst : f32 to vector<8x8xf32>
    %6 = vector.broadcast %cst_3 : f32 to vector<8x8xf32>
    %7 = arith.select %4, %5, %6 : vector<8x8xi1>, vector<8x8xf32>
    %8 = arith.truncf %0 : vector<16x32xf32> to vector<16x32xbf16>
    %c0_4 = arith.constant 0 : index
    %c0_5 = arith.constant 0 : index
    %9 = vector.load %arg3[%c0_4, %c0_5] : memref<32x96xbf16, #tpu.memory_space<vmem>>, vector<32x96xbf16>
    %cst_6 = arith.constant dense<0.000000e+00> : vector<16x96xf32>
    %10 = tpu.matmul %8, %9, %cst_6 {dimension_numbers = #tpu.dot_dimension_numbers<[1], [0], [0], [1], [0, 0, 1, 1], [], []>} : vector<16x32xbf16>, vector<32x96xbf16>, vector<16x96xf32> -> vector<16x96xf32>
    %c0_7 = arith.constant 0 : index
    %c0_8 = arith.constant 0 : index
    %11 = vector.load %arg4[%c0_7, %c0_8] : memref<1x96xf32, #tpu.memory_space<vmem>>, vector<1x96xf32>
    %12 = vector.broadcast %11 : vector<1x96xf32> to vector<16x96xf32>
    %13 = arith.addf %10, %12 : vector<16x96xf32>
    %14 = vector.extract_strided_slice %13 {offsets = [0, 0], sizes = [16, 32], strides = [1, 1]} : vector<16x96xf32> to vector<16x32xf32>
    %15 = vector.extract_strided_slice %13 {offsets = [0, 32], sizes = [16, 32], strides = [1, 1]} : vector<16x96xf32> to vector<16x32xf32>
    %16 = vector.extract_strided_slice %13 {offsets = [0, 64], sizes = [16, 32], strides = [1, 1]} : vector<16x96xf32> to vector<16x32xf32>
    %17 = vector.shape_cast %14 : vector<16x32xf32> to vector<2x8x32xf32>
    %18 = vector.shape_cast %15 : vector<16x32xf32> to vector<2x8x32xf32>
    %19 = vector.shape_cast %16 : vector<16x32xf32> to vector<2x8x32xf32>
    %20 = vector.extract_strided_slice %17 {offsets = [0, 0, 0], sizes = [2, 8, 8], strides = [1, 1, 1]} : vector<2x8x32xf32> to vector<2x8x8xf32>
    %21 = arith.truncf %20 : vector<2x8x8xf32> to vector<2x8x8xbf16>
    %22 = vector.extract_strided_slice %18 {offsets = [0, 0, 0], sizes = [2, 8, 8], strides = [1, 1, 1]} : vector<2x8x32xf32> to vector<2x8x8xf32>
    %23 = arith.truncf %22 : vector<2x8x8xf32> to vector<2x8x8xbf16>
    %24 = vector.extract_strided_slice %19 {offsets = [0, 0, 0], sizes = [2, 8, 8], strides = [1, 1, 1]} : vector<2x8x32xf32> to vector<2x8x8xf32>
    %25 = arith.truncf %24 : vector<2x8x8xf32> to vector<2x8x8xbf16>
    "tpu.trace_start"() <{level = 10 : i32, message = "bqd,bkd->bqk"}> : () -> ()
    %cst_9 = arith.constant dense<0.000000e+00> : vector<2x8x8xf32>
    %26 = tpu.matmul %21, %23, %cst_9 {dimension_numbers = #tpu.dot_dimension_numbers<[2], [2], [1], [1], [0, 0, 0, 1, 1, 1], [0], [0]>} : vector<2x8x8xbf16>, vector<2x8x8xbf16>, vector<2x8x8xf32> -> vector<2x8x8xf32>
    "tpu.trace_stop"() : () -> ()
    %27 = vector.shape_cast %7 : vector<8x8xf32> to vector<1x8x8xf32>
    %28 = vector.broadcast %27 : vector<1x8x8xf32> to vector<2x8x8xf32>
    %29 = arith.addf %26, %28 : vector<2x8x8xf32>
    %cst_10 = arith.constant dense<0xFF800000> : vector<2x8xf32>
    %30 = vector.multi_reduction <maximumf>, %29, %cst_10 [2] : vector<2x8x8xf32> to vector<2x8xf32>
    %31 = vector.shape_cast %30 : vector<2x8xf32> to vector<2x8x1xf32>
    %32 = vector.broadcast %31 : vector<2x8x1xf32> to vector<2x8x8xf32>
    %33 = arith.subf %29, %32 : vector<2x8x8xf32>
    %34 = math.exp %33 : vector<2x8x8xf32>
    %cst_11 = arith.constant dense<0.000000e+00> : vector<2x8xf32>
    %35 = vector.multi_reduction <add>, %34, %cst_11 [2] : vector<2x8x8xf32> to vector<2x8xf32>
    %36 = vector.shape_cast %35 : vector<2x8xf32> to vector<2x8x1xf32>
    %37 = tpu.reciprocal %36 {approx = true} : vector<2x8x1xf32> -> vector<2x8x1xf32>
    %38 = vector.broadcast %37 : vector<2x8x1xf32> to vector<2x8x8xf32>
    %39 = arith.mulf %34, %38 : vector<2x8x8xf32>
    %40 = arith.truncf %39 : vector<2x8x8xf32> to vector<2x8x8xbf16>
    "tpu.trace_start"() <{level = 10 : i32, message = "bqk,bkd->bqd"}> : () -> ()
    %cst_12 = arith.constant dense<0.000000e+00> : vector<2x8x8xf32>
    %41 = tpu.matmul %40, %25, %cst_12 {dimension_numbers = #tpu.dot_dimension_numbers<[2], [1], [1], [2], [0, 0, 0, 1, 1, 2], [0], [0]>} : vector<2x8x8xbf16>, vector<2x8x8xbf16>, vector<2x8x8xf32> -> vector<2x8x8xf32>
    "tpu.trace_stop"() : () -> ()
    %c0_13 = arith.constant 0 : index
    %c0_14 = arith.constant 0 : index
    %c0_15 = arith.constant 0 : index
    %42 = vector.load %arg27[%c0_13, %c0_14, %c0_15] : memref<2x8x32xf32, #tpu.memory_space<vmem>>, vector<2x8x8xf32>
    tpu.vector_store %arg27[%c0_13, %c0_14, %c0_15], %41 {strides = array<i32>} : memref<2x8x32xf32, #tpu.memory_space<vmem>>, vector<2x8x8xf32>,
    %43 = vector.extract_strided_slice %17 {offsets = [0, 0, 8], sizes = [2, 8, 8], strides = [1, 1, 1]} : vector<2x8x32xf32> to vector<2x8x8xf32>
    %44 = arith.truncf %43 : vector<2x8x8xf32> to vector<2x8x8xbf16>
    %45 = vector.extract_strided_slice %18 {offsets = [0, 0, 8], sizes = [2, 8, 8], strides = [1, 1, 1]} : vector<2x8x32xf32> to vector<2x8x8xf32>
    %46 = arith.truncf %45 : vector<2x8x8xf32> to vector<2x8x8xbf16>
    %47 = vector.extract_strided_slice %19 {offsets = [0, 0, 8], sizes = [2, 8, 8], strides = [1, 1, 1]} : vector<2x8x32xf32> to vector<2x8x8xf32>
    %48 = arith.truncf %47 : vector<2x8x8xf32> to vector<2x8x8xbf16>
    "tpu.trace_start"() <{level = 10 : i32, message = "bqd,bkd->bqk"}> : () -> ()
    %cst_16 = arith.constant dense<0.000000e+00> : vector<2x8x8xf32>
    %49 = tpu.matmul %44, %46, %cst_16 {dimension_numbers = #tpu.dot_dimension_numbers<[2], [2], [1], [1], [0, 0, 0, 1, 1, 1], [0], [0]>} : vector<2x8x8xbf16>, vector<2x8x8xbf16>, vector<2x8x8xf32> -> vector<2x8x8xf32>
    "tpu.trace_stop"() : () -> ()
    %50 = vector.shape_cast %7 : vector<8x8xf32> to vector<1x8x8xf32>
    %51 = vector.broadcast %50 : vector<1x8x8xf32> to vector<2x8x8xf32>
    %52 = arith.addf %49, %51 : vector<2x8x8xf32>
    %cst_17 = arith.constant dense<0xFF800000> : vector<2x8xf32>
    %53 = vector.multi_reduction <maximumf>, %52, %cst_17 [2] : vector<2x8x8xf32> to vector<2x8xf32>
    %54 = vector.shape_cast %53 : vector<2x8xf32> to vector<2x8x1xf32>
    %55 = vector.broadcast %54 : vector<2x8x1xf32> to vector<2x8x8xf32>
    %56 = arith.subf %52, %55 : vector<2x8x8xf32>
    %57 = math.exp %56 : vector<2x8x8xf32>
    %cst_18 = arith.constant dense<0.000000e+00> : vector<2x8xf32>
    %58 = vector.multi_reduction <add>, %57, %cst_18 [2] : vector<2x8x8xf32> to vector<2x8xf32>
    %59 = vector.shape_cast %58 : vector<2x8xf32> to vector<2x8x1xf32>
    %60 = tpu.reciprocal %59 {approx = true} : vector<2x8x1xf32> -> vector<2x8x1xf32>
    %61 = vector.broadcast %60 : vector<2x8x1xf32> to vector<2x8x8xf32>
    %62 = arith.mulf %57, %61 : vector<2x8x8xf32>
    %63 = arith.truncf %62 : vector<2x8x8xf32> to vector<2x8x8xbf16>
    "tpu.trace_start"() <{level = 10 : i32, message = "bqk,bkd->bqd"}> : () -> ()
    %cst_19 = arith.constant dense<0.000000e+00> : vector<2x8x8xf32>
    %64 = tpu.matmul %63, %48, %cst_19 {dimension_numbers = #tpu.dot_dimension_numbers<[2], [1], [1], [2], [0, 0, 0, 1, 1, 2], [0], [0]>} : vector<2x8x8xbf16>, vector<2x8x8xbf16>, vector<2x8x8xf32> -> vector<2x8x8xf32>
    "tpu.trace_stop"() : () -> ()
    %c0_20 = arith.constant 0 : index
    %c0_21 = arith.constant 0 : index
    %c8 = arith.constant 8 : index
    %65 = vector.load %arg27[%c0_20, %c0_21, %c8] : memref<2x8x32xf32, #tpu.memory_space<vmem>>, vector<2x8x8xf32>
    tpu.vector_store %arg27[%c0_20, %c0_21, %c8], %64 {strides = array<i32>} : memref<2x8x32xf32, #tpu.memory_space<vmem>>, vector<2x8x8xf32>,
    %66 = vector.extract_strided_slice %17 {offsets = [0, 0, 16], sizes = [2, 8, 8], strides = [1, 1, 1]} : vector<2x8x32xf32> to vector<2x8x8xf32>
    %67 = arith.truncf %66 : vector<2x8x8xf32> to vector<2x8x8xbf16>
    %68 = vector.extract_strided_slice %18 {offsets = [0, 0, 16], sizes = [2, 8, 8], strides = [1, 1, 1]} : vector<2x8x32xf32> to vector<2x8x8xf32>
    %69 = arith.truncf %68 : vector<2x8x8xf32> to vector<2x8x8xbf16>
    %70 = vector.extract_strided_slice %19 {offsets = [0, 0, 16], sizes = [2, 8, 8], strides = [1, 1, 1]} : vector<2x8x32xf32> to vector<2x8x8xf32>
    %71 = arith.truncf %70 : vector<2x8x8xf32> to vector<2x8x8xbf16>
    "tpu.trace_start"() <{level = 10 : i32, message = "bqd,bkd->bqk"}> : () -> ()
    %cst_22 = arith.constant dense<0.000000e+00> : vector<2x8x8xf32>
    %72 = tpu.matmul %67, %69, %cst_22 {dimension_numbers = #tpu.dot_dimension_numbers<[2], [2], [1], [1], [0, 0, 0, 1, 1, 1], [0], [0]>} : vector<2x8x8xbf16>, vector<2x8x8xbf16>, vector<2x8x8xf32> -> vector<2x8x8xf32>
    "tpu.trace_stop"() : () -> ()
    %73 = vector.shape_cast %7 : vector<8x8xf32> to vector<1x8x8xf32>
    %74 = vector.broadcast %73 : vector<1x8x8xf32> to vector<2x8x8xf32>
    %75 = arith.addf %72, %74 : vector<2x8x8xf32>
    %cst_23 = arith.constant dense<0xFF800000> : vector<2x8xf32>
    %76 = vector.multi_reduction <maximumf>, %75, %cst_23 [2] : vector<2x8x8xf32> to vector<2x8xf32>
    %77 = vector.shape_cast %76 : vector<2x8xf32> to vector<2x8x1xf32>
    %78 = vector.broadcast %77 : vector<2x8x1xf32> to vector<2x8x8xf32>
    %79 = arith.subf %75, %78 : vector<2x8x8xf32>
    %80 = math.exp %79 : vector<2x8x8xf32>
    %cst_24 = arith.constant dense<0.000000e+00> : vector<2x8xf32>
    %81 = vector.multi_reduction <add>, %80, %cst_24 [2] : vector<2x8x8xf32> to vector<2x8xf32>
    %82 = vector.shape_cast %81 : vector<2x8xf32> to vector<2x8x1xf32>
    %83 = tpu.reciprocal %82 {approx = true} : vector<2x8x1xf32> -> vector<2x8x1xf32>
    %84 = vector.broadcast %83 : vector<2x8x1xf32> to vector<2x8x8xf32>
    %85 = arith.mulf %80, %84 : vector<2x8x8xf32>
    %86 = arith.truncf %85 : vector<2x8x8xf32> to vector<2x8x8xbf16>
    "tpu.trace_start"() <{level = 10 : i32, message = "bqk,bkd->bqd"}> : () -> ()
    %cst_25 = arith.constant dense<0.000000e+00> : vector<2x8x8xf32>
    %87 = tpu.matmul %86, %71, %cst_25 {dimension_numbers = #tpu.dot_dimension_numbers<[2], [1], [1], [2], [0, 0, 0, 1, 1, 2], [0], [0]>} : vector<2x8x8xbf16>, vector<2x8x8xbf16>, vector<2x8x8xf32> -> vector<2x8x8xf32>
    "tpu.trace_stop"() : () -> ()
    %c0_26 = arith.constant 0 : index
    %c0_27 = arith.constant 0 : index
    %c16 = arith.constant 16 : index
    %88 = vector.load %arg27[%c0_26, %c0_27, %c16] : memref<2x8x32xf32, #tpu.memory_space<vmem>>, vector<2x8x8xf32>
    tpu.vector_store %arg27[%c0_26, %c0_27, %c16], %87 {strides = array<i32>} : memref<2x8x32xf32, #tpu.memory_space<vmem>>, vector<2x8x8xf32>,
    %89 = vector.extract_strided_slice %17 {offsets = [0, 0, 24], sizes = [2, 8, 8], strides = [1, 1, 1]} : vector<2x8x32xf32> to vector<2x8x8xf32>
    %90 = arith.truncf %89 : vector<2x8x8xf32> to vector<2x8x8xbf16>
    %91 = vector.extract_strided_slice %18 {offsets = [0, 0, 24], sizes = [2, 8, 8], strides = [1, 1, 1]} : vector<2x8x32xf32> to vector<2x8x8xf32>
    %92 = arith.truncf %91 : vector<2x8x8xf32> to vector<2x8x8xbf16>
    %93 = vector.extract_strided_slice %19 {offsets = [0, 0, 24], sizes = [2, 8, 8], strides = [1, 1, 1]} : vector<2x8x32xf32> to vector<2x8x8xf32>
    %94 = arith.truncf %93 : vector<2x8x8xf32> to vector<2x8x8xbf16>
    "tpu.trace_start"() <{level = 10 : i32, message = "bqd,bkd->bqk"}> : () -> ()
    %cst_28 = arith.constant dense<0.000000e+00> : vector<2x8x8xf32>
    %95 = tpu.matmul %90, %92, %cst_28 {dimension_numbers = #tpu.dot_dimension_numbers<[2], [2], [1], [1], [0, 0, 0, 1, 1, 1], [0], [0]>} : vector<2x8x8xbf16>, vector<2x8x8xbf16>, vector<2x8x8xf32> -> vector<2x8x8xf32>
    "tpu.trace_stop"() : () -> ()
    %96 = vector.shape_cast %7 : vector<8x8xf32> to vector<1x8x8xf32>
    %97 = vector.broadcast %96 : vector<1x8x8xf32> to vector<2x8x8xf32>
    %98 = arith.addf %95, %97 : vector<2x8x8xf32>
    %cst_29 = arith.constant dense<0xFF800000> : vector<2x8xf32>
    %99 = vector.multi_reduction <maximumf>, %98, %cst_29 [2] : vector<2x8x8xf32> to vector<2x8xf32>
    %100 = vector.shape_cast %99 : vector<2x8xf32> to vector<2x8x1xf32>
    %101 = vector.broadcast %100 : vector<2x8x1xf32> to vector<2x8x8xf32>
    %102 = arith.subf %98, %101 : vector<2x8x8xf32>
    %103 = math.exp %102 : vector<2x8x8xf32>
    %cst_30 = arith.constant dense<0.000000e+00> : vector<2x8xf32>
    %104 = vector.multi_reduction <add>, %103, %cst_30 [2] : vector<2x8x8xf32> to vector<2x8xf32>
    %105 = vector.shape_cast %104 : vector<2x8xf32> to vector<2x8x1xf32>
    %106 = tpu.reciprocal %105 {approx = true} : vector<2x8x1xf32> -> vector<2x8x1xf32>
    %107 = vector.broadcast %106 : vector<2x8x1xf32> to vector<2x8x8xf32>
    %108 = arith.mulf %103, %107 : vector<2x8x8xf32>
    %109 = arith.truncf %108 : vector<2x8x8xf32> to vector<2x8x8xbf16>
    "tpu.trace_start"() <{level = 10 : i32, message = "bqk,bkd->bqd"}> : () -> ()
    %cst_31 = arith.constant dense<0.000000e+00> : vector<2x8x8xf32>
    %110 = tpu.matmul %109, %94, %cst_31 {dimension_numbers = #tpu.dot_dimension_numbers<[2], [1], [1], [2], [0, 0, 0, 1, 1, 2], [0], [0]>} : vector<2x8x8xbf16>, vector<2x8x8xbf16>, vector<2x8x8xf32> -> vector<2x8x8xf32>
    "tpu.trace_stop"() : () -> ()
    %c0_32 = arith.constant 0 : index
    %c0_33 = arith.constant 0 : index
    %c24 = arith.constant 24 : index
    %111 = vector.load %arg27[%c0_32, %c0_33, %c24] : memref<2x8x32xf32, #tpu.memory_space<vmem>>, vector<2x8x8xf32>
    tpu.vector_store %arg27[%c0_32, %c0_33, %c24], %110 {strides = array<i32>} : memref<2x8x32xf32, #tpu.memory_space<vmem>>, vector<2x8x8xf32>,
    %c0_34 = arith.constant 0 : index
    %c0_35 = arith.constant 0 : index
    %c0_36 = arith.constant 0 : index
    %112 = vector.load %arg27[%c0_34, %c0_35, %c0_36] : memref<2x8x32xf32, #tpu.memory_space<vmem>>, vector<2x8x32xf32>
    %113 = vector.shape_cast %112 : vector<2x8x32xf32> to vector<16x32xf32>
    %114 = arith.truncf %113 : vector<16x32xf32> to vector<16x32xbf16>
    %c0_37 = arith.constant 0 : index
    %c0_38 = arith.constant 0 : index
    %115 = vector.load %arg5[%c0_37, %c0_38] : memref<32x32xbf16, #tpu.memory_space<vmem>>, vector<32x32xbf16>
    %cst_39 = arith.constant dense<0.000000e+00> : vector<16x32xf32>
    %116 = tpu.matmul %114, %115, %cst_39 {dimension_numbers = #tpu.dot_dimension_numbers<[1], [0], [0], [1], [0, 0, 1, 1], [], []>} : vector<16x32xbf16>, vector<32x32xbf16>, vector<16x32xf32> -> vector<16x32xf32>
    %c0_40 = arith.constant 0 : index
    %c0_41 = arith.constant 0 : index
    %117 = vector.load %arg6[%c0_40, %c0_41] : memref<1x32xf32, #tpu.memory_space<vmem>>, vector<1x32xf32>
    %118 = vector.broadcast %117 : vector<1x32xf32> to vector<16x32xf32>
    %119 = arith.addf %116, %118 : vector<16x32xf32>
    %120 = arith.addf %0, %119 : vector<16x32xf32>
    %cst_42 = arith.constant dense<0.000000e+00> : vector<16xf32>
    %121 = vector.multi_reduction <add>, %120, %cst_42 [1] : vector<16x32xf32> to vector<16xf32>
    %122 = vector.shape_cast %121 : vector<16xf32> to vector<16x1xf32>
    %cst_43 = arith.constant 3.200000e+01 : f32
    %123 = vector.broadcast %cst_43 : f32 to vector<16x1xf32>
    %124 = arith.divf %122, %123 : vector<16x1xf32>
    %125 = vector.broadcast %124 : vector<16x1xf32> to vector<16x32xf32>
    %126 = arith.subf %120, %125 : vector<16x32xf32>
    %127 = arith.mulf %126, %126 : vector<16x32xf32>
    %cst_44 = arith.constant dense<0.000000e+00> : vector<16xf32>
    %128 = vector.multi_reduction <add>, %127, %cst_44 [1] : vector<16x32xf32> to vector<16xf32>
    %129 = vector.shape_cast %128 : vector<16xf32> to vector<16x1xf32>
    %cst_45 = arith.constant 3.200000e+01 : f32
    %130 = vector.broadcast %cst_45 : f32 to vector<16x1xf32>
    %131 = arith.divf %129, %130 : vector<16x1xf32>
    %132 = vector.broadcast %124 : vector<16x1xf32> to vector<16x32xf32>
    %133 = arith.subf %120, %132 : vector<16x32xf32>
    %cst_46 = arith.constant 9.99999974E-6 : f32
    %134 = vector.broadcast %cst_46 : f32 to vector<16x1xf32>
    %135 = arith.addf %131, %134 : vector<16x1xf32>
    %136 = math.rsqrt %135 : vector<16x1xf32>
    %137 = vector.broadcast %136 : vector<16x1xf32> to vector<16x32xf32>
    %138 = arith.mulf %133, %137 : vector<16x32xf32>
    %c0_47 = arith.constant 0 : index
    %c0_48 = arith.constant 0 : index
    %139 = vector.load %arg7[%c0_47, %c0_48] : memref<1x32xf32, #tpu.memory_space<vmem>>, vector<1x32xf32>
    %140 = vector.broadcast %139 : vector<1x32xf32> to vector<16x32xf32>
    %141 = arith.mulf %138, %140 : vector<16x32xf32>
    %c0_49 = arith.constant 0 : index
    %c0_50 = arith.constant 0 : index
    %142 = vector.load %arg8[%c0_49, %c0_50] : memref<1x32xf32, #tpu.memory_space<vmem>>, vector<1x32xf32>
    %143 = vector.broadcast %142 : vector<1x32xf32> to vector<16x32xf32>
    %144 = arith.addf %141, %143 : vector<16x32xf32>
    %145 = arith.truncf %144 : vector<16x32xf32> to vector<16x32xbf16>
    %c0_51 = arith.constant 0 : index
    %c0_52 = arith.constant 0 : index
    %146 = vector.load %arg9[%c0_51, %c0_52] : memref<32x32xbf16, #tpu.memory_space<vmem>>, vector<32x32xbf16>
    %cst_53 = arith.constant dense<0.000000e+00> : vector<16x32xf32>
    %147 = tpu.matmul %145, %146, %cst_53 {dimension_numbers = #tpu.dot_dimension_numbers<[1], [0], [0], [1], [0, 0, 1, 1], [], []>} : vector<16x32xbf16>, vector<32x32xbf16>, vector<16x32xf32> -> vector<16x32xf32>
    %c0_54 = arith.constant 0 : index
    %c0_55 = arith.constant 0 : index
    %148 = vector.load %arg10[%c0_54, %c0_55] : memref<1x32xf32, #tpu.memory_space<vmem>>, vector<1x32xf32>
    %149 = vector.broadcast %148 : vector<1x32xf32> to vector<16x32xf32>
    %150 = arith.addf %147, %149 : vector<16x32xf32>
    %151 = arith.truncf %1 : vector<16x32xf32> to vector<16x32xbf16>
    %c0_56 = arith.constant 0 : index
    %c0_57 = arith.constant 0 : index
    %152 = vector.load %arg11[%c0_56, %c0_57] : memref<32x64xbf16, #tpu.memory_space<vmem>>, vector<32x64xbf16>
    %cst_58 = arith.constant dense<0.000000e+00> : vector<16x64xf32>
    %153 = tpu.matmul %151, %152, %cst_58 {dimension_numbers = #tpu.dot_dimension_numbers<[1], [0], [0], [1], [0, 0, 1, 1], [], []>} : vector<16x32xbf16>, vector<32x64xbf16>, vector<16x64xf32> -> vector<16x64xf32>
    %c0_59 = arith.constant 0 : index
    %c0_60 = arith.constant 0 : index
    %154 = vector.load %arg12[%c0_59, %c0_60] : memref<1x64xf32, #tpu.memory_space<vmem>>, vector<1x64xf32>
    %155 = vector.broadcast %154 : vector<1x64xf32> to vector<16x64xf32>
    %156 = arith.addf %153, %155 : vector<16x64xf32>
    %157 = vector.extract_strided_slice %156 {offsets = [0, 0], sizes = [16, 32], strides = [1, 1]} : vector<16x64xf32> to vector<16x32xf32>
    %158 = vector.extract_strided_slice %156 {offsets = [0, 32], sizes = [16, 32], strides = [1, 1]} : vector<16x64xf32> to vector<16x32xf32>
    %159 = vector.shape_cast %150 : vector<16x32xf32> to vector<2x8x32xf32>
    %160 = vector.shape_cast %157 : vector<16x32xf32> to vector<2x8x32xf32>
    %161 = vector.shape_cast %158 : vector<16x32xf32> to vector<2x8x32xf32>
    %162 = vector.extract_strided_slice %159 {offsets = [0, 0, 0], sizes = [2, 8, 8], strides = [1, 1, 1]} : vector<2x8x32xf32> to vector<2x8x8xf32>
    %163 = arith.truncf %162 : vector<2x8x8xf32> to vector<2x8x8xbf16>
    %164 = vector.extract_strided_slice %160 {offsets = [0, 0, 0], sizes = [2, 8, 8], strides = [1, 1, 1]} : vector<2x8x32xf32> to vector<2x8x8xf32>
    %165 = arith.truncf %164 : vector<2x8x8xf32> to vector<2x8x8xbf16>
    %166 = vector.extract_strided_slice %161 {offsets = [0, 0, 0], sizes = [2, 8, 8], strides = [1, 1, 1]} : vector<2x8x32xf32> to vector<2x8x8xf32>
    %167 = arith.truncf %166 : vector<2x8x8xf32> to vector<2x8x8xbf16>
    "tpu.trace_start"() <{level = 10 : i32, message = "bqd,bkd->bqk"}> : () -> ()
    %cst_61 = arith.constant dense<0.000000e+00> : vector<2x8x8xf32>
    %168 = tpu.matmul %163, %165, %cst_61 {dimension_numbers = #tpu.dot_dimension_numbers<[2], [2], [1], [1], [0, 0, 0, 1, 1, 1], [0], [0]>} : vector<2x8x8xbf16>, vector<2x8x8xbf16>, vector<2x8x8xf32> -> vector<2x8x8xf32>
    "tpu.trace_stop"() : () -> ()
    %cst_62 = arith.constant dense<0xFF800000> : vector<2x8xf32>
    %169 = vector.multi_reduction <maximumf>, %168, %cst_62 [2] : vector<2x8x8xf32> to vector<2x8xf32>
    %170 = vector.shape_cast %169 : vector<2x8xf32> to vector<2x8x1xf32>
    %171 = vector.broadcast %170 : vector<2x8x1xf32> to vector<2x8x8xf32>
    %172 = arith.subf %168, %171 : vector<2x8x8xf32>
    %173 = math.exp %172 : vector<2x8x8xf32>
    %cst_63 = arith.constant dense<0.000000e+00> : vector<2x8xf32>
    %174 = vector.multi_reduction <add>, %173, %cst_63 [2] : vector<2x8x8xf32> to vector<2x8xf32>
    %175 = vector.shape_cast %174 : vector<2x8xf32> to vector<2x8x1xf32>
    %176 = vector.broadcast %175 : vector<2x8x1xf32> to vector<2x8x8xf32>
    %177 = arith.divf %173, %176 : vector<2x8x8xf32>
    %178 = arith.truncf %177 : vector<2x8x8xf32> to vector<2x8x8xbf16>
    "tpu.trace_start"() <{level = 10 : i32, message = "bqk,bkd->bqd"}> : () -> ()
    %cst_64 = arith.constant dense<0.000000e+00> : vector<2x8x8xf32>
    %179 = tpu.matmul %178, %167, %cst_64 {dimension_numbers = #tpu.dot_dimension_numbers<[2], [1], [1], [2], [0, 0, 0, 1, 1, 2], [0], [0]>} : vector<2x8x8xbf16>, vector<2x8x8xbf16>, vector<2x8x8xf32> -> vector<2x8x8xf32>
    "tpu.trace_stop"() : () -> ()
    %c0_65 = arith.constant 0 : index
    %c0_66 = arith.constant 0 : index
    %c0_67 = arith.constant 0 : index
    %180 = vector.load %arg27[%c0_65, %c0_66, %c0_67] : memref<2x8x32xf32, #tpu.memory_space<vmem>>, vector<2x8x8xf32>
    tpu.vector_store %arg27[%c0_65, %c0_66, %c0_67], %179 {strides = array<i32>} : memref<2x8x32xf32, #tpu.memory_space<vmem>>, vector<2x8x8xf32>,
    %181 = vector.extract_strided_slice %159 {offsets = [0, 0, 8], sizes = [2, 8, 8], strides = [1, 1, 1]} : vector<2x8x32xf32> to vector<2x8x8xf32>
    %182 = arith.truncf %181 : vector<2x8x8xf32> to vector<2x8x8xbf16>
    %183 = vector.extract_strided_slice %160 {offsets = [0, 0, 8], sizes = [2, 8, 8], strides = [1, 1, 1]} : vector<2x8x32xf32> to vector<2x8x8xf32>
    %184 = arith.truncf %183 : vector<2x8x8xf32> to vector<2x8x8xbf16>
    %185 = vector.extract_strided_slice %161 {offsets = [0, 0, 8], sizes = [2, 8, 8], strides = [1, 1, 1]} : vector<2x8x32xf32> to vector<2x8x8xf32>
    %186 = arith.truncf %185 : vector<2x8x8xf32> to vector<2x8x8xbf16>
    "tpu.trace_start"() <{level = 10 : i32, message = "bqd,bkd->bqk"}> : () -> ()
    %cst_68 = arith.constant dense<0.000000e+00> : vector<2x8x8xf32>
    %187 = tpu.matmul %182, %184, %cst_68 {dimension_numbers = #tpu.dot_dimension_numbers<[2], [2], [1], [1], [0, 0, 0, 1, 1, 1], [0], [0]>} : vector<2x8x8xbf16>, vector<2x8x8xbf16>, vector<2x8x8xf32> -> vector<2x8x8xf32>
    "tpu.trace_stop"() : () -> ()
    %cst_69 = arith.constant dense<0xFF800000> : vector<2x8xf32>
    %188 = vector.multi_reduction <maximumf>, %187, %cst_69 [2] : vector<2x8x8xf32> to vector<2x8xf32>
    %189 = vector.shape_cast %188 : vector<2x8xf32> to vector<2x8x1xf32>
    %190 = vector.broadcast %189 : vector<2x8x1xf32> to vector<2x8x8xf32>
    %191 = arith.subf %187, %190 : vector<2x8x8xf32>
    %192 = math.exp %191 : vector<2x8x8xf32>
    %cst_70 = arith.constant dense<0.000000e+00> : vector<2x8xf32>
    %193 = vector.multi_reduction <add>, %192, %cst_70 [2] : vector<2x8x8xf32> to vector<2x8xf32>
    %194 = vector.shape_cast %193 : vector<2x8xf32> to vector<2x8x1xf32>
    %195 = vector.broadcast %194 : vector<2x8x1xf32> to vector<2x8x8xf32>
    %196 = arith.divf %192, %195 : vector<2x8x8xf32>
    %197 = arith.truncf %196 : vector<2x8x8xf32> to vector<2x8x8xbf16>
    "tpu.trace_start"() <{level = 10 : i32, message = "bqk,bkd->bqd"}> : () -> ()
    %cst_71 = arith.constant dense<0.000000e+00> : vector<2x8x8xf32>
    %198 = tpu.matmul %197, %186, %cst_71 {dimension_numbers = #tpu.dot_dimension_numbers<[2], [1], [1], [2], [0, 0, 0, 1, 1, 2], [0], [0]>} : vector<2x8x8xbf16>, vector<2x8x8xbf16>, vector<2x8x8xf32> -> vector<2x8x8xf32>
    "tpu.trace_stop"() : () -> ()
    %c0_72 = arith.constant 0 : index
    %c0_73 = arith.constant 0 : index
    %c8_74 = arith.constant 8 : index
    %199 = vector.load %arg27[%c0_72, %c0_73, %c8_74] : memref<2x8x32xf32, #tpu.memory_space<vmem>>, vector<2x8x8xf32>
    tpu.vector_store %arg27[%c0_72, %c0_73, %c8_74], %198 {strides = array<i32>} : memref<2x8x32xf32, #tpu.memory_space<vmem>>, vector<2x8x8xf32>,
    %200 = arith.addf %177, %196 : vector<2x8x8xf32>
    %201 = vector.extract_strided_slice %159 {offsets = [0, 0, 16], sizes = [2, 8, 8], strides = [1, 1, 1]} : vector<2x8x32xf32> to vector<2x8x8xf32>
    %202 = arith.truncf %201 : vector<2x8x8xf32> to vector<2x8x8xbf16>
    %203 = vector.extract_strided_slice %160 {offsets = [0, 0, 16], sizes = [2, 8, 8], strides = [1, 1, 1]} : vector<2x8x32xf32> to vector<2x8x8xf32>
    %204 = arith.truncf %203 : vector<2x8x8xf32> to vector<2x8x8xbf16>
    %205 = vector.extract_strided_slice %161 {offsets = [0, 0, 16], sizes = [2, 8, 8], strides = [1, 1, 1]} : vector<2x8x32xf32> to vector<2x8x8xf32>
    %206 = arith.truncf %205 : vector<2x8x8xf32> to vector<2x8x8xbf16>
    "tpu.trace_start"() <{level = 10 : i32, message = "bqd,bkd->bqk"}> : () -> ()
    %cst_75 = arith.constant dense<0.000000e+00> : vector<2x8x8xf32>
    %207 = tpu.matmul %202, %204, %cst_75 {dimension_numbers = #tpu.dot_dimension_numbers<[2], [2], [1], [1], [0, 0, 0, 1, 1, 1], [0], [0]>} : vector<2x8x8xbf16>, vector<2x8x8xbf16>, vector<2x8x8xf32> -> vector<2x8x8xf32>
    "tpu.trace_stop"() : () -> ()
    %cst_76 = arith.constant dense<0xFF800000> : vector<2x8xf32>
    %208 = vector.multi_reduction <maximumf>, %207, %cst_76 [2] : vector<2x8x8xf32> to vector<2x8xf32>
    %209 = vector.shape_cast %208 : vector<2x8xf32> to vector<2x8x1xf32>
    %210 = vector.broadcast %209 : vector<2x8x1xf32> to vector<2x8x8xf32>
    %211 = arith.subf %207, %210 : vector<2x8x8xf32>
    %212 = math.exp %211 : vector<2x8x8xf32>
    %cst_77 = arith.constant dense<0.000000e+00> : vector<2x8xf32>
    %213 = vector.multi_reduction <add>, %212, %cst_77 [2] : vector<2x8x8xf32> to vector<2x8xf32>
    %214 = vector.shape_cast %213 : vector<2x8xf32> to vector<2x8x1xf32>
    %215 = vector.broadcast %214 : vector<2x8x1xf32> to vector<2x8x8xf32>
    %216 = arith.divf %212, %215 : vector<2x8x8xf32>
    %217 = arith.truncf %216 : vector<2x8x8xf32> to vector<2x8x8xbf16>
    "tpu.trace_start"() <{level = 10 : i32, message = "bqk,bkd->bqd"}> : () -> ()
    %cst_78 = arith.constant dense<0.000000e+00> : vector<2x8x8xf32>
    %218 = tpu.matmul %217, %206, %cst_78 {dimension_numbers = #tpu.dot_dimension_numbers<[2], [1], [1], [2], [0, 0, 0, 1, 1, 2], [0], [0]>} : vector<2x8x8xbf16>, vector<2x8x8xbf16>, vector<2x8x8xf32> -> vector<2x8x8xf32>
    "tpu.trace_stop"() : () -> ()
    %c0_79 = arith.constant 0 : index
    %c0_80 = arith.constant 0 : index
    %c16_81 = arith.constant 16 : index
    %219 = vector.load %arg27[%c0_79, %c0_80, %c16_81] : memref<2x8x32xf32, #tpu.memory_space<vmem>>, vector<2x8x8xf32>
    tpu.vector_store %arg27[%c0_79, %c0_80, %c16_81], %218 {strides = array<i32>} : memref<2x8x32xf32, #tpu.memory_space<vmem>>, vector<2x8x8xf32>,
    %220 = arith.addf %200, %216 : vector<2x8x8xf32>
    %221 = vector.extract_strided_slice %159 {offsets = [0, 0, 24], sizes = [2, 8, 8], strides = [1, 1, 1]} : vector<2x8x32xf32> to vector<2x8x8xf32>
    %222 = arith.truncf %221 : vector<2x8x8xf32> to vector<2x8x8xbf16>
    %223 = vector.extract_strided_slice %160 {offsets = [0, 0, 24], sizes = [2, 8, 8], strides = [1, 1, 1]} : vector<2x8x32xf32> to vector<2x8x8xf32>
    %224 = arith.truncf %223 : vector<2x8x8xf32> to vector<2x8x8xbf16>
    %225 = vector.extract_strided_slice %161 {offsets = [0, 0, 24], sizes = [2, 8, 8], strides = [1, 1, 1]} : vector<2x8x32xf32> to vector<2x8x8xf32>
    %226 = arith.truncf %225 : vector<2x8x8xf32> to vector<2x8x8xbf16>
    "tpu.trace_start"() <{level = 10 : i32, message = "bqd,bkd->bqk"}> : () -> ()
    %cst_82 = arith.constant dense<0.000000e+00> : vector<2x8x8xf32>
    %227 = tpu.matmul %222, %224, %cst_82 {dimension_numbers = #tpu.dot_dimension_numbers<[2], [2], [1], [1], [0, 0, 0, 1, 1, 1], [0], [0]>} : vector<2x8x8xbf16>, vector<2x8x8xbf16>, vector<2x8x8xf32> -> vector<2x8x8xf32>
    "tpu.trace_stop"() : () -> ()
    %cst_83 = arith.constant dense<0xFF800000> : vector<2x8xf32>
    %228 = vector.multi_reduction <maximumf>, %227, %cst_83 [2] : vector<2x8x8xf32> to vector<2x8xf32>
    %229 = vector.shape_cast %228 : vector<2x8xf32> to vector<2x8x1xf32>
    %230 = vector.broadcast %229 : vector<2x8x1xf32> to vector<2x8x8xf32>
    %231 = arith.subf %227, %230 : vector<2x8x8xf32>
    %232 = math.exp %231 : vector<2x8x8xf32>
    %cst_84 = arith.constant dense<0.000000e+00> : vector<2x8xf32>
    %233 = vector.multi_reduction <add>, %232, %cst_84 [2] : vector<2x8x8xf32> to vector<2x8xf32>
    %234 = vector.shape_cast %233 : vector<2x8xf32> to vector<2x8x1xf32>
    %235 = vector.broadcast %234 : vector<2x8x1xf32> to vector<2x8x8xf32>
    %236 = arith.divf %232, %235 : vector<2x8x8xf32>
    %237 = arith.truncf %236 : vector<2x8x8xf32> to vector<2x8x8xbf16>
    "tpu.trace_start"() <{level = 10 : i32, message = "bqk,bkd->bqd"}> : () -> ()
    %cst_85 = arith.constant dense<0.000000e+00> : vector<2x8x8xf32>
    %238 = tpu.matmul %237, %226, %cst_85 {dimension_numbers = #tpu.dot_dimension_numbers<[2], [1], [1], [2], [0, 0, 0, 1, 1, 2], [0], [0]>} : vector<2x8x8xbf16>, vector<2x8x8xbf16>, vector<2x8x8xf32> -> vector<2x8x8xf32>
    "tpu.trace_stop"() : () -> ()
    %c0_86 = arith.constant 0 : index
    %c0_87 = arith.constant 0 : index
    %c24_88 = arith.constant 24 : index
    %239 = vector.load %arg27[%c0_86, %c0_87, %c24_88] : memref<2x8x32xf32, #tpu.memory_space<vmem>>, vector<2x8x8xf32>
    tpu.vector_store %arg27[%c0_86, %c0_87, %c24_88], %238 {strides = array<i32>} : memref<2x8x32xf32, #tpu.memory_space<vmem>>, vector<2x8x8xf32>,
    %240 = arith.addf %220, %236 : vector<2x8x8xf32>
    %c0_89 = arith.constant 0 : index
    %c0_90 = arith.constant 0 : index
    %c0_91 = arith.constant 0 : index
    %241 = vector.load %arg27[%c0_89, %c0_90, %c0_91] : memref<2x8x32xf32, #tpu.memory_space<vmem>>, vector<2x8x32xf32>
    %242 = vector.shape_cast %241 : vector<2x8x32xf32> to vector<16x32xf32>
    %cst_92 = arith.constant 2.500000e-01 : f32
    %243 = vector.broadcast %cst_92 : f32 to vector<2x8x8xf32>
    %244 = arith.mulf %240, %243 : vector<2x8x8xf32>
    %c0_93 = arith.constant 0 : index
    %c0_94 = arith.constant 0 : index
    %c0_95 = arith.constant 0 : index
    %245 = vector.load %arg26[%c0_93, %c0_94, %c0_95] : memref<2x8x8xf32, #tpu.memory_space<vmem>>, vector<2x8x8xf32>
    tpu.vector_store %arg26[%c0_93, %c0_94, %c0_95], %244 {strides = array<i32>} : memref<2x8x8xf32, #tpu.memory_space<vmem>>, vector<2x8x8xf32>,
    %246 = arith.truncf %242 : vector<16x32xf32> to vector<16x32xbf16>
    %c0_96 = arith.constant 0 : index
    %c0_97 = arith.constant 0 : index
    %247 = vector.load %arg13[%c0_96, %c0_97] : memref<32x32xbf16, #tpu.memory_space<vmem>>, vector<32x32xbf16>
    %cst_98 = arith.constant dense<0.000000e+00> : vector<16x32xf32>
    %248 = tpu.matmul %246, %247, %cst_98 {dimension_numbers = #tpu.dot_dimension_numbers<[1], [0], [0], [1], [0, 0, 1, 1], [], []>} : vector<16x32xbf16>, vector<32x32xbf16>, vector<16x32xf32> -> vector<16x32xf32>
    %c0_99 = arith.constant 0 : index
    %c0_100 = arith.constant 0 : index
    %249 = vector.load %arg14[%c0_99, %c0_100] : memref<1x32xf32, #tpu.memory_space<vmem>>, vector<1x32xf32>
    %250 = vector.broadcast %249 : vector<1x32xf32> to vector<16x32xf32>
    %251 = arith.addf %248, %250 : vector<16x32xf32>
    %252 = arith.addf %144, %251 : vector<16x32xf32>
    %cst_101 = arith.constant dense<0.000000e+00> : vector<16xf32>
    %253 = vector.multi_reduction <add>, %252, %cst_101 [1] : vector<16x32xf32> to vector<16xf32>
    %254 = vector.shape_cast %253 : vector<16xf32> to vector<16x1xf32>
    %cst_102 = arith.constant 3.200000e+01 : f32
    %255 = vector.broadcast %cst_102 : f32 to vector<16x1xf32>
    %256 = arith.divf %254, %255 : vector<16x1xf32>
    %257 = vector.broadcast %256 : vector<16x1xf32> to vector<16x32xf32>
    %258 = arith.subf %252, %257 : vector<16x32xf32>
    %259 = arith.mulf %258, %258 : vector<16x32xf32>
    %cst_103 = arith.constant dense<0.000000e+00> : vector<16xf32>
    %260 = vector.multi_reduction <add>, %259, %cst_103 [1] : vector<16x32xf32> to vector<16xf32>
    %261 = vector.shape_cast %260 : vector<16xf32> to vector<16x1xf32>
    %cst_104 = arith.constant 3.200000e+01 : f32
    %262 = vector.broadcast %cst_104 : f32 to vector<16x1xf32>
    %263 = arith.divf %261, %262 : vector<16x1xf32>
    %264 = vector.broadcast %256 : vector<16x1xf32> to vector<16x32xf32>
    %265 = arith.subf %252, %264 : vector<16x32xf32>
    %cst_105 = arith.constant 9.99999974E-6 : f32
    %266 = vector.broadcast %cst_105 : f32 to vector<16x1xf32>
    %267 = arith.addf %263, %266 : vector<16x1xf32>
    %268 = math.rsqrt %267 : vector<16x1xf32>
    %269 = vector.broadcast %268 : vector<16x1xf32> to vector<16x32xf32>
    %270 = arith.mulf %265, %269 : vector<16x32xf32>
    %c0_106 = arith.constant 0 : index
    %c0_107 = arith.constant 0 : index
    %271 = vector.load %arg15[%c0_106, %c0_107] : memref<1x32xf32, #tpu.memory_space<vmem>>, vector<1x32xf32>
    %272 = vector.broadcast %271 : vector<1x32xf32> to vector<16x32xf32>
    %273 = arith.mulf %270, %272 : vector<16x32xf32>
    %c0_108 = arith.constant 0 : index
    %c0_109 = arith.constant 0 : index
    %274 = vector.load %arg16[%c0_108, %c0_109] : memref<1x32xf32, #tpu.memory_space<vmem>>, vector<1x32xf32>
    %275 = vector.broadcast %274 : vector<1x32xf32> to vector<16x32xf32>
    %276 = arith.addf %273, %275 : vector<16x32xf32>
    %277 = arith.truncf %276 : vector<16x32xf32> to vector<16x32xbf16>
    %c0_110 = arith.constant 0 : index
    %c0_111 = arith.constant 0 : index
    %278 = vector.load %arg17[%c0_110, %c0_111] : memref<32x64xbf16, #tpu.memory_space<vmem>>, vector<32x64xbf16>
    %cst_112 = arith.constant dense<0.000000e+00> : vector<16x64xf32>
    %279 = tpu.matmul %277, %278, %cst_112 {dimension_numbers = #tpu.dot_dimension_numbers<[1], [0], [0], [1], [0, 0, 1, 1], [], []>} : vector<16x32xbf16>, vector<32x64xbf16>, vector<16x64xf32> -> vector<16x64xf32>
    %c0_113 = arith.constant 0 : index
    %c0_114 = arith.constant 0 : index
    %280 = vector.load %arg18[%c0_113, %c0_114] : memref<1x64xf32, #tpu.memory_space<vmem>>, vector<1x64xf32>
    %281 = vector.broadcast %280 : vector<1x64xf32> to vector<16x64xf32>
    %282 = arith.addf %279, %281 : vector<16x64xf32>
    %cst_115 = arith.constant 0.000000e+00 : f32
    %283 = vector.broadcast %cst_115 : f32 to vector<16x64xf32>
    %284 = arith.maximumf %282, %283 : vector<16x64xf32>
    %285 = arith.truncf %284 : vector<16x64xf32> to vector<16x64xbf16>
    %c0_116 = arith.constant 0 : index
    %c0_117 = arith.constant 0 : index
    %286 = vector.load %arg19[%c0_116, %c0_117] : memref<64x32xbf16, #tpu.memory_space<vmem>>, vector<64x32xbf16>
    %cst_118 = arith.constant dense<0.000000e+00> : vector<16x32xf32>
    %287 = tpu.matmul %285, %286, %cst_118 {dimension_numbers = #tpu.dot_dimension_numbers<[1], [0], [0], [1], [0, 0, 1, 1], [], []>} : vector<16x64xbf16>, vector<64x32xbf16>, vector<16x32xf32> -> vector<16x32xf32>
    %c0_119 = arith.constant 0 : index
    %c0_120 = arith.constant 0 : index
    %288 = vector.load %arg20[%c0_119, %c0_120] : memref<1x32xf32, #tpu.memory_space<vmem>>, vector<1x32xf32>
    %289 = vector.broadcast %288 : vector<1x32xf32> to vector<16x32xf32>
    %290 = arith.addf %287, %289 : vector<16x32xf32>
    %291 = arith.addf %276, %290 : vector<16x32xf32>
    %cst_121 = arith.constant dense<0.000000e+00> : vector<16xf32>
    %292 = vector.multi_reduction <add>, %291, %cst_121 [1] : vector<16x32xf32> to vector<16xf32>
    %293 = vector.shape_cast %292 : vector<16xf32> to vector<16x1xf32>
    %cst_122 = arith.constant 3.200000e+01 : f32
    %294 = vector.broadcast %cst_122 : f32 to vector<16x1xf32>
    %295 = arith.divf %293, %294 : vector<16x1xf32>
    %296 = vector.broadcast %295 : vector<16x1xf32> to vector<16x32xf32>
    %297 = arith.subf %291, %296 : vector<16x32xf32>
    %298 = arith.mulf %297, %297 : vector<16x32xf32>
    %cst_123 = arith.constant dense<0.000000e+00> : vector<16xf32>
    %299 = vector.multi_reduction <add>, %298, %cst_123 [1] : vector<16x32xf32> to vector<16xf32>
    %300 = vector.shape_cast %299 : vector<16xf32> to vector<16x1xf32>
    %cst_124 = arith.constant 3.200000e+01 : f32
    %301 = vector.broadcast %cst_124 : f32 to vector<16x1xf32>
    %302 = arith.divf %300, %301 : vector<16x1xf32>
    %303 = vector.broadcast %295 : vector<16x1xf32> to vector<16x32xf32>
    %304 = arith.subf %291, %303 : vector<16x32xf32>
    %cst_125 = arith.constant 9.99999974E-6 : f32
    %305 = vector.broadcast %cst_125 : f32 to vector<16x1xf32>
    %306 = arith.addf %302, %305 : vector<16x1xf32>
    %307 = math.rsqrt %306 : vector<16x1xf32>
    %308 = vector.broadcast %307 : vector<16x1xf32> to vector<16x32xf32>
    %309 = arith.mulf %304, %308 : vector<16x32xf32>
    %c0_126 = arith.constant 0 : index
    %c0_127 = arith.constant 0 : index
    %310 = vector.load %arg21[%c0_126, %c0_127] : memref<1x32xf32, #tpu.memory_space<vmem>>, vector<1x32xf32>
    %311 = vector.broadcast %310 : vector<1x32xf32> to vector<16x32xf32>
    %312 = arith.mulf %309, %311 : vector<16x32xf32>
    %c0_128 = arith.constant 0 : index
    %c0_129 = arith.constant 0 : index
    %313 = vector.load %arg22[%c0_128, %c0_129] : memref<1x32xf32, #tpu.memory_space<vmem>>, vector<1x32xf32>
    %314 = vector.broadcast %313 : vector<1x32xf32> to vector<16x32xf32>
    %315 = arith.addf %312, %314 : vector<16x32xf32>
    %cst_130 = arith.constant dense<0.000000e+00> : vector<16xf32>
    %316 = vector.multi_reduction <add>, %315, %cst_130 [1] : vector<16x32xf32> to vector<16xf32>
    %317 = vector.shape_cast %316 : vector<16xf32> to vector<16x1xf32>
    %cst_131 = arith.constant 3.200000e+01 : f32
    %318 = vector.broadcast %cst_131 : f32 to vector<16x1xf32>
    %319 = arith.divf %317, %318 : vector<16x1xf32>
    %320 = vector.broadcast %319 : vector<16x1xf32> to vector<16x32xf32>
    %321 = arith.subf %315, %320 : vector<16x32xf32>
    %322 = arith.mulf %321, %321 : vector<16x32xf32>
    %cst_132 = arith.constant dense<0.000000e+00> : vector<16xf32>
    %323 = vector.multi_reduction <add>, %322, %cst_132 [1] : vector<16x32xf32> to vector<16xf32>
    %324 = vector.shape_cast %323 : vector<16xf32> to vector<16x1xf32>
    %cst_133 = arith.constant 3.200000e+01 : f32
    %325 = vector.broadcast %cst_133 : f32 to vector<16x1xf32>
    %326 = arith.divf %324, %325 : vector<16x1xf32>
    %327 = vector.broadcast %319 : vector<16x1xf32> to vector<16x32xf32>
    %328 = arith.subf %315, %327 : vector<16x32xf32>
    %cst_134 = arith.constant 9.99999974E-6 : f32
    %329 = vector.broadcast %cst_134 : f32 to vector<16x1xf32>
    %330 = arith.addf %326, %329 : vector<16x1xf32>
    %331 = math.rsqrt %330 : vector<16x1xf32>
    %332 = vector.broadcast %331 : vector<16x1xf32> to vector<16x32xf32>
    %333 = arith.mulf %328, %332 : vector<16x32xf32>
    %c0_135 = arith.constant 0 : index
    %c0_136 = arith.constant 0 : index
    %334 = vector.load %arg23[%c0_135, %c0_136] : memref<1x32xf32, #tpu.memory_space<vmem>>, vector<1x32xf32>
    %335 = vector.broadcast %334 : vector<1x32xf32> to vector<16x32xf32>
    %336 = arith.mulf %333, %335 : vector<16x32xf32>
    %c0_137 = arith.constant 0 : index
    %c0_138 = arith.constant 0 : index
    %337 = vector.load %arg24[%c0_137, %c0_138] : memref<1x32xf32, #tpu.memory_space<vmem>>, vector<1x32xf32>
    %338 = vector.broadcast %337 : vector<1x32xf32> to vector<16x32xf32>
    %339 = arith.addf %336, %338 : vector<16x32xf32>
    %c0_139 = arith.constant 0 : index
    %c0_140 = arith.constant 0 : index
    %340 = vector.load %arg25[%c0_139, %c0_140] : memref<16x32xf32, #tpu.memory_space<vmem>>, vector<16x32xf32>
    tpu.vector_store %arg25[%c0_139, %c0_140], %339 {strides = array<i32>} : memref<16x32xf32, #tpu.memory_space<vmem>>, vector<16x32xf32>,
    return
  }
  func.func @transform_0(%arg0: i32) -> (i32, i32) {
    %c0_i32 = arith.constant 0 : i32
    %c0_i32_0 = arith.constant 0 : i32
    %c0_i32_1 = arith.constant 0 : i32
    return %c0_i32, %c0_i32_0 : i32, i32
  }
  func.func @transform_1(%arg0: i32) -> (i32, i32) {
    %c0_i32 = arith.constant 0 : i32
    %c0_i32_0 = arith.constant 0 : i32
    %c0_i32_1 = arith.constant 0 : i32
    return %c0_i32, %c0_i32_0 : i32, i32
  }
  func.func @transform_2(%arg0: i32) -> (i32, i32) {
    %c0_i32 = arith.constant 0 : i32
    %c0_i32_0 = arith.constant 0 : i32
    %c0_i32_1 = arith.constant 0 : i32
    return %c0_i32, %c0_i32_0 : i32, i32
  }
  func.func @transform_3(%arg0: i32) -> (i32, i32) {
    %c0_i32 = arith.constant 0 : i32
    %c0_i32_0 = arith.constant 0 : i32
    %c0_i32_1 = arith.constant 0 : i32
    return %c0_i32, %c0_i32_0 : i32, i32
  }
  func.func @transform_4(%arg0: i32) -> (i32, i32) {
    %c0_i32 = arith.constant 0 : i32
    %c0_i32_0 = arith.constant 0 : i32
    %c0_i32_1 = arith.constant 0 : i32
    return %c0_i32, %c0_i32_0 : i32, i32
  }
  func.func @transform_5(%arg0: i32) -> (i32, i32) {
    %c0_i32 = arith.constant 0 : i32
    %c0_i32_0 = arith.constant 0 : i32
    %c0_i32_1 = arith.constant 0 : i32
    return %c0_i32, %c0_i32_0 : i32, i32
  }
  func.func @transform_6(%arg0: i32) -> (i32, i32) {
    %c0_i32 = arith.constant 0 : i32
    %c0_i32_0 = arith.constant 0 : i32
    %c0_i32_1 = arith.constant 0 : i32
    return %c0_i32, %c0_i32_0 : i32, i32
  }
  func.func @transform_7(%arg0: i32) -> (i32, i32) {
    %c0_i32 = arith.constant 0 : i32
    %c0_i32_0 = arith.constant 0 : i32
    %c0_i32_1 = arith.constant 0 : i32
    return %c0_i32, %c0_i32_0 : i32, i32
  }
  func.func @transform_8(%arg0: i32) -> (i32, i32) {
    %c0_i32 = arith.constant 0 : i32
    %c0_i32_0 = arith.constant 0 : i32
    %c0_i32_1 = arith.constant 0 : i32
    return %c0_i32, %c0_i32_0 : i32, i32
  }
  func.func @transform_9(%arg0: i32) -> (i32, i32) {
    %c0_i32 = arith.constant 0 : i32
    %c0_i32_0 = arith.constant 0 : i32
    %c0_i32_1 = arith.constant 0 : i32
    return %c0_i32, %c0_i32_0 : i32, i32
  }
  func.func @transform_10(%arg0: i32) -> (i32, i32) {
    %c0_i32 = arith.constant 0 : i32
    %c0_i32_0 = arith.constant 0 : i32
    %c0_i32_1 = arith.constant 0 : i32
    return %c0_i32, %c0_i32_0 : i32, i32
  }
  func.func @transform_11(%arg0: i32) -> (i32, i32) {
    %c0_i32 = arith.constant 0 : i32
    %c0_i32_0 = arith.constant 0 : i32
    %c0_i32_1 = arith.constant 0 : i32
    return %c0_i32, %c0_i32_0 : i32, i32
  }
  func.func @transform_12(%arg0: i32) -> (i32, i32) {
    %c0_i32 = arith.constant 0 : i32
    %c0_i32_0 = arith.constant 0 : i32
    %c0_i32_1 = arith.constant 0 : i32
    return %c0_i32, %c0_i32_0 : i32, i32
  }
  func.func @transform_13(%arg0: i32) -> (i32, i32) {
    %c0_i32 = arith.constant 0 : i32
    %c0_i32_0 = arith.constant 0 : i32
    %c0_i32_1 = arith.constant 0 : i32
    return %c0_i32, %c0_i32_0 : i32, i32
  }
  func.func @transform_14(%arg0: i32) -> (i32, i32) {
    %c0_i32 = arith.constant 0 : i32
    %c0_i32_0 = arith.constant 0 : i32
    %c0_i32_1 = arith.constant 0 : i32
    return %c0_i32, %c0_i32_0 : i32, i32
  }
  func.func @transform_15(%arg0: i32) -> (i32, i32) {
    %c0_i32 = arith.constant 0 : i32
    %c0_i32_0 = arith.constant 0 : i32
    %c0_i32_1 = arith.constant 0 : i32
    return %c0_i32, %c0_i32_0 : i32, i32
  }
  func.func @transform_16(%arg0: i32) -> (i32, i32) {
    %c0_i32 = arith.constant 0 : i32
    %c0_i32_0 = arith.constant 0 : i32
    %c0_i32_1 = arith.constant 0 : i32
    return %c0_i32, %c0_i32_0 : i32, i32
  }
  func.func @transform_17(%arg0: i32) -> (i32, i32) {
    %c0_i32 = arith.constant 0 : i32
    %c0_i32_0 = arith.constant 0 : i32
    %c0_i32_1 = arith.constant 0 : i32
    return %c0_i32, %c0_i32_0 : i32, i32
  }
  func.func @transform_18(%arg0: i32) -> (i32, i32) {
    %c0_i32 = arith.constant 0 : i32
    %c0_i32_0 = arith.constant 0 : i32
    %c0_i32_1 = arith.constant 0 : i32
    return %c0_i32, %c0_i32_0 : i32, i32
  }
  func.func @transform_19(%arg0: i32) -> (i32, i32) {
    %c0_i32 = arith.constant 0 : i32
    %c0_i32_0 = arith.constant 0 : i32
    %c0_i32_1 = arith.constant 0 : i32
    return %c0_i32, %c0_i32_0 : i32, i32
  }
  func.func @transform_20(%arg0: i32) -> (i32, i32) {
    %c0_i32 = arith.constant 0 : i32
    %c0_i32_0 = arith.constant 0 : i32
    %c0_i32_1 = arith.constant 0 : i32
    return %c0_i32, %c0_i32_0 : i32, i32
  }
  func.func @transform_21(%arg0: i32) -> (i32, i32) {
    %c0_i32 = arith.constant 0 : i32
    %c0_i32_0 = arith.constant 0 : i32
    %c0_i32_1 = arith.constant 0 : i32
    return %c0_i32, %c0_i32_0 : i32, i32
  }
  func.func @transform_22(%arg0: i32) -> (i32, i32) {
    %c0_i32 = arith.constant 0 : i32
    %c0_i32_0 = arith.constant 0 : i32
    %c0_i32_1 = arith.constant 0 : i32
    return %c0_i32, %c0_i32_0 : i32, i32
  }
  func.func @transform_23(%arg0: i32) -> (i32, i32) {
    %c0_i32 = arith.constant 0 : i32
    %c0_i32_0 = arith.constant 0 : i32
    %c0_i32_1 = arith.constant 0 : i32
    return %c0_i32, %c0_i32_0 : i32, i32
  }
  func.func @transform_24(%arg0: i32) -> (i32, i32) {
    %c0_i32 = arith.constant 0 : i32
    %c0_i32_0 = arith.constant 0 : i32
    %c0_i32_1 = arith.constant 0 : i32
    return %c0_i32, %c0_i32_0 : i32, i32
  }
  func.func @transform_25(%arg0: i32) -> (i32, i32, i32) {
    %c0_i32 = arith.constant 0 : i32
    %c0_i32_0 = arith.constant 0 : i32
    %c0_i32_1 = arith.constant 0 : i32
    %c0_i32_2 = arith.constant 0 : i32
    return %c0_i32, %c0_i32_0, %c0_i32_1 : i32, i32, i32
  }
}

</mosaic_0001>

<bundles_post_ra>
// kernel: transformer_decoder.2
= control target key start
LH: loop header
LB: loop body
LE: loop exit
PB: predicated region body
PF: predicated region fallthrough
CT: control target
= control target key end

     0   :  { %s3048_s0 = inlined_call_operand.vmem [shape: f32[16,32], index: 0, kind: input, shape index: {}]   ;;  %s3049_s1 = inlined_call_operand.vmem [shape: f32[16,32], index: 1, kind: input, shape index: {}]   ;;  %s3050_s2 = inlined_call_operand.vmem [shape: bf16[32,96], index: 2, kind: input, shape index: {}]   ;;  %s3051_s3 = inlined_call_operand.vmem [shape: f32[1,96], index: 3, kind: input, shape index: {}]   ;;  %s3052_s4 = inlined_call_operand.vmem [shape: bf16[32,32], index: 4, kind: input, shape index: {}]   ;;  %s3053_s5 = inlined_call_operand.hbm [shape: f32[1,32], index: 5, kind: input, shape index: {}]   ;;  %s3054_s6 = inlined_call_operand.hbm [shape: f32[1,32], index: 6, kind: input, shape index: {}]   ;;  %s3055_s7 = inlined_call_operand.hbm [shape: f32[1,32], index: 7, kind: input, shape index: {}]   ;;  %s3056_s8 = inlined_call_operand.vmem [shape: bf16[32,32], index: 8, kind: input, shape index: {}]   ;;  %s3057_s9 = inlined_call_operand.hbm [shape: f32[1,32], index: 9, kind: input, shape index: {}]   ;;  %s3058_s10 = inlined_call_operand.vmem [shape: bf16[32,64], index: 10, kind: input, shape index: {}]   ;;  %s3059_s11 = inlined_call_operand.hbm [shape: f32[1,64], index: 11, kind: input, shape index: {}]   ;;  %s3060_s12 = inlined_call_operand.vmem [shape: bf16[32,32], index: 12, kind: input, shape index: {}]   ;;  %s3061_s13 = inlined_call_operand.hbm [shape: f32[1,32], index: 13, kind: input, shape index: {}]   ;;  %s3062_s14 = inlined_call_operand.hbm [shape: f32[1,32], index: 14, kind: input, shape index: {}]   ;;  %s3063_s15 = inlined_call_operand.hbm [shape: f32[1,32], index: 15, kind: input, shape index: {}]   ;;  %s3064_s16 = inlined_call_operand.hbm [shape: bf16[32,64], index: 16, kind: input, shape index: {}]   ;;  %s3065_s17 = inlined_call_operand.hbm [shape: f32[1,64], index: 17, kind: input, shape index: {}]   ;;  %s3066_s18 = inlined_call_operand.vmem [shape: bf16[64,32], index: 18, kind: input, shape index: {}]   ;;  %s3067_s19 = inlined_call_operand.hbm [shape: f32[1,32], index: 19, kind: input, shape index: {}]   ;;  %s3068_s20 = inlined_call_operand.hbm [shape: f32[1,32], index: 20, kind: input, shape index: {}]   ;;  %s3069_s21 = inlined_call_operand.hbm [shape: f32[1,32], index: 21, kind: input, shape index: {}]   ;;  %s3070_s22 = inlined_call_operand.vmem [shape: f32[16,32], index: 22, kind: output, shape index: {0}]   ;;  %s3071_s23 = inlined_call_operand.hbm [shape: f32[2,8,8], index: 23, kind: output, shape index: {1}]  }
   0x1   :  { %3076 = sst [smem:[#allocation33_spill]] %s3048_s0 }
   0x2   :  { %3077 = sst [smem:[#allocation34_spill]] %s3049_s1 }
   0x3   :  { %3078 = sst [smem:[#allocation35_spill]] %s3050_s2 }
   0x4   :  { %3079 = sst [smem:[#allocation36_spill]] %s3051_s3 }
   0x5   :  { %3080 = sst [smem:[#allocation37_spill]] %s3052_s4 }
   0x6   :  { %3081 = sst [smem:[#allocation38_spill]] %s3053_s5 }
   0x7   :  { %3082 = sst [smem:[#allocation39_spill]] %s3054_s6 }
   0x8   :  { %3083 = sst [smem:[#allocation40_spill]] %s3055_s7 }
   0x9   :  { %29 = vsyncpa [#allocation4], 0 }
   0xa   :  { %30 = vsyncpa [#allocation7], 0 }
   0xb   :  { %31 = vsyncpa [#allocation10], 0 }
   0xc   :  { %32 = vsyncpa [#allocation13], 0 }
   0xd   :  { %33 = vsyncpa [#allocation16], 0 }
   0xe   :  { %34 = vsyncpa [#allocation19], 0 }
   0xf   :  { %35 = vsyncpa [#allocation22], 0  ;;  %s3084_s24 = sld [smem:[#allocation39_spill]] }
  0x15   :  { %s63_s25 = sshll.u32 %s3084_s24, 4  ;;  %s64_s25 = int_to_ptr.hbm [resolvable:$true] %s63_s25 }
  0x16   :  { %36 = vsyncpa [#allocation5], 0  ;;  %s2450_s5 = smov [#allocation6]   ;;  %s87_s6 = sshll.u32 %s3057_s9, 4  ;;  %s88_s6 = int_to_ptr.hbm [resolvable:$true] %s87_s6 }
  0x17   :  { %s65_s1 = sshll.u32 %s2450_s5, 4  ;;  %s2451_s27 = smov [#allocation9]   ;;  %s66_s1 = int_to_ptr.vmem [resolvable:$true] %s65_s1 }
  0x18   :  { %68 = dma.hbm_to_vmem [thread:$0]  %s64_s25, 16, %s66_s1, [#allocation7]  }
  0x19   :  { %s89_s7 = sshll.u32 %s2451_s27, 4  ;;  %s113_s3 = sshll.u32 %s3061_s13, 4  ;;  %s90_s7 = int_to_ptr.vmem [resolvable:$true] %s89_s7  ;;  %s114_s3 = int_to_ptr.hbm [resolvable:$true] %s113_s3 }
  0x1a   :  { %92 = dma.hbm_to_vmem [thread:$0]  %s88_s6, 16, %s90_s7, [#allocation10]  }
  0x1b   :  { %s135_s30 = sshll.u32 %s3063_s15, 4  ;;  %s2452_s24 = smov [#allocation12]   ;;  %s136_s30 = int_to_ptr.hbm [resolvable:$true] %s135_s30 }
  0x1c   :  { %s115_s5 = sshll.u32 %s2452_s24, 4  ;;  %s2453_s9 = smov [#allocation15]   ;;  %s116_s5 = int_to_ptr.vmem [resolvable:$true] %s115_s5 }
  0x1d   :  { %118 = dma.hbm_to_vmem [thread:$0]  %s114_s3, 16, %s116_s5, [#allocation13]  }
  0x1e   :  { %s137_s25 = sshll.u32 %s2453_s9, 4  ;;  %s159_s2 = sshll.u32 %s3065_s17, 4  ;;  %s138_s25 = int_to_ptr.vmem [resolvable:$true] %s137_s25  ;;  %s160_s2 = int_to_ptr.hbm [resolvable:$true] %s159_s2 }
  0x1f   :  { %140 = dma.hbm_to_vmem [thread:$0]  %s136_s30, 16, %s138_s25, [#allocation16]  }
  0x20   :  { %s183_s27 = sshll.u32 %s3068_s20, 4  ;;  %s2454_s7 = smov [#allocation18]   ;;  %s184_s27 = int_to_ptr.hbm [resolvable:$true] %s183_s27 }
  0x21   :  { %s161_s15 = sshll.u32 %s2454_s7, 4  ;;  %s2455_s28 = smov [#allocation21]   ;;  %s162_s15 = int_to_ptr.vmem [resolvable:$true] %s161_s15 }
  0x22   :  { %164 = dma.hbm_to_vmem [thread:$0]  %s160_s2, 16, %s162_s15, [#allocation19]  }
  0x23   :  { %s185_s29 = sshll.u32 %s2455_s28, 4  ;;  %s3085_s4 = sld [smem:[#allocation38_spill]]  ;;  %s186_s29 = int_to_ptr.vmem [resolvable:$true] %s185_s29 }
  0x24   :  { %188 = dma.hbm_to_vmem [thread:$0]  %s184_s27, 16, %s186_s29, [#allocation22]  }
  0x25   :  { %s3086_s5 = sld [smem:[#allocation40_spill]]  ;;  %s2456_s25 = smov [#allocation3]  }
  0x26   :  { %s54_s20 = sshll.u32 %s2456_s25, 4  ;;  %s2457_s1 = smov [#allocation8]   ;;  %s55_s20 = int_to_ptr.vmem [resolvable:$true] %s54_s20 }
  0x27   :  { %s76_s26 = sshll.u32 %s2457_s1, 4  ;;  %s100_s6 = sshll.u32 %s3059_s11, 4  ;;  %s77_s26 = int_to_ptr.vmem [resolvable:$true] %s76_s26  ;;  %s101_s6 = int_to_ptr.hbm [resolvable:$true] %s100_s6 }
  0x28   :  { %s124_s15 = sshll.u32 %s3062_s14, 4  ;;  %s2458_s28 = smov [#allocation11]   ;;  %s125_s15 = int_to_ptr.hbm [resolvable:$true] %s124_s15 }
  0x29   :  { %s52_s24 = sshll.u32 %s3085_s4, 4  ;;  %s102_s29 = sshll.u32 %s2458_s28, 4  ;;  %s53_s24 = int_to_ptr.hbm [resolvable:$true] %s52_s24  ;;  %s103_s29 = int_to_ptr.vmem [resolvable:$true] %s102_s29 }
  0x2a   :  { %57 = dma.hbm_to_vmem [thread:$0]  %s53_s24, 16, %s55_s20, [#allocation4]  }
  0x2b   :  { %s74_s9 = sshll.u32 %s3086_s5, 4  ;;  %s2459_s3 = smov [#allocation14]   ;;  %s75_s9 = int_to_ptr.hbm [resolvable:$true] %s74_s9 }
  0x2c   :  { %79 = dma.hbm_to_vmem [thread:$0]  %s75_s9, 16, %s77_s26, [#allocation7]  }
  0x2d   :  { %105 = dma.hbm_to_vmem [thread:$0]  %s101_s6, 16, %s103_s29, [#allocation10]  }
  0x2e   :  { %s126_s0 = sshll.u32 %s2459_s3, 4  ;;  %s145_s17 = sshll.u32 %s3064_s16, 4  ;;  %s127_s0 = int_to_ptr.vmem [resolvable:$true] %s126_s0  ;;  %s146_s17 = int_to_ptr.hbm [resolvable:$true] %s145_s17 }
  0x2f   :  { %129 = dma.hbm_to_vmem [thread:$0]  %s125_s15, 16, %s127_s0, [#allocation13]  }
  0x30   :  { %s2460_s11 = smov [#allocation17]   ;;  %s172_s14 = sshll.u32 %s3067_s19, 4  ;;  %s173_s14 = int_to_ptr.hbm [resolvable:$true] %s172_s14 }
  0x31   :  { %s147_s30 = sshll.u32 %s2460_s11, 4  ;;  %s2461_s25 = smov 64   ;;  %s148_s30 = int_to_ptr.vmem [resolvable:$true] %s147_s30 }
  0x32   :  { %s2462_s20 = smov 4   ;;  %s2463_s1 = smov [#allocation20]  }
  0x33   :  { %153 = dma.hbm_to_vmem [thread:$0]  %s146_s17, 256, %s148_s30, [#allocation16], %s2461_s25, %s2461_s25, %s2462_s20  }
  0x34   :  { %s174_s26 = sshll.u32 %s2463_s1, 4  ;;  %s194_s13 = sshll.u32 %s3069_s21, 4  ;;  %s175_s26 = int_to_ptr.vmem [resolvable:$true] %s174_s26  ;;  %s195_s13 = int_to_ptr.hbm [resolvable:$true] %s194_s13 }
  0x35   :  { %177 = dma.hbm_to_vmem [thread:$0]  %s173_s14, 16, %s175_s26, [#allocation19]  }
  0x36   :  { %s2464_s6 = smov [#allocation23]  }
  0x37   :  { %s196_s7 = sshll.u32 %s2464_s6, 4  ;;  %s197_s7 = int_to_ptr.vmem [resolvable:$true] %s196_s7 }
  0x38   :  { %199 = dma.hbm_to_vmem [thread:$0]  %s195_s13, 16, %s197_s7, [#allocation22]  }
  0x39   :  { %2434 = dma.done.wait [#allocation4], 16  }
  0x3a   :  { %2435 = vsyncadd [#allocation4], 4294967280 }
  0x3b   :  { %2436 = dma.done.wait [#allocation7], 32  }
  0x3c   :  { %2437 = vsyncadd [#allocation7], 4294967264 }
  0x3d   :  { %2438 = dma.done.wait [#allocation10], 32  }
  0x3e   :  { %2439 = vsyncadd [#allocation10], 4294967264 }
  0x3f   :  { %2440 = dma.done.wait [#allocation13], 32  }
  0x40   :  { %2441 = vsyncadd [#allocation13], 4294967264 }
  0x41   :  { %2442 = dma.done.wait [#allocation16], 272  }
  0x42   :  { %2443 = vsyncadd [#allocation16], 4294967024 }
  0x43   :  { %2444 = dma.done.wait [#allocation19], 32  }
  0x44   :  { %2445 = vsyncadd [#allocation19], 4294967264 }
  0x45   :  { %2446 = dma.done.wait [#allocation22], 32  }
  0x46   :  { %2447 = vsyncadd [#allocation22], 4294967264  ;;  %s3087_s27 = sld [smem:[#allocation35_spill]]  ;;  %vm284_vm0 = vcmask 261120   ;;  %s2465_s5 = smov 120   ;;  %vm309_vm1 = vcmask 64512   ;;  %v257_v38 = vlaneseq }
  0x47   :  { %s3088_s0 = sld [smem:[#allocation33_spill]]  ;;  %s2466_s9 = smov 88   ;;  %v2472_v41 = vmov 0.0   ;;  %vm382_vm3 = vcmask 1043456   ;;  %vm542_vm4 = vcmask 130112   ;;  %vm665_vm5 = vcmask 195712  }
  0x48   :  { %s3089_s30 = sld [smem:[#allocation36_spill]]  ;;  %s2467_s14 = smov 96   ;;  %v258_v39 = vshrl.u32 %v257_v38, 7  ;;  %v260_v40 = vand.u32 127, %v257_v38  ;;  %vm788_vm6 = vcmask 261312  }
  0x49   :  { %s2468_s20 = smov 112   ;;  %s2469_s1 = smov 80  }
  0x4a   :  { %s2470_s26 = smov 72   ;;  %s2471_s2 = smov 104   ;;  %vm261_vm2 = vcmp.gt.s32.totalorder %v260_v40, %v258_v39 }
  0x4b   :  { %v262_v42 = vsel %vm261_vm2, -1e+09, %v2472_v41  ;;  %s2473_s16 = smov 56   ;;  %s2475_s13 = smov 40  }
  0x4c   :  { %v1960_v0 = vld [vmem:[%s3087_s27 + $0x8] sm:$0xff]  ;;  %v1959_v1 = vld [vmem:[%s3087_s27] sm:$0xff]  ;;  %s2476_s6 = smov 8   ;;  %s2477_s7 = smov 16  }
  0x4d   :  { %v2652_v2 = vld [vmem:[%s3088_s0] sm:$0xff]  ;;  %v2657_v3 = vld [vmem:[%s3088_s0 + $0x8] sm:$0xff]  ;;  %294 = vmatpush.bf16.msra.mxu0 %v1960_v0  ;;  %s2478_s19 = smov 24   ;;  %s3090_s15 = sld [smem:[#allocation37_spill]] }
  0x4e   :  { %v263_v4 = vpack.c.bf16 %v2657_v3, %v2652_v2  ;;  %v2007_v5 = vld [vmem:[%s3089_s30] ss:$0 sm:$0xff]  ;;  %s3091_s30 = sld [smem:[#allocation34_spill]]  ;;  %s1835_s0 = sshll.u32 %s3071_s23, 4  ;;  %s1836_s0 = int_to_ptr.hbm [resolvable:$true] %s1835_s0 }
  0x4f   :  { %s2481_s4 = smov 128  }
  0x51   :  { %295 = vmatpush.bf16.msra.mxu0 %v1959_v1 }
  0x54   :  { %1864 = vmatmul.msk.bf16.vlgmr.msra.gmra.mxu0 %vm284_vm0, %v263_v4 }
  0xd1   :  { %v297_v6 = vpop.f32.mrf.mxu0 }
  0xd2   :  { %v298_v7 = vadd.f32 %v2007_v5, %v297_v6 }
  0xd4   :  { %v302_v8 = vpack.c.bf16 %v298_v7, %v298_v7 }
  0xd6   :  { %v305_v9 = vunpack.c.l.b16 %v302_v8 }
  0xd8   :  { %v2665_v10 = vpack.c.b16 %v305_v9, %v305_v9 }
  0xd9   :  { %v299_v11 = vpop.f32.mrf.mxu0 }
  0xda   :  { %v300_v12 = vadd.f32 %v2007_v5, %v299_v11  ;;  %422 = vrot.lane.b32.xlu2 %v2665_v10, %s2465_s5  ;;  %424 = vrot.lane.b32.xlu1 %v2665_v10, %s2466_s9 }
  0xdb   :  { %307 = vrot.lane.b32.xlu0 %v2665_v10, %s2467_s14 }
  0xdc   :  { %v303_v13 = vpack.c.bf16 %v300_v12, %v300_v12 }
  0xde   :  { %v330_v14 = vunpack.c.l.b16 %v303_v13 }
  0xe0   :  { %v2673_v15 = vpack.c.b16 %v330_v14, %v330_v14 }
  0xe2   :  { %445 = vrot.lane.b32.xlu2 %v2673_v15, %s2465_s5  ;;  %447 = vrot.lane.b32.xlu1 %v2673_v15, %s2466_s9 }
  0xe3   :  { %332 = vrot.lane.b32.xlu0 %v2673_v15, %s2467_s14 }
  0xea   :  { %545 = vrot.lane.b32.xlu2 %v2665_v10, %s2468_s20  ;;  %570 = vrot.lane.b32.xlu1 %v2673_v15, %s2469_s1 }
  0xeb   :  { %547 = vrot.lane.b32.xlu0 %v2665_v10, %s2469_s1 }
  0xf2   :  { %693 = vrot.lane.b32.xlu2 %v2673_v15, %s2470_s26  ;;  %670 = vrot.lane.b32.xlu1 %v2665_v10, %s2470_s26 }
  0xf3   :  { %568 = vrot.lane.b32.xlu0 %v2673_v15, %s2468_s20 }
  0xfa   :  { %691 = vrot.lane.b32.xlu1 %v2673_v15, %s2471_s2 }
  0xfb   :  { %668 = vrot.lane.b32.xlu0 %v2665_v10, %s2471_s2 }
 0x134   :  { %v423_v16 = vpop.permute.xlu2 %422 }
 0x13c   :  { %v446_v21 = vpop.permute.xlu2 %445 }
 0x144   :  { %v546_v26 = vpop.permute.xlu2 %545 }
 0x14c   :  { %v425_v17 = vpop.permute.xlu1 %424  ;;  %v694_v31 = vpop.permute.xlu2 %693 }
 0x14d   :  { %v308_v18 = vpop.permute.xlu0 %307  ;;  %v430_v19 = vsel %vm309_vm1, %v425_v17, 0  ;;  %v699_v34 = vsel %vm309_vm1, %v694_v31, 0 }
 0x14e   :  { %v314_v20 = vsel %vm309_vm1, %v308_v18, 0  ;;  %439 = vmatpush.bf16.xpose.msrb.mxu0 %v430_v19 }
 0x14f   :  { %323 = vmatpush.bf16.xpose.msra.mxu1 %v314_v20 }
 0x154   :  { %v448_v22 = vpop.permute.xlu1 %447 }
 0x155   :  { %v333_v23 = vpop.permute.xlu0 %332  ;;  %1869 = vmatmul.msk.bf16.vlgmr.msrb.gmra.mxu0 %vm309_vm1, %v423_v16  ;;  %v453_v24 = vsel %vm309_vm1, %v448_v22, 0 }
 0x156   :  { %1865 = vmatmul.msk.bf16.vlgmr.msra.gmra.mxu1 %vm309_vm1, %v302_v8  ;;  %v338_v25 = vsel %vm309_vm1, %v333_v23, 0 }
 0x157   :  { %347 = vmatpush.bf16.xpose.msra.mxu2 %v338_v25  ;;  %462 = vmatpush.bf16.xpose.msrb.mxu1 %v453_v24 }
 0x15c   :  { %v571_v27 = vpop.permute.xlu1 %570 }
 0x15d   :  { %v576_v28 = vsel %vm309_vm1, %v571_v27, 0  ;;  %v548_v29 = vpop.permute.xlu0 %547 }
 0x15e   :  { %v553_v30 = vsel %vm309_vm1, %v548_v29, 0  ;;  %1866 = vmatmul.msk.bf16.vlgmr.msra.gmra.mxu2 %vm309_vm1, %v303_v13 }
 0x15f   :  { %585 = vmatpush.bf16.xpose.msra.mxu1 %v576_v28  ;;  %562 = vmatpush.bf16.xpose.msra.mxu0 %v553_v30 }
 0x164   :  { %v671_v32 = vpop.permute.xlu1 %670 }
 0x165   :  { %v676_v33 = vsel %vm309_vm1, %v671_v32, 0  ;;  %v569_v35 = vpop.permute.xlu0 %568 }
 0x166   :  { %1870 = vmatmul.msk.bf16.vlgmr.msrb.gmra.mxu1 %vm309_vm1, %v446_v21  ;;  %1873 = vmatmul.msk.bf16.vlgmr.msra.gmra.mxu0 %vm309_vm1, %v546_v26 }
 0x167   :  { %708 = vmatpush.bf16.xpose.msrb.mxu1 %v699_v34  ;;  %685 = vmatpush.bf16.xpose.msrb.mxu0 %v676_v33 }
 0x16c   :  { %v692_v37 = vpop.permute.xlu1 %691 }
 0x16d   :  { %v669_v36 = vpop.permute.xlu0 %668 }
 0x176   :  { %1874 = vmatmul.msk.bf16.vlgmr.msra.gmra.mxu1 %vm309_vm1, %v569_v35  ;;  %1877 = vmatmul.msk.bf16.vlgmr.msrb.gmra.mxu0 %vm309_vm1, %v669_v36 }
 0x186   :  { %1878 = vmatmul.msk.bf16.vlgmr.msrb.gmra.mxu1 %vm309_vm1, %v692_v37 }
 0x1d2   :  { %v441_v43 = vpop.f32.mrf.mxu0 }
 0x1d3   :  { %v325_v44 = vpop.f32.mrf.mxu1  ;;  %v442_v45 = vadd.f32 %v441_v43, %v262_v42 }
 0x1d4   :  { %v326_v46 = vadd.f32 %v325_v44, %v262_v42 }
 0x1d5   :  { %v468_v47 = vsel %vm309_vm1, %v442_v45, -inf }
 0x1d6   :  { %469 = vmax.xlane.f32.xlu1 %v468_v47  ;;  %v353_v48 = vsel %vm309_vm1, %v326_v46, -inf }
 0x1d7   :  { %354 = vmax.xlane.f32.xlu2 %v353_v48 }
 0x1da   :  { %v443_v49 = vpop.f32.mrf.mxu0 }
 0x1db   :  { %v327_v50 = vpop.f32.mrf.mxu1 }
 0x1e1   :  { %v349_v51 = vpop.f32.mrf.mxu2 }
 0x1e2   :  { %v350_v52 = vadd.f32 %v349_v51, %v262_v42 }
 0x1e3   :  { %v464_v53 = vpop.f32.mrf.mxu1  ;;  %v564_v54 = vpop.f32.mrf.mxu0 }
 0x1e4   :  { %v465_v55 = vadd.f32 %v464_v53, %v262_v42  ;;  %v2715_v56 = vadd.f32 %v564_v54, %v262_v42  ;;  %v356_v57 = vsel %vm309_vm1, %v350_v52, -inf }
 0x1e5   :  { %357 = vmax.xlane.f32.xlu0 %v356_v57 }
 0x1e6   :  { %v471_v58 = vsel %vm309_vm1, %v465_v55, -inf  ;;  %v591_v12 = vsel %vm309_vm1, %v2715_v56, -inf }
 0x1e7   :  { %472 = vmax.xlane.f32.xlu2 %v471_v58 }
 0x1e9   :  { %v351_v59 = vpop.f32.mrf.mxu2 }
 0x1eb   :  { %v466_v60 = vpop.f32.mrf.mxu1  ;;  %v566_v61 = vpop.f32.mrf.mxu0 }
 0x1ef   :  { %399 = vrot.lane.b32.xlu1 %v2673_v15, %s2461_s25 }
 0x1f3   :  { %v587_v62 = vpop.f32.mrf.mxu1  ;;  %v687_v63 = vpop.f32.mrf.mxu0 }
 0x1f4   :  { %v588_v7 = vadd.f32 %v587_v62, %v262_v42  ;;  %v688_v11 = vadd.f32 %v687_v63, %v262_v42 }
 0x1f6   :  { %v594_v9 = vsel %vm309_vm1, %v588_v7, -inf  ;;  %v714_v13 = vsel %vm309_vm1, %v688_v11, -inf }
 0x1f7   :  { %513 = vrot.lane.b32.xlu1 %v2673_v15, %s2473_s16 }
 0x1f9   :  { %492 = vrot.lane.b32.xlu0 %v2665_v10, %s2473_s16 }
 0x1fb   :  { %v589_v0 = vpop.f32.mrf.mxu1  ;;  %v689_v1 = vpop.f32.mrf.mxu0 }
 0x1ff   :  { %377 = vrot.lane.b32.xlu2 %v2665_v10, %s2461_s25  ;;  %s2474_s25 = smov 48  }
 0x203   :  { %v710_v4 = vpop.f32.mrf.mxu1 }
 0x204   :  { %v711_v6 = vadd.f32 %v710_v4, %v262_v42 }
 0x206   :  { %v717_v8 = vsel %vm309_vm1, %v711_v6, -inf }
 0x20b   :  { %v712_v5 = vpop.f32.mrf.mxu1 }
 0x221   :  { %718 = vmax.xlane.f32.xlu1 %v717_v8 }
 0x223   :  { %595 = vmax.xlane.f32.xlu0 %v594_v9 }
 0x228   :  { %592 = vmax.xlane.f32.xlu2 %v591_v12 }
 0x22b   :  { %715 = vmax.xlane.f32.xlu0 %v714_v13 }
 0x249   :  { %v470_v14 = vpop.xlane.xlu1 %469 }
 0x24a   :  { %v474_v16 = vsub.f32 %v442_v45, %v470_v14  ;;  %v355_v17 = vpop.xlane.xlu2 %354 }
 0x24b   :  { %v359_v18 = vsub.f32 %v326_v46, %v355_v17 }
 0x24c   :  { %v476_v19 = vmul.f32 1.442695, %v474_v16 }
 0x24d   :  { %v361_v20 = vmul.f32 1.442695, %v359_v18 }
 0x24e   :  { %2020 = vpow2.f32 %v476_v19 }
 0x24f   :  { %2022 = vpow2.f32 %v361_v20 }
 0x254   :  { %v2730_v21 = vpop.eup %2020 }
 0x255   :  { %v2732_v22 = vpop.eup %2022  ;;  %v480_v23 = vsel %vm309_vm1, %v2730_v21, 0.0 }
 0x256   :  { %v365_v24 = vsel %vm309_vm1, %v2732_v22, 0.0  ;;  %481 = vadd.xlane.f32.xlu0 %v480_v23 }
 0x257   :  { %366 = vadd.xlane.f32.xlu1 %v365_v24 }
 0x258   :  { %v358_v25 = vpop.xlane.xlu0 %357 }
 0x259   :  { %v360_v26 = vsub.f32 %v350_v52, %v358_v25 }
 0x25a   :  { %v473_v27 = vpop.xlane.xlu2 %472 }
 0x25b   :  { %v363_v28 = vmul.f32 1.442695, %v360_v26  ;;  %v475_v29 = vsub.f32 %v465_v55, %v473_v27 }
 0x25d   :  { %2024 = vpow2.f32 %v363_v28  ;;  %v478_v30 = vmul.f32 1.442695, %v475_v29 }
 0x25f   :  { %2026 = vpow2.f32 %v478_v30 }
 0x261   :  { %v400_v31 = vpop.permute.xlu1 %399 }
 0x262   :  { %v378_v32 = vpop.permute.xlu2 %377  ;;  %v405_v33 = vsel %vm382_vm3, %v400_v31, 0 }
 0x263   :  { %v2739_v34 = vpop.eup %2024  ;;  %v384_v35 = vsel %vm382_vm3, %v378_v32, 0 }
 0x264   :  { %393 = vmatpush.bf16.msra.mxu3 %v384_v35  ;;  %v368_v36 = vsel %vm309_vm1, %v2739_v34, 0.0 }
 0x265   :  { %v2744_v37 = vpop.eup %2026  ;;  %369 = vadd.xlane.f32.xlu0 %v368_v36 }
 0x266   :  { %v483_v38 = vsel %vm309_vm1, %v2744_v37, 0.0 }
 0x267   :  { %484 = vadd.xlane.f32.xlu2 %v483_v38 }
 0x268   :  { %414 = vmatpush.bf16.msrb.mxu3 %v405_v33 }
 0x269   :  { %v514_v41 = vpop.permute.xlu1 %513 }
 0x26a   :  { %v519_v8 = vsel %vm382_vm3, %v514_v41, 0 }
 0x26b   :  { %v493_v39 = vpop.permute.xlu0 %492 }
 0x26c   :  { %v498_v40 = vsel %vm382_vm3, %v493_v39, 0 }
 0x26d   :  { %507 = vmatpush.bf16.msrb.mxu2 %v498_v40 }
 0x270   :  { %636 = vrot.lane.b32.xlu1 %v2673_v15, %s2474_s25 }
 0x27f   :  { %615 = vrot.lane.b32.xlu2 %v2665_v10, %s2474_s25 }
 0x294   :  { %v719_v42 = vpop.xlane.xlu1 %718 }
 0x295   :  { %v721_v43 = vsub.f32 %v711_v6, %v719_v42 }
 0x296   :  { %v596_v44 = vpop.xlane.xlu0 %595 }
 0x297   :  { %v598_v45 = vsub.f32 %v588_v7, %v596_v44  ;;  %v724_v47 = vmul.f32 1.442695, %v721_v43 }
 0x299   :  { %v601_v46 = vmul.f32 1.442695, %v598_v45 }
 0x29b   :  { %2028 = vpow2.f32 %v601_v46  ;;  %v593_v48 = vpop.xlane.xlu2 %592 }
 0x29c   :  { %v597_v49 = vsub.f32 %v2715_v56, %v593_v48  ;;  %2030 = vpow2.f32 %v724_v47 }
 0x29e   :  { %v599_v50 = vmul.f32 1.442695, %v597_v49  ;;  %v716_v51 = vpop.xlane.xlu0 %715 }
 0x29f   :  { %v720_v52 = vsub.f32 %v688_v11, %v716_v51 }
 0x2a0   :  { %2032 = vpow2.f32 %v599_v50 }
 0x2a1   :  { %v2029_v53 = vpop.eup %2028  ;;  %v722_v54 = vmul.f32 1.442695, %v720_v52 }
 0x2a2   :  { %v606_v55 = vsel %vm309_vm1, %v2029_v53, 0.0  ;;  %v2753_v57 = vpop.eup %2030 }
 0x2a3   :  { %2034 = vpow2.f32 %v722_v54  ;;  %607 = vadd.xlane.f32.xlu0 %v606_v55  ;;  %v729_v60 = vsel %vm309_vm1, %v2753_v57, 0.0 }
 0x2a6   :  { %v2033_v58 = vpop.eup %2032 }
 0x2a7   :  { %v603_v59 = vsel %vm309_vm1, %v2033_v58, 0.0 }
 0x2a8   :  { %604 = vadd.xlane.f32.xlu1 %v603_v59  ;;  %730 = vadd.xlane.f32.xlu2 %v729_v60  ;;  %v1962_v60 = vld [vmem:[%s3090_s15 + $0x8] sm:$0xff] }
 0x2a9   :  { %v2035_v56 = vpop.eup %2034  ;;  %823 = vmatpush.bf16.msra.mxu0 %v1962_v60 }
 0x2aa   :  { %v726_v61 = vsel %vm309_vm1, %v2035_v56, 0.0 }
 0x2ab   :  { %727 = vadd.xlane.f32.xlu0 %v726_v61 }
 0x2bf   :  { %738 = vrot.lane.b32.xlu0 %v2665_v10, %s2475_s13 }
 0x2c1   :  { %759 = vrot.lane.b32.xlu1 %v2673_v15, %s2475_s13 }
 0x2c9   :  { %v482_v62 = vpop.xlane.xlu0 %481 }
 0x2ca   :  { %v367_v63 = vpop.xlane.xlu1 %366  ;;  %2036 = vrcp.f32 %v482_v62 }
 0x2cb   :  { %2038 = vrcp.f32 %v367_v63 }
 0x2d0   :  { %v2037_v0 = vpop.eup %2036 }
 0x2d1   :  { %v2039_v1 = vpop.eup %2038  ;;  %v488_v4 = vmul.f32 %v2037_v0, %v2730_v21 }
 0x2d2   :  { %v373_v5 = vmul.f32 %v2039_v1, %v2732_v22 }
 0x2d3   :  { %v490_v6 = vpack.c.bf16 %v488_v4, %v488_v4 }
 0x2d4   :  { %v375_v7 = vpack.c.bf16 %v373_v5, %v373_v5 }
 0x2d5   :  { %1871 = vmatmul.msk.bf16.vlgmr.msrb.gmra.mxu2 %vm309_vm1, %v490_v6  ;;  %v2008_v6 = vld [vmem:[#allocation3] ss:$0 sm:$0xff] }
 0x2d6   :  { %1867 = vmatmul.msk.bf16.vlgmr.msra.gmra.mxu3 %vm309_vm1, %v375_v7 }
 0x2d7   :  { %528 = vmatpush.bf16.msra.mxu3 %v519_v8 }
 0x2d8   :  { %v370_v10 = vpop.xlane.xlu0 %369 }
 0x2d9   :  { %2040 = vrcp.f32 %v370_v10 }
 0x2da   :  { %v485_v15 = vpop.xlane.xlu2 %484 }
 0x2db   :  { %2042 = vrcp.f32 %v485_v15 }
 0x2df   :  { %v2041_v9 = vpop.eup %2040 }
 0x2e0   :  { %v374_v11 = vmul.f32 %v2041_v9, %v2739_v34 }
 0x2e1   :  { %v2043_v18 = vpop.eup %2042 }
 0x2e2   :  { %v616_v12 = vpop.permute.xlu2 %615  ;;  %v637_v14 = vpop.permute.xlu1 %636  ;;  %v376_v16 = vpack.c.bf16 %v374_v11, %v374_v11  ;;  %v489_v19 = vmul.f32 %v2043_v18, %v2744_v37  ;;  %v1966_v18 = vld [vmem:[%s3058_s10 + $0x8] sm:$0xff] }
 0x2e3   :  { %v621_v13 = vsel %vm382_vm3, %v616_v12, 0  ;;  %v642_v17 = vsel %vm382_vm3, %v637_v14, 0  ;;  %v2479_v14 = vmov 32.0  }
 0x2e4   :  { %630 = vmatpush.bf16.msra.mxu2 %v621_v13  ;;  %v491_v20 = vpack.c.bf16 %v489_v19, %v489_v19 }
 0x2e6   :  { %1868 = vmatmul.msk.bf16.vlgmr.msrb.gmra.mxu3 %vm309_vm1, %v376_v16 }
 0x2e7   :  { %651 = vmatpush.bf16.msrb.mxu3 %v642_v17 }
 0x2f6   :  { %1872 = vmatmul.msk.bf16.vlgmr.msra.gmra.mxu3 %vm309_vm1, %v491_v20  ;;  %v256_v20 = vld [vmem:[%s3091_s30 + $0x8] sm:$0xff] }
 0x316   :  { %v608_v21 = vpop.xlane.xlu0 %607 }
 0x317   :  { %2044 = vrcp.f32 %v608_v21 }
 0x31b   :  { %v605_v22 = vpop.xlane.xlu1 %604  ;;  %v731_v28 = vpop.xlane.xlu2 %730 }
 0x31c   :  { %2046 = vrcp.f32 %v605_v22 }
 0x31d   :  { %v2045_v23 = vpop.eup %2044  ;;  %2048 = vrcp.f32 %v731_v28 }
 0x31e   :  { %v612_v24 = vmul.f32 %v2045_v23, %v2029_v53  ;;  %v728_v30 = vpop.xlane.xlu0 %727 }
 0x31f   :  { %2050 = vrcp.f32 %v728_v30 }
 0x320   :  { %v614_v25 = vpack.c.bf16 %v612_v24, %v612_v24  ;;  %2052 = vrcp.f32 %v2479_v14 }
 0x322   :  { %1876 = vmatmul.msk.bf16.vlgmr.msrb.gmra.mxu3 %vm309_vm1, %v614_v25  ;;  %v2047_v26 = vpop.eup %2046 }
 0x323   :  { %v611_v27 = vmul.f32 %v2047_v26, %v2033_v58  ;;  %v2049_v31 = vpop.eup %2048 }
 0x324   :  { %v735_v34 = vmul.f32 %v2049_v31, %v2753_v57 }
 0x325   :  { %v613_v29 = vpack.c.bf16 %v611_v27, %v611_v27  ;;  %v2051_v32 = vpop.eup %2050 }
 0x326   :  { %v734_v35 = vmul.f32 %v2051_v32, %v2035_v56  ;;  %v737_v39 = vpack.c.bf16 %v735_v34, %v735_v34  ;;  %v1961_v56 = vld [vmem:[%s3090_s15] sm:$0xff]  ;;  %v2053_v16 = vpop.eup %2052 }
 0x327   :  { %1875 = vmatmul.msk.bf16.vlgmr.msra.gmra.mxu2 %vm309_vm1, %v613_v29  ;;  %824 = vmatpush.bf16.msra.mxu0 %v1961_v56  ;;  %v840_v17 = vmul.f32 32.0, %v2053_v16  ;;  %vm844_vm7 = vweird.f32 %v2053_v16 }
 0x328   :  { %v736_v40 = vpack.c.bf16 %v734_v35, %v734_v35  ;;  %v1964_v35 = vld [vmem:[%s3056_s8 + $0x8] sm:$0xff] }
 0x329   :  { %v841_v19 = vsub.f32 1.0, %v840_v17  ;;  %926 = vmatpush.bf16.msra.mxu1 %v1964_v35  ;;  %v2012_v17 = vld [vmem:[#allocation9] ss:$0 sm:$0xff] }
 0x32b   :  { %v842_v22 = vmul.f32 %v2053_v16, %v841_v19 }
 0x32d   :  { %v843_v23 = vadd.f32 %v2053_v16, %v842_v22 }
 0x32f   :  { %v2817_v24 = vsel %vm844_vm7, %v2053_v16, %v843_v23 }
 0x331   :  { %v739_v33 = vpop.permute.xlu0 %738 }
 0x332   :  { %v744_v36 = vsel %vm382_vm3, %v739_v33, 0 }
 0x333   :  { %v760_v37 = vpop.permute.xlu1 %759  ;;  %753 = vmatpush.bf16.msrb.mxu2 %v744_v36 }
 0x334   :  { %v765_v38 = vsel %vm382_vm3, %v760_v37, 0 }
 0x335   :  { %774 = vmatpush.bf16.msra.mxu3 %v765_v38 }
 0x337   :  { %1879 = vmatmul.msk.bf16.vlgmr.msrb.gmra.mxu2 %vm309_vm1, %v736_v40  ;;  %v2011_v40 = vld [vmem:[#allocation11] ss:$0 sm:$0xff] }
 0x338   :  { %1880 = vmatmul.msk.bf16.vlgmr.msra.gmra.mxu3 %vm309_vm1, %v737_v39  ;;  %964 = vmatpush.bf16.msra.mxu2 %v1966_v18  ;;  %v1963_v39 = vld [vmem:[%s3056_s8] sm:$0xff] }
 0x339   :  { %927 = vmatpush.bf16.msra.mxu1 %v1963_v39 }
 0x358   :  { %v509_v41 = vpop.f32.mrf.mxu2 }
 0x359   :  { %v395_v42 = vpop.f32.mrf.mxu3  ;;  %536 = vrot.lane.b32.xlu0 %v509_v41, %s2476_s6 }
 0x35a   :  { %420 = vst.msk [vmem:[#allocation2] sm:$0xff] %vm309_vm1, %v395_v42 }
 0x360   :  { %v511_v43 = vpop.f32.mrf.mxu2 }
 0x361   :  { %v397_v44 = vpop.f32.mrf.mxu3 }
 0x369   :  { %v416_v45 = vpop.f32.mrf.mxu3 }
 0x36a   :  { %421 = vst.msk [vmem:[#allocation2 + $0x8] sm:$0xff] %vm309_vm1, %v416_v45 }
 0x371   :  { %v418_v46 = vpop.f32.mrf.mxu3 }
 0x379   :  { %v530_v47 = vpop.f32.mrf.mxu3 }
 0x37a   :  { %538 = vrot.lane.b32.xlu1 %v530_v47, %s2476_s6 }
 0x381   :  { %v532_v48 = vpop.f32.mrf.mxu3 }
 0x3a5   :  { %v653_v49 = vpop.f32.mrf.mxu3 }
 0x3a6   :  { %661 = vrot.lane.b32.xlu1 %v653_v49, %s2477_s7 }
 0x3aa   :  { %v632_v50 = vpop.f32.mrf.mxu2 }
 0x3ab   :  { %659 = vrot.lane.b32.xlu0 %v632_v50, %s2477_s7 }
 0x3ad   :  { %v655_v51 = vpop.f32.mrf.mxu3 }
 0x3b2   :  { %v634_v52 = vpop.f32.mrf.mxu2 }
 0x3ba   :  { %v755_v53 = vpop.f32.mrf.mxu2 }
 0x3bb   :  { %v776_v54 = vpop.f32.mrf.mxu3  ;;  %782 = vrot.lane.b32.xlu2 %v755_v53, %s2478_s19 }
 0x3bc   :  { %784 = vrot.lane.b32.xlu0 %v776_v54, %s2478_s19 }
 0x3c2   :  { %v757_v55 = vpop.f32.mrf.mxu2 }
 0x3c3   :  { %v778_v57 = vpop.f32.mrf.mxu3 }
 0x3cb   :  { %v537_v58 = vpop.permute.xlu0 %536 }
 0x3cc   :  { %543 = vst.msk [vmem:[#allocation2] sm:$0xff] %vm542_vm4, %v537_v58 }
 0x3ec   :  { %v539_v59 = vpop.permute.xlu1 %538 }
 0x3ed   :  { %544 = vst.msk [vmem:[#allocation2 + $0x8] sm:$0xff] %vm542_vm4, %v539_v59 }
 0x415   :  { %v783_v63 = vpop.permute.xlu2 %782 }
 0x418   :  { %v662_v61 = vpop.permute.xlu1 %661 }
 0x419   :  { %667 = vst.msk [vmem:[#allocation2 + $0x8] sm:$0xff] %vm665_vm5, %v662_v61 }
 0x41d   :  { %v660_v62 = vpop.permute.xlu0 %659 }
 0x41e   :  { %666 = vst.msk [vmem:[#allocation2] sm:$0xff] %vm665_vm5, %v660_v62 }
 0x41f   :  { %789 = vst.msk [vmem:[#allocation2] sm:$0xff] %vm788_vm6, %v783_v63 }
 0x426   :  { %v791_v1 = vld [vmem:[#allocation2] sm:$0xff] }
 0x42e   :  { %v785_v0 = vpop.permute.xlu0 %784 }
 0x42f   :  { %790 = vst.msk [vmem:[#allocation2 + $0x8] sm:$0xff] %vm788_vm6, %v785_v0 }
 0x436   :  { %v792_v4 = vld [vmem:[#allocation2 + $0x8] sm:$0xff] }
 0x437   :  { %v793_v5 = vpack.c.bf16 %v792_v4, %v791_v1 }
 0x439   :  { %1889 = vmatmul.msk.bf16.vlgmr.msra.gmra.mxu0 %vm284_vm0, %v793_v5 }
 0x4b6   :  { %v826_v7 = vpop.f32.mrf.mxu0 }
 0x4b7   :  { %v827_v8 = vadd.f32 %v2008_v6, %v826_v7 }
 0x4b9   :  { %v831_v10 = vadd.f32 %v827_v8, %v2652_v2  ;;  %v1965_v2 = vld [vmem:[%s3058_s10] sm:$0xff] }
 0x4ba   :  { %965 = vmatpush.bf16.msra.mxu2 %v1965_v2 }
 0x4bb   :  { %v833_v15 = vsel %vm284_vm0, %v831_v10, 0.0 }
 0x4bc   :  { %834 = vadd.xlane.f32.xlu1 %v833_v15  ;;  %v2010_v15 = vld [vmem:[#allocation8] ss:$0 sm:$0xff] }
 0x4be   :  { %v828_v9 = vpop.f32.mrf.mxu0 }
 0x4bf   :  { %v829_v11 = vadd.f32 %v2008_v6, %v828_v9  ;;  %v2009_v6 = vld [vmem:[#allocation6] ss:$0 sm:$0xff] }
 0x4c1   :  { %v832_v12 = vadd.f32 %v829_v11, %v2657_v3  ;;  %v255_v3 = vld [vmem:[%s3091_s30] sm:$0xff] }
 0x4c2   :  { %v934_v21 = vpack.c.bf16 %v256_v20, %v255_v3 }
 0x4c3   :  { %v836_v13 = vsel %vm284_vm0, %v832_v12, 0.0 }
 0x4c4   :  { %837 = vadd.xlane.f32.xlu0 %v836_v13  ;;  %1907 = vmatmul.msk.bf16.vlgmr.msra.gmra.mxu2 %vm284_vm0, %v934_v21 }
 0x52f   :  { %v835_v25 = vpop.xlane.xlu1 %834 }
 0x530   :  { %v846_v26 = vmul.f32 %v2817_v24, %v835_v25 }
 0x532   :  { %v848_v27 = vsub.f32 %v831_v10, %v846_v26 }
 0x534   :  { %v850_v28 = vmul.f32 %v848_v27, %v848_v27 }
 0x536   :  { %v852_v29 = vsel %vm284_vm0, %v850_v28, 0.0 }
 0x537   :  { %v838_v30 = vpop.xlane.xlu0 %837  ;;  %853 = vadd.xlane.f32.xlu2 %v852_v29 }
 0x538   :  { %v847_v31 = vmul.f32 %v2817_v24, %v838_v30 }
 0x53a   :  { %v849_v32 = vsub.f32 %v832_v12, %v847_v31 }
 0x53c   :  { %v851_v33 = vmul.f32 %v849_v32, %v849_v32 }
 0x53e   :  { %v855_v34 = vsel %vm284_vm0, %v851_v33, 0.0 }
 0x53f   :  { %856 = vadd.xlane.f32.xlu1 %v855_v34 }
 0x547   :  { %v967_v41 = vpop.f32.mrf.mxu2 }
 0x548   :  { %v968_v44 = vadd.f32 %v2011_v40, %v967_v41 }
 0x54a   :  { %v974_v47 = vpack.c.bf16 %v968_v44, %v968_v44 }
 0x54c   :  { %v980_v49 = vsel %vm309_vm1, %v974_v47, 0  ;;  %v1065_v50 = vunpack.c.l.b16 %v974_v47 }
 0x54d   :  { %989 = vmatpush.bf16.xpose.msrb.mxu3 %v980_v49 }
 0x54e   :  { %v2832_v52 = vpack.c.b16 %v1065_v50, %v1065_v50 }
 0x54f   :  { %v969_v53 = vpop.f32.mrf.mxu2 }
 0x550   :  { %v970_v55 = vadd.f32 %v2011_v40, %v969_v53  ;;  %1119 = vrot.lane.b32.xlu0 %v2832_v52, %s2465_s5 }
 0x552   :  { %v975_v58 = vpack.c.bf16 %v970_v55, %v970_v55 }
 0x554   :  { %v999_v61 = vsel %vm309_vm1, %v975_v58, 0  ;;  %v1089_v62 = vunpack.c.l.b16 %v975_v58 }
 0x555   :  { %1008 = vmatpush.bf16.xpose.msrb.mxu0 %v999_v61 }
 0x556   :  { %v2837_v0 = vpack.c.b16 %v1089_v62, %v1089_v62 }
 0x558   :  { %1145 = vrot.lane.b32.xlu1 %v2837_v0, %s2465_s5 }
 0x560   :  { %1272 = vrot.lane.b32.xlu1 %v2832_v52, %s2468_s20 }
 0x5aa   :  { %v854_v36 = vpop.xlane.xlu2 %853 }
 0x5ab   :  { %v858_v37 = vmul.f32 %v854_v36, %v2817_v24 }
 0x5ad   :  { %v860_v38 = vadd.f32 1e-05, %v858_v37 }
 0x5af   :  { %2054 = vrsqrt.f32 %v860_v38  ;;  %vm868_vm9 = vweird.f32 %v860_v38 }
 0x5b2   :  { %v857_v42 = vpop.xlane.xlu1 %856 }
 0x5b3   :  { %v859_v43 = vmul.f32 %v857_v42, %v2817_v24 }
 0x5b5   :  { %v2055_v45 = vpop.eup %2054  ;;  %v861_v46 = vadd.f32 1e-05, %v859_v43 }
 0x5b6   :  { %v863_v48 = vmul.f32 %v2055_v45, %v860_v38  ;;  %vm869_vm8 = vweird.f32 %v2055_v45 }
 0x5b7   :  { %2056 = vrsqrt.f32 %v861_v46  ;;  %vm870_vm10 = vmor %vm868_vm9, %vm869_vm8  ;;  %vm878_vm12 = vweird.f32 %v861_v46 }
 0x5b8   :  { %v864_v51 = vmul.f32 %v2055_v45, %v863_v48 }
 0x5ba   :  { %v865_v54 = vmul.f32 0.5, %v864_v51 }
 0x5bc   :  { %v866_v57 = vsub.f32 1.5, %v865_v54 }
 0x5bd   :  { %v2057_v59 = vpop.eup %2056 }
 0x5be   :  { %v867_v60 = vmul.f32 %v2055_v45, %v866_v57  ;;  %v873_v56 = vmul.f32 %v2057_v59, %v861_v46  ;;  %vm879_vm11 = vweird.f32 %v2057_v59 }
 0x5bf   :  { %vm880_vm13 = vmor %vm878_vm12, %vm879_vm11 }
 0x5c0   :  { %v874_v63 = vmul.f32 %v2057_v59, %v873_v56  ;;  %v871_v1 = vsel %vm870_vm10, %v2055_v45, %v867_v60 }
 0x5c1   :  { %v882_v7 = vmul.f32 %v871_v1, %v848_v27 }
 0x5c2   :  { %v875_v4 = vmul.f32 0.5, %v874_v63  ;;  %v1120_v23 = vpop.permute.xlu0 %1119 }
 0x5c3   :  { %v888_v9 = vmul.f32 %v2009_v6, %v882_v7  ;;  %v1125_v26 = vsel %vm309_vm1, %v1120_v23, 0 }
 0x5c4   :  { %v876_v5 = vsub.f32 1.5, %v875_v4  ;;  %1134 = vmatpush.bf16.xpose.msra.mxu3 %v1125_v26 }
 0x5c5   :  { %v2843_v13 = vadd.f32 %v2010_v15, %v888_v9 }
 0x5c6   :  { %v877_v8 = vmul.f32 %v2057_v59, %v876_v5 }
 0x5c8   :  { %v881_v10 = vsel %vm880_vm13, %v2057_v59, %v877_v8 }
 0x5c9   :  { %v883_v11 = vmul.f32 %v881_v10, %v849_v32 }
 0x5ca   :  { %v1146_v25 = vpop.permute.xlu1 %1145 }
 0x5cb   :  { %v889_v12 = vmul.f32 %v2009_v6, %v883_v11  ;;  %v1151_v27 = vsel %vm309_vm1, %v1146_v25, 0 }
 0x5cc   :  { %1160 = vmatpush.bf16.xpose.msra.mxu0 %v1151_v27 }
 0x5cd   :  { %v2845_v14 = vadd.f32 %v2010_v15, %v889_v12 }
 0x5cf   :  { %v896_v16 = vpack.c.bf16 %v2845_v14, %v2843_v13 }
 0x5d1   :  { %1898 = vmatmul.msk.bf16.vlgmr.msra.gmra.mxu1 %vm284_vm0, %v896_v16 }
 0x5d2   :  { %v1273_v31 = vpop.permute.xlu1 %1272 }
 0x5d3   :  { %v1278_v32 = vsel %vm309_vm1, %v1273_v31, 0 }
 0x64e   :  { %v929_v18 = vpop.f32.mrf.mxu1 }
 0x64f   :  { %v930_v19 = vadd.f32 %v2012_v17, %v929_v18 }
 0x651   :  { %v972_v2 = vpack.c.bf16 %v930_v19, %v930_v19 }
 0x653   :  { %v1115_v3 = vunpack.c.l.b16 %v972_v2  ;;  %1908 = vmatmul.msk.bf16.vlgmr.msrb.gmra.mxu3 %vm309_vm1, %v972_v2 }
 0x654   :  { %1287 = vmatpush.bf16.xpose.msrb.mxu3 %v1278_v32 }
 0x655   :  { %v1116_v20 = vpack.c.b16 %v1115_v3, %v1115_v3 }
 0x656   :  { %v931_v21 = vpop.f32.mrf.mxu1 }
 0x657   :  { %v932_v22 = vadd.f32 %v2012_v17, %v931_v21  ;;  %1270 = vrot.lane.b32.xlu1 %v1116_v20, %s2468_s20  ;;  %1117 = vrot.lane.b32.xlu2 %v1116_v20, %s2465_s5 }
 0x659   :  { %v973_v28 = vpack.c.bf16 %v932_v22, %v932_v22 }
 0x65b   :  { %v1141_v29 = vunpack.c.l.b16 %v973_v28  ;;  %1909 = vmatmul.msk.bf16.vlgmr.msrb.gmra.mxu0 %vm309_vm1, %v973_v28 }
 0x65d   :  { %v1142_v30 = vpack.c.b16 %v1141_v29, %v1141_v29 }
 0x65f   :  { %1143 = vrot.lane.b32.xlu0 %v1142_v30, %s2465_s5  ;;  %1445 = vrot.lane.b32.xlu1 %v2837_v0, %s2471_s2 }
 0x660   :  { %1422 = vrot.lane.b32.xlu2 %v2832_v52, %s2471_s2 }
 0x667   :  { %1295 = vrot.lane.b32.xlu0 %v2837_v0, %s2468_s20 }
 0x668   :  { %1443 = vrot.lane.b32.xlu2 %v1142_v30, %s2471_s2 }
 0x66f   :  { %1293 = vrot.lane.b32.xlu0 %v1142_v30, %s2468_s20 }
 0x677   :  { %1420 = vrot.lane.b32.xlu0 %v1116_v20, %s2471_s2 }
 0x6b1   :  { %v1118_v33 = vpop.permute.xlu2 %1117 }
 0x6b2   :  { %1912 = vmatmul.msk.bf16.vlgmr.msra.gmra.mxu3 %vm309_vm1, %v1118_v33 }
 0x6ba   :  { %v1423_v34 = vpop.permute.xlu2 %1422 }
 0x6bb   :  { %v1428_v35 = vsel %vm309_vm1, %v1423_v34, 0 }
 0x6bc   :  { %1437 = vmatpush.bf16.xpose.msra.mxu3 %v1428_v35 }
 0x6c2   :  { %v1444_v50 = vpop.permute.xlu2 %1443 }
 0x6c9   :  { %v1271_v36 = vpop.permute.xlu1 %1270 }
 0x6ca   :  { %1916 = vmatmul.msk.bf16.vlgmr.msrb.gmra.mxu3 %vm309_vm1, %v1271_v36 }
 0x6d1   :  { %v1144_v37 = vpop.permute.xlu0 %1143  ;;  %v1446_v40 = vpop.permute.xlu1 %1445 }
 0x6d2   :  { %1913 = vmatmul.msk.bf16.vlgmr.msra.gmra.mxu0 %vm309_vm1, %v1144_v37  ;;  %v1451_v45 = vsel %vm309_vm1, %v1446_v40, 0 }
 0x6d6   :  { %v991_v38 = vpop.f32.mrf.mxu3 }
 0x6d7   :  { %v1014_v39 = vsel %vm309_vm1, %v991_v38, -inf }
 0x6d8   :  { %v1010_v41 = vpop.f32.mrf.mxu0  ;;  %1015 = vmax.xlane.f32.xlu0 %v1014_v39 }
 0x6d9   :  { %v1296_v42 = vpop.permute.xlu0 %1295  ;;  %v1017_v43 = vsel %vm309_vm1, %v1010_v41, -inf }
 0x6da   :  { %v1301_v44 = vsel %vm309_vm1, %v1296_v42, 0  ;;  %1018 = vmax.xlane.f32.xlu1 %v1017_v43 }
 0x6db   :  { %1310 = vmatpush.bf16.xpose.msrb.mxu0 %v1301_v44 }
 0x6de   :  { %v993_v46 = vpop.f32.mrf.mxu3 }
 0x6e0   :  { %v1012_v47 = vpop.f32.mrf.mxu0 }
 0x6e1   :  { %v1294_v48 = vpop.permute.xlu0 %1293 }
 0x6e2   :  { %1917 = vmatmul.msk.bf16.vlgmr.msrb.gmra.mxu0 %vm309_vm1, %v1294_v48 }
 0x6e3   :  { %1460 = vmatpush.bf16.xpose.msra.mxu0 %v1451_v45 }
 0x6e9   :  { %v1421_v49 = vpop.permute.xlu0 %1420 }
 0x6ea   :  { %1920 = vmatmul.msk.bf16.vlgmr.msra.gmra.mxu3 %vm309_vm1, %v1421_v49 }
 0x6f2   :  { %1921 = vmatmul.msk.bf16.vlgmr.msra.gmra.mxu0 %vm309_vm1, %v1444_v50 }
 0x735   :  { %v1136_v51 = vpop.f32.mrf.mxu3 }
 0x736   :  { %v1166_v53 = vsel %vm309_vm1, %v1136_v51, -inf }
 0x737   :  { %1167 = vmax.xlane.f32.xlu1 %v1166_v53 }
 0x73d   :  { %v1138_v54 = vpop.f32.mrf.mxu3 }
 0x74b   :  { %v1016_v55 = vpop.xlane.xlu0 %1015 }
 0x74c   :  { %v1020_v57 = vsub.f32 %v991_v38, %v1016_v55 }
 0x74d   :  { %v1289_v58 = vpop.f32.mrf.mxu3  ;;  %v1019_v59 = vpop.xlane.xlu1 %1018 }
 0x74e   :  { %v1022_v60 = vmul.f32 1.442695, %v1020_v57  ;;  %v1021_v56 = vsub.f32 %v1010_v41, %v1019_v59  ;;  %v1316_v8 = vsel %vm309_vm1, %v1289_v58, -inf }
 0x74f   :  { %v1162_v61 = vpop.f32.mrf.mxu0 }
 0x750   :  { %2058 = vpow2.f32 %v1022_v60  ;;  %v1024_v62 = vmul.f32 1.442695, %v1021_v56  ;;  %v1169_v63 = vsel %vm309_vm1, %v1162_v61, -inf }
 0x751   :  { %1170 = vmax.xlane.f32.xlu2 %v1169_v63 }
 0x752   :  { %2060 = vpow2.f32 %v1024_v62 }
 0x755   :  { %v1291_v1 = vpop.f32.mrf.mxu3 }
 0x756   :  { %v2880_v4 = vpop.eup %2058 }
 0x757   :  { %v1164_v5 = vpop.f32.mrf.mxu0  ;;  %v1026_v6 = vsel %vm309_vm1, %v2880_v4, 0.0 }
 0x758   :  { %v2884_v7 = vpop.eup %2060  ;;  %1027 = vadd.xlane.f32.xlu1 %v1026_v6 }
 0x759   :  { %1317 = vmax.xlane.f32.xlu2 %v1316_v8  ;;  %v1029_v10 = vsel %vm309_vm1, %v2884_v7, 0.0 }
 0x75a   :  { %1030 = vadd.xlane.f32.xlu0 %v1029_v10 }
 0x75f   :  { %v1312_v15 = vpop.f32.mrf.mxu0 }
 0x760   :  { %v1319_v9 = vsel %vm309_vm1, %v1312_v15, -inf }
 0x762   :  { %1320 = vmax.xlane.f32.xlu0 %v1319_v9 }
 0x767   :  { %v1314_v11 = vpop.f32.mrf.mxu0 }
 0x76d   :  { %v2890_v12 = vpop.f32.mrf.mxu3 }
 0x76e   :  { %v1466_v16 = vsel %vm309_vm1, %v2890_v12, -inf }
 0x76f   :  { %1467 = vmax.xlane.f32.xlu2 %v1466_v16  ;;  %v2894_v17 = vpop.f32.mrf.mxu0 }
 0x770   :  { %v1469_v2 = vsel %vm309_vm1, %v2894_v17, -inf }
 0x771   :  { %1237 = vrot.lane.b32.xlu1 %v2837_v0, %s2466_s9 }
 0x775   :  { %v1441_v18 = vpop.f32.mrf.mxu3 }
 0x776   :  { %1067 = vrot.lane.b32.xlu0 %v2832_v52, %s2467_s14 }
 0x777   :  { %v1464_v19 = vpop.f32.mrf.mxu0 }
 0x77e   :  { %1216 = vrot.lane.b32.xlu0 %v2832_v52, %s2466_s9 }
 0x787   :  { %1091 = vrot.lane.b32.xlu2 %v2837_v0, %s2467_s14 }
 0x79b   :  { %1470 = vmax.xlane.f32.xlu1 %v1469_v2 }
 0x7aa   :  { %v1168_v3 = vpop.xlane.xlu1 %1167 }
 0x7ab   :  { %v1172_v20 = vsub.f32 %v1136_v51, %v1168_v3 }
 0x7ad   :  { %v1174_v21 = vmul.f32 1.442695, %v1172_v20 }
 0x7af   :  { %2062 = vpow2.f32 %v1174_v21 }
 0x7b5   :  { %v2906_v22 = vpop.eup %2062 }
 0x7b6   :  { %v1178_v23 = vsel %vm309_vm1, %v2906_v22, 0.0 }
 0x7b7   :  { %1179 = vadd.xlane.f32.xlu1 %v1178_v23 }
 0x7c4   :  { %v1171_v25 = vpop.xlane.xlu2 %1170 }
 0x7c5   :  { %v1173_v26 = vsub.f32 %v1162_v61, %v1171_v25 }
 0x7c7   :  { %v1176_v27 = vmul.f32 1.442695, %v1173_v26 }
 0x7c9   :  { %2064 = vpow2.f32 %v1176_v27 }
 0x7cb   :  { %v1028_v28 = vpop.xlane.xlu1 %1027 }
 0x7cc   :  { %2066 = vrcp.f32 %v1028_v28  ;;  %v1318_v29 = vpop.xlane.xlu2 %1317  ;;  %v1043_v49 = vand.u32 2147483648, %v1028_v28  ;;  %vm1037_vm15 = vweird.f32 %v1028_v28  ;;  %v1041_v50 = vand.u32 2147483647, %v1028_v28 }
 0x7cd   :  { %v1322_v30 = vsub.f32 %v1289_v58, %v1318_v29  ;;  %v1031_v31 = vpop.xlane.xlu0 %1030 }
 0x7ce   :  { %2068 = vrcp.f32 %v1031_v31  ;;  %v1058_v54 = vand.u32 2147483648, %v1031_v31  ;;  %vm1052_vm8 = vweird.f32 %v1031_v31  ;;  %v1056_v57 = vand.u32 2147483647, %v1031_v31 }
 0x7cf   :  { %v2910_v32 = vpop.eup %2064  ;;  %v1324_v33 = vmul.f32 1.442695, %v1322_v30  ;;  %v1044_v59 = vor.u32 1.1754944e-38, %v1043_v49  ;;  %vm1042_vm10 = vcmp.eq.f32.partialorder %v1041_v50, 8.507059e+37 }
 0x7d0   :  { %v1181_v34 = vsel %vm309_vm1, %v2910_v32, 0.0  ;;  %v1059_v62 = vor.u32 1.1754944e-38, %v1058_v54  ;;  %vm1057_vm11 = vcmp.eq.f32.partialorder %v1056_v57, 8.507059e+37 }
 0x7d1   :  { %2070 = vpow2.f32 %v1324_v33  ;;  %1182 = vadd.xlane.f32.xlu0 %v1181_v34 }
 0x7d2   :  { %v2067_v35 = vpop.eup %2066 }
 0x7d3   :  { %v1033_v36 = vmul.f32 %v2067_v35, %v1028_v28  ;;  %vm1038_vm14 = vweird.f32 %v2067_v35 }
 0x7d4   :  { %v2069_v37 = vpop.eup %2068  ;;  %vm1039_vm7 = vmor %vm1037_vm15, %vm1038_vm14 }
 0x7d5   :  { %v1034_v38 = vsub.f32 1.0, %v1033_v36  ;;  %v1048_v39 = vmul.f32 %v2069_v37, %v1031_v31  ;;  %v1321_v40 = vpop.xlane.xlu0 %1320  ;;  %vm1053_vm2 = vweird.f32 %v2069_v37 }
 0x7d6   :  { %v1323_v41 = vsub.f32 %v1312_v15, %v1321_v40  ;;  %vm1054_vm9 = vmor %vm1052_vm8, %vm1053_vm2 }
 0x7d7   :  { %v2914_v42 = vpop.eup %2070  ;;  %v1049_v43 = vsub.f32 1.0, %v1048_v39  ;;  %v1035_v46 = vmul.f32 %v2067_v35, %v1034_v38 }
 0x7d8   :  { %v1326_v44 = vmul.f32 1.442695, %v1323_v41  ;;  %v1328_v45 = vsel %vm309_vm1, %v2914_v42, 0.0 }
 0x7d9   :  { %1329 = vadd.xlane.f32.xlu2 %v1328_v45  ;;  %v1050_v47 = vmul.f32 %v2069_v37, %v1049_v43  ;;  %v1036_v48 = vadd.f32 %v2067_v35, %v1035_v46 }
 0x7da   :  { %2072 = vpow2.f32 %v1326_v44 }
 0x7db   :  { %v1051_v51 = vadd.f32 %v2069_v37, %v1050_v47  ;;  %v1040_v55 = vsel %vm1039_vm7, %v2067_v35, %v1036_v48 }
 0x7dc   :  { %v1045_v61 = vsel %vm1042_vm10, %v1044_v59, %v1040_v55 }
 0x7dd   :  { %v1055_v56 = vsel %vm1054_vm9, %v2069_v37, %v1051_v51  ;;  %v2923_v1 = vmul.f32 %v2880_v4, %v1045_v61 }
 0x7de   :  { %v1060_v63 = vsel %vm1057_vm11, %v1059_v62, %v1055_v56 }
 0x7df   :  { %v2926_v6 = vmul.f32 %v2884_v7, %v1060_v63  ;;  %v1062_v11 = vpack.c.bf16 %v2923_v1, %v2923_v1 }
 0x7e0   :  { %v2918_v53 = vpop.eup %2072 }
 0x7e1   :  { %v1331_v58 = vsel %vm309_vm1, %v2918_v53, 0.0  ;;  %v1063_v4 = vpack.c.bf16 %v2926_v6, %v2926_v6 }
 0x7e2   :  { %v1468_v60 = vpop.xlane.xlu2 %1467  ;;  %1332 = vadd.xlane.f32.xlu1 %v1331_v58 }
 0x7e3   :  { %v1238_v8 = vpop.permute.xlu1 %1237  ;;  %v1472_v20 = vsub.f32 %v2890_v12, %v1468_v60 }
 0x7e4   :  { %v1243_v16 = vsel %vm382_vm3, %v1238_v8, 0 }
 0x7e5   :  { %v1474_v21 = vmul.f32 1.442695, %v1472_v20 }
 0x7e8   :  { %v1068_v5 = vpop.permute.xlu0 %1067 }
 0x7e9   :  { %v1073_v10 = vsel %vm382_vm3, %v1068_v5, 0 }
 0x7ea   :  { %v1092_v15 = vpop.permute.xlu2 %1091  ;;  %1082 = vmatpush.bf16.msrb.mxu1 %v1073_v10 }
 0x7eb   :  { %v1097_v9 = vsel %vm382_vm3, %v1092_v15, 0 }
 0x7ec   :  { %1106 = vmatpush.bf16.msrb.mxu2 %v1097_v9 }
 0x7ed   :  { %1910 = vmatmul.msk.bf16.vlgmr.msrb.gmra.mxu1 %vm309_vm1, %v1062_v11 }
 0x7ef   :  { %1911 = vmatmul.msk.bf16.vlgmr.msrb.gmra.mxu2 %vm309_vm1, %v1063_v4 }
 0x7f0   :  { %1252 = vmatpush.bf16.msra.mxu2 %v1243_v16  ;;  %v1217_v7 = vpop.permute.xlu0 %1216 }
 0x7f1   :  { %v1222_v18 = vsel %vm382_vm3, %v1217_v7, 0  ;;  %1366 = vrot.lane.b32.xlu2 %v2832_v52, %s2469_s1 }
 0x7f2   :  { %1231 = vmatpush.bf16.msra.mxu1 %v1222_v18 }
 0x7f9   :  { %1516 = vrot.lane.b32.xlu2 %v2832_v52, %s2470_s26 }
 0x7fb   :  { %1387 = vrot.lane.b32.xlu1 %v2837_v0, %s2469_s1 }
 0x80e   :  { %v1471_v19 = vpop.xlane.xlu1 %1470 }
 0x80f   :  { %v1473_v2 = vsub.f32 %v2894_v17, %v1471_v19 }
 0x811   :  { %v1476_v3 = vmul.f32 1.442695, %v1473_v2 }
 0x813   :  { %2074 = vpow2.f32 %v1476_v3 }
 0x814   :  { %2076 = vpow2.f32 %v1474_v21 }
 0x819   :  { %v2946_v23 = vpop.eup %2074 }
 0x81a   :  { %v1481_v25 = vsel %vm309_vm1, %v2946_v23, 0.0  ;;  %v2950_v26 = vpop.eup %2076 }
 0x81b   :  { %1482 = vadd.xlane.f32.xlu0 %v1481_v25  ;;  %v1478_v52 = vsel %vm309_vm1, %v2950_v26, 0.0 }
 0x825   :  { %1479 = vadd.xlane.f32.xlu1 %v1478_v52 }
 0x82a   :  { %v1180_v27 = vpop.xlane.xlu1 %1179 }
 0x82b   :  { %2078 = vrcp.f32 %v1180_v27  ;;  %v1195_v29 = vand.u32 2147483648, %v1180_v27  ;;  %v1193_v31 = vand.u32 2147483647, %v1180_v27  ;;  %vm1189_vm13 = vweird.f32 %v1180_v27 }
 0x82d   :  { %v1196_v34 = vor.u32 1.1754944e-38, %v1195_v29  ;;  %vm1194_vm15 = vcmp.eq.f32.partialorder %v1193_v31, 8.507059e+37 }
 0x82f   :  { %1537 = vrot.lane.b32.xlu0 %v2837_v0, %s2470_s26 }
 0x831   :  { %v2079_v12 = vpop.eup %2078 }
 0x832   :  { %v1185_v17 = vmul.f32 %v2079_v12, %v1180_v27  ;;  %vm1190_vm12 = vweird.f32 %v2079_v12 }
 0x833   :  { %vm1191_vm14 = vmor %vm1189_vm13, %vm1190_vm12 }
 0x834   :  { %v1186_v28 = vsub.f32 1.0, %v1185_v17 }
 0x836   :  { %v1187_v30 = vmul.f32 %v2079_v12, %v1186_v28 }
 0x838   :  { %v1188_v33 = vadd.f32 %v2079_v12, %v1187_v30 }
 0x83a   :  { %v1192_v35 = vsel %vm1191_vm14, %v2079_v12, %v1188_v33 }
 0x83b   :  { %v1197_v36 = vsel %vm1194_vm15, %v1196_v34, %v1192_v35 }
 0x83c   :  { %v1198_v37 = vmul.f32 %v2906_v22, %v1197_v36 }
 0x83e   :  { %v1214_v38 = vpack.c.bf16 %v1198_v37, %v1198_v37  ;;  %v1268_v16 = vadd.f32 %v1198_v37, %v2923_v1 }
 0x840   :  { %1914 = vmatmul.msk.bf16.vlgmr.msra.gmra.mxu1 %vm309_vm1, %v1214_v38 }
 0x844   :  { %v1183_v0 = vpop.xlane.xlu0 %1182 }
 0x845   :  { %2080 = vrcp.f32 %v1183_v0  ;;  %v1210_v44 = vand.u32 2147483648, %v1183_v0  ;;  %v1208_v46 = vand.u32 2147483647, %v1183_v0  ;;  %vm1204_vm7 = vweird.f32 %v1183_v0 }
 0x847   :  { %v1211_v49 = vor.u32 1.1754944e-38, %v1210_v44  ;;  %vm1209_vm9 = vcmp.eq.f32.partialorder %v1208_v46, 8.507059e+37 }
 0x84b   :  { %v2081_v39 = vpop.eup %2080 }
 0x84c   :  { %v1200_v40 = vmul.f32 %v2081_v39, %v1183_v0  ;;  %v1330_v41 = vpop.xlane.xlu2 %1329  ;;  %vm1205_vm2 = vweird.f32 %v2081_v39 }
 0x84d   :  { %2082 = vrcp.f32 %v1330_v41  ;;  %vm1206_vm8 = vmor %vm1204_vm7, %vm1205_vm2  ;;  %v1345_v60 = vand.u32 2147483648, %v1330_v41  ;;  %v1343_v61 = vand.u32 2147483647, %v1330_v41  ;;  %vm1339_vm11 = vweird.f32 %v1330_v41 }
 0x84e   :  { %v1201_v43 = vsub.f32 1.0, %v1200_v40 }
 0x84f   :  { %v1346_v5 = vor.u32 1.1754944e-38, %v1345_v60  ;;  %vm1344_vm13 = vcmp.eq.f32.partialorder %v1343_v61, 8.507059e+37 }
 0x850   :  { %v1202_v45 = vmul.f32 %v2081_v39, %v1201_v43 }
 0x852   :  { %v1203_v47 = vadd.f32 %v2081_v39, %v1202_v45 }
 0x853   :  { %v2083_v48 = vpop.eup %2082 }
 0x854   :  { %v1207_v22 = vsel %vm1206_vm8, %v2081_v39, %v1203_v47  ;;  %v1335_v50 = vmul.f32 %v2083_v48, %v1330_v41  ;;  %v1367_v51 = vpop.permute.xlu2 %1366  ;;  %vm1340_vm10 = vweird.f32 %v2083_v48 }
 0x855   :  { %v1212_v54 = vsel %vm1209_vm9, %v1211_v49, %v1207_v22  ;;  %v1372_v55 = vsel %vm382_vm3, %v1367_v51, 0  ;;  %v1333_v57 = vpop.xlane.xlu1 %1332  ;;  %vm1341_vm12 = vmor %vm1339_vm11, %vm1340_vm10 }
 0x856   :  { %v2960_v58 = vmul.f32 %v2910_v32, %v1212_v54  ;;  %v1336_v59 = vsub.f32 1.0, %v1335_v50  ;;  %2084 = vrcp.f32 %v1333_v57  ;;  %1381 = vmatpush.bf16.msrb.mxu1 %v1372_v55  ;;  %v1360_v20 = vand.u32 2147483648, %v1333_v57 }
 0x857   :  { %vm1354_vm15 = vweird.f32 %v1333_v57  ;;  %v1358_v21 = vand.u32 2147483647, %v1333_v57 }
 0x858   :  { %v1337_v56 = vmul.f32 %v2083_v48, %v1336_v59  ;;  %v1215_v62 = vpack.c.bf16 %v2960_v58, %v2960_v58  ;;  %v1361_v52 = vor.u32 1.1754944e-38, %v1360_v20  ;;  %v1269_v41 = vadd.f32 %v2960_v58, %v2926_v6 }
 0x859   :  { %vm1359_vm7 = vcmp.eq.f32.partialorder %v1358_v21, 8.507059e+37 }
 0x85a   :  { %v1338_v63 = vadd.f32 %v2083_v48, %v1337_v56  ;;  %1915 = vmatmul.msk.bf16.vlgmr.msra.gmra.mxu2 %vm309_vm1, %v1215_v62 }
 0x85c   :  { %v2085_v8 = vpop.eup %2084  ;;  %v1342_v10 = vsel %vm1341_vm12, %v2083_v48, %v1338_v63  ;;  %v1517_v32 = vpop.permute.xlu2 %1516 }
 0x85d   :  { %v1347_v15 = vsel %vm1344_vm13, %v1346_v5, %v1342_v10  ;;  %v1350_v9 = vmul.f32 %v2085_v8, %v1333_v57  ;;  %v1522_v11 = vsel %vm382_vm3, %v1517_v32, 0  ;;  %vm1355_vm14 = vweird.f32 %v2085_v8 }
 0x85e   :  { %v1348_v4 = vmul.f32 %v2914_v42, %v1347_v15  ;;  %1531 = vmatpush.bf16.msra.mxu1 %v1522_v11  ;;  %vm1356_vm2 = vmor %vm1354_vm15, %vm1355_vm14 }
 0x85f   :  { %v1351_v7 = vsub.f32 1.0, %v1350_v9 }
 0x860   :  { %v2968_v18 = vadd.f32 %v1348_v4, %v1268_v16  ;;  %v1364_v19 = vpack.c.bf16 %v1348_v4, %v1348_v4 }
 0x861   :  { %v1352_v2 = vmul.f32 %v2085_v8, %v1351_v7 }
 0x862   :  { %1918 = vmatmul.msk.bf16.vlgmr.msrb.gmra.mxu1 %vm309_vm1, %v1364_v19 }
 0x863   :  { %v1353_v3 = vadd.f32 %v2085_v8, %v1352_v2 }
 0x865   :  { %v1357_v25 = vsel %vm1356_vm2, %v2085_v8, %v1353_v3 }
 0x866   :  { %v1362_v1 = vsel %vm1359_vm7, %v1361_v52, %v1357_v25  ;;  %v1968_v25 = vld [vmem:[%s3060_s12 + $0x8] sm:$0xff]  ;;  %v1967_v52 = vld [vmem:[%s3060_s12] sm:$0xff]  ;;  %vm1749_vm7 = vcmask 523264  }
 0x867   :  { %v1363_v42 = vmul.f32 %v2918_v53, %v1362_v1  ;;  %1606 = vmatpush.bf16.msrb.mxu3 %v1968_v25 }
 0x869   :  { %v1365_v28 = vpack.c.bf16 %v1363_v42, %v1363_v42  ;;  %v1419_v46 = vadd.f32 %v1363_v42, %v1269_v41 }
 0x86a   :  { %v1084_v27 = vpop.f32.mrf.mxu1 }
 0x86b   :  { %1112 = vst.msk [vmem:[#allocation2] sm:$0xff] %vm309_vm1, %v1084_v27  ;;  %1607 = vmatpush.bf16.msrb.mxu3 %v1967_v52 }
 0x86d   :  { %v1388_v12 = vpop.permute.xlu1 %1387 }
 0x86e   :  { %v1393_v17 = vsel %vm382_vm3, %v1388_v12, 0 }
 0x86f   :  { %1402 = vmatpush.bf16.msrb.mxu2 %v1393_v17 }
 0x872   :  { %v1086_v29 = vpop.f32.mrf.mxu1  ;;  %v1108_v30 = vpop.f32.mrf.mxu2  ;;  %1919 = vmatmul.msk.bf16.vlgmr.msrb.gmra.mxu2 %vm309_vm1, %v1365_v28  ;;  %v2013_v28 = vld [vmem:[#allocation12] ss:$0 sm:$0xff] }
 0x873   :  { %1113 = vst.msk [vmem:[#allocation2 + $0x8] sm:$0xff] %vm309_vm1, %v1108_v30 }
 0x87a   :  { %v1110_v31 = vpop.f32.mrf.mxu2 }
 0x88e   :  { %v1483_v33 = vpop.xlane.xlu0 %1482 }
 0x88f   :  { %2086 = vrcp.f32 %v1483_v33  ;;  %v1510_v38 = vand.u32 2147483648, %v1483_v33  ;;  %v1508_v0 = vand.u32 2147483647, %v1483_v33  ;;  %vm1504_vm9 = vweird.f32 %v1483_v33 }
 0x891   :  { %v1511_v40 = vor.u32 1.1754944e-38, %v1510_v38  ;;  %vm1509_vm11 = vcmp.eq.f32.partialorder %v1508_v0, 8.507059e+37 }
 0x895   :  { %v2087_v34 = vpop.eup %2086 }
 0x896   :  { %v1500_v35 = vmul.f32 %v2087_v34, %v1483_v33  ;;  %vm1505_vm8 = vweird.f32 %v2087_v34 }
 0x897   :  { %vm1506_vm10 = vmor %vm1504_vm9, %vm1505_vm8 }
 0x898   :  { %v1501_v36 = vsub.f32 1.0, %v1500_v35  ;;  %v1480_v37 = vpop.xlane.xlu1 %1479 }
 0x899   :  { %2088 = vrcp.f32 %v1480_v37  ;;  %v1493_v54 = vand.u32 2147483647, %v1480_v37  ;;  %v1495_v55 = vand.u32 2147483648, %v1480_v37  ;;  %vm1489_vm13 = vweird.f32 %v1480_v37 }
 0x89a   :  { %v1502_v53 = vmul.f32 %v2087_v34, %v1501_v36 }
 0x89b   :  { %vm1494_vm15 = vcmp.eq.f32.partialorder %v1493_v54, 8.507059e+37 }
 0x89c   :  { %v1503_v39 = vadd.f32 %v2087_v34, %v1502_v53 }
 0x89e   :  { %v1507_v43 = vsel %vm1506_vm10, %v2087_v34, %v1503_v39 }
 0x89f   :  { %v2089_v44 = vpop.eup %2088  ;;  %v1512_v45 = vsel %vm1509_vm11, %v1511_v40, %v1507_v43 }
 0x8a0   :  { %v1513_v47 = vmul.f32 %v2946_v23, %v1512_v45  ;;  %v1485_v48 = vmul.f32 %v2089_v44, %v1480_v37  ;;  %vm1490_vm12 = vweird.f32 %v2089_v44  ;;  %v1496_v23 = vor.u32 1.1754944e-38, %v1495_v55 }
 0x8a1   :  { %v1538_v49 = vpop.permute.xlu0 %1537  ;;  %vm1491_vm14 = vmor %vm1489_vm13, %vm1490_vm12 }
 0x8a2   :  { %v1569_v22 = vadd.f32 %v1513_v47, %v1419_v46  ;;  %v1486_v50 = vsub.f32 1.0, %v1485_v48  ;;  %v1543_v51 = vsel %vm382_vm3, %v1538_v49, 0  ;;  %v1515_v6 = vpack.c.bf16 %v1513_v47, %v1513_v47  ;;  %v1969_v49 = vld [vmem:[#allocation17] sm:$0xff] }
 0x8a3   :  { %1552 = vmatpush.bf16.msra.mxu2 %v1543_v51 }
 0x8a4   :  { %v1573_v57 = vmul.f32 0.25, %v1569_v22  ;;  %v1487_v59 = vmul.f32 %v2089_v44, %v1486_v50 }
 0x8a6   :  { %1575 = vst.msk [vmem:[#allocation24 + $0x8] sm:$0xff] %vm309_vm1, %v1573_v57  ;;  %v1488_v58 = vadd.f32 %v2089_v44, %v1487_v59  ;;  %1923 = vmatmul.msk.bf16.vlgmr.msra.gmra.mxu2 %vm309_vm1, %v1515_v6 }
 0x8a8   :  { %v1492_v60 = vsel %vm1491_vm14, %v2089_v44, %v1488_v58 }
 0x8a9   :  { %v1497_v56 = vsel %vm1494_vm15, %v1496_v23, %v1492_v60 }
 0x8aa   :  { %v1498_v61 = vmul.f32 %v2950_v26, %v1497_v56 }
 0x8ac   :  { %v1568_v62 = vadd.f32 %v1498_v61, %v2968_v18  ;;  %v1514_v63 = vpack.c.bf16 %v1498_v61, %v1498_v61 }
 0x8ae   :  { %v1572_v5 = vmul.f32 0.25, %v1568_v62  ;;  %1922 = vmatmul.msk.bf16.vlgmr.msra.gmra.mxu1 %vm309_vm1, %v1514_v63 }
 0x8b0   :  { %1574 = vst.msk [vmem:[#allocation24] sm:$0xff] %vm309_vm1, %v1572_v5  ;;  %v2014_v5 = vld [vmem:[#allocation14] ss:$0 sm:$0xff] }
 0x8bd   :  { %v1233_v8 = vpop.f32.mrf.mxu1 }
 0x8be   :  { %1260 = vrot.lane.b32.xlu0 %v1233_v8, %s2476_s6 }
 0x8c5   :  { %v1235_v10 = vpop.f32.mrf.mxu1 }
 0x8dd   :  { %v1254_v32 = vpop.f32.mrf.mxu2 }
 0x8de   :  { %1262 = vrot.lane.b32.xlu1 %v1254_v32, %s2476_s6 }
 0x8df   :  { %v1383_v15 = vpop.f32.mrf.mxu1 }
 0x8e0   :  { %1410 = vrot.lane.b32.xlu2 %v1383_v15, %s2477_s7  ;;  %v2015_v15 = vld [vmem:[#allocation15] ss:$0 sm:$0xff] }
 0x8e5   :  { %v1256_v9 = vpop.f32.mrf.mxu2 }
 0x8e7   :  { %v1385_v26 = vpop.f32.mrf.mxu1 }
 0x8f5   :  { %v1404_v11 = vpop.f32.mrf.mxu2 }
 0x8f6   :  { %1412 = vrot.lane.b32.xlu0 %v1404_v11, %s2477_s7 }
 0x8fd   :  { %v1406_v16 = vpop.f32.mrf.mxu2 }
 0x929   :  { %v1554_v4 = vpop.f32.mrf.mxu2 }
 0x92a   :  { %1562 = vrot.lane.b32.xlu0 %v1554_v4, %s2478_s19 }
 0x92b   :  { %v1533_v7 = vpop.f32.mrf.mxu1 }
 0x92c   :  { %1560 = vrot.lane.b32.xlu2 %v1533_v7, %s2478_s19 }
 0x930   :  { %v1261_v18 = vpop.permute.xlu0 %1260 }
 0x931   :  { %1266 = vst.msk [vmem:[#allocation2] sm:$0xff] %vm542_vm4, %v1261_v18  ;;  %v1556_v19 = vpop.f32.mrf.mxu2  ;;  %v1974_v18 = vld [vmem:[%s3066_s18 + $0x18] sm:$0xff] }
 0x932   :  { %1757 = vmatpush.bf16.msrb.mxu1 %v1974_v18  ;;  %v1973_v19 = vld [vmem:[%s3066_s18 + $0x10] sm:$0xff] }
 0x933   :  { %v1535_v2 = vpop.f32.mrf.mxu1 }
 0x934   :  { %v1972_v2 = vld [vmem:[%s3066_s18 + $0x8] sm:$0xff] }
 0x936   :  { %1758 = vmatpush.bf16.msrb.mxu1 %v1973_v19 }
 0x93a   :  { %v1411_v3 = vpop.permute.xlu2 %1410  ;;  %1759 = vmatpush.bf16.msrb.mxu1 %v1972_v2 }
 0x93b   :  { %1416 = vst.msk [vmem:[#allocation2] sm:$0xff] %vm665_vm5, %v1411_v3  ;;  %v1971_v3 = vld [vmem:[%s3066_s18] sm:$0xff]  ;;  %s2480_s18 = smov [#allocation24]  }
 0x93c   :  { %s1833_s28 = sshll.u32 %s2480_s18, 4  ;;  %s1834_s28 = int_to_ptr.vmem [resolvable:$true] %s1833_s28 }
 0x93d   :  { %1841 = dma.vmem_to_hbm [thread:$0]  %s1834_s28, 256, %s1836_s0, [#allocation5], %s2481_s4, %s2481_s4, %s2476_s6  }
 0x93e   :  { %1760 = vmatpush.bf16.msrb.mxu1 %v1971_v3 }
 0x950   :  { %v1263_v20 = vpop.permute.xlu1 %1262 }
 0x951   :  { %1267 = vst.msk [vmem:[#allocation2 + $0x8] sm:$0xff] %vm542_vm4, %v1263_v20 }
 0x968   :  { %v1413_v21 = vpop.permute.xlu0 %1412 }
 0x969   :  { %1417 = vst.msk [vmem:[#allocation2 + $0x8] sm:$0xff] %vm665_vm5, %v1413_v21  ;;  %v2016_v21 = vld [vmem:[#allocation18] ss:$0 sm:$0xff] }
 0x986   :  { %v1561_v1 = vpop.permute.xlu2 %1560 }
 0x987   :  { %1566 = vst.msk [vmem:[#allocation2] sm:$0xff] %vm788_vm6, %v1561_v1 }
 0x98e   :  { %v1570_v42 = vld [vmem:[#allocation2] sm:$0xff] }
 0x99c   :  { %v1563_v27 = vpop.permute.xlu0 %1562 }
 0x99d   :  { %1567 = vst.msk [vmem:[#allocation2 + $0x8] sm:$0xff] %vm788_vm6, %v1563_v27 }
 0x9a4   :  { %v1571_v12 = vld [vmem:[#allocation2 + $0x8] sm:$0xff] }
 0x9a5   :  { %v1576_v17 = vpack.c.bf16 %v1571_v12, %v1570_v42 }
 0x9a7   :  { %1932 = vmatmul.msk.bf16.vlgmr.msrb.gmra.mxu3 %vm284_vm0, %v1576_v17  ;;  %v2017_v17 = vld [vmem:[#allocation20] ss:$0 sm:$0xff] }
 0xa2a   :  { %v1609_v29 = vpop.f32.mrf.mxu3 }
 0xa2b   :  { %v1610_v30 = vadd.f32 %v2013_v28, %v1609_v29 }
 0xa2d   :  { %v1614_v31 = vadd.f32 %v1610_v30, %v2843_v13 }
 0xa2f   :  { %v1616_v33 = vsel %vm284_vm0, %v1614_v31, 0.0 }
 0xa30   :  { %1617 = vadd.xlane.f32.xlu2 %v1616_v33 }
 0xa32   :  { %v1611_v34 = vpop.f32.mrf.mxu3 }
 0xa33   :  { %v1612_v35 = vadd.f32 %v2013_v28, %v1611_v34 }
 0xa35   :  { %v1615_v36 = vadd.f32 %v1612_v35, %v2845_v14  ;;  %v1970_v14 = vld [vmem:[#allocation17 + $0x8] sm:$0xff] }
 0xa36   :  { %1702 = vmatpush.bf16.msrb.mxu0 %v1970_v14 }
 0xa37   :  { %v1619_v37 = vsel %vm284_vm0, %v1615_v36, 0.0 }
 0xa38   :  { %1620 = vadd.xlane.f32.xlu0 %v1619_v37 }
 0xa3a   :  { %1703 = vmatpush.bf16.msrb.mxu0 %v1969_v49 }
 0xaa3   :  { %v1618_v38 = vpop.xlane.xlu2 %1617 }
 0xaa4   :  { %v1622_v53 = vmul.f32 %v1618_v38, %v2817_v24 }
 0xaa6   :  { %v1624_v0 = vsub.f32 %v1614_v31, %v1622_v53 }
 0xaa8   :  { %v1626_v39 = vmul.f32 %v1624_v0, %v1624_v0 }
 0xaaa   :  { %v1628_v40 = vsel %vm284_vm0, %v1626_v39, 0.0 }
 0xaab   :  { %v1621_v41 = vpop.xlane.xlu0 %1620  ;;  %1629 = vadd.xlane.f32.xlu1 %v1628_v40 }
 0xaac   :  { %v1623_v13 = vmul.f32 %v1621_v41, %v2817_v24 }
 0xaae   :  { %v1625_v43 = vsub.f32 %v1615_v36, %v1623_v13 }
 0xab0   :  { %v1627_v44 = vmul.f32 %v1625_v43, %v1625_v43 }
 0xab2   :  { %v1631_v45 = vsel %vm284_vm0, %v1627_v44, 0.0 }
 0xab3   :  { %1632 = vadd.xlane.f32.xlu2 %v1631_v45 }
 0xb1e   :  { %v1630_v46 = vpop.xlane.xlu1 %1629 }
 0xb1f   :  { %v1634_v47 = vmul.f32 %v1630_v46, %v2817_v24 }
 0xb21   :  { %v1636_v48 = vadd.f32 1e-05, %v1634_v47 }
 0xb23   :  { %2090 = vrsqrt.f32 %v1636_v48  ;;  %vm1644_vm3 = vweird.f32 %v1636_v48 }
 0xb26   :  { %v1633_v22 = vpop.xlane.xlu2 %1632 }
 0xb27   :  { %v1635_v50 = vmul.f32 %v1633_v22, %v2817_v24 }
 0xb29   :  { %v2091_v51 = vpop.eup %2090  ;;  %v1637_v54 = vadd.f32 1e-05, %v1635_v50 }
 0xb2a   :  { %v1639_v55 = vmul.f32 %v2091_v51, %v1636_v48  ;;  %vm1645_vm1 = vweird.f32 %v2091_v51 }
 0xb2b   :  { %2092 = vrsqrt.f32 %v1637_v54  ;;  %vm1646_vm4 = vmor %vm1644_vm3, %vm1645_vm1  ;;  %vm1654_vm6 = vweird.f32 %v1637_v54 }
 0xb2c   :  { %v1640_v57 = vmul.f32 %v2091_v51, %v1639_v55 }
 0xb2e   :  { %v1641_v59 = vmul.f32 0.5, %v1640_v57 }
 0xb30   :  { %v1642_v6 = vsub.f32 1.5, %v1641_v59 }
 0xb31   :  { %v2093_v58 = vpop.eup %2092 }
 0xb32   :  { %v1643_v23 = vmul.f32 %v2091_v51, %v1642_v6  ;;  %v1649_v60 = vmul.f32 %v2093_v58, %v1637_v54  ;;  %vm1655_vm5 = vweird.f32 %v2093_v58 }
 0xb33   :  { %vm1656_vm2 = vmor %vm1654_vm6, %vm1655_vm5 }
 0xb34   :  { %v1650_v56 = vmul.f32 %v2093_v58, %v1649_v60  ;;  %v1647_v61 = vsel %vm1646_vm4, %v2091_v51, %v1643_v23 }
 0xb35   :  { %v1658_v8 = vmul.f32 %v1647_v61, %v1624_v0 }
 0xb36   :  { %v1651_v62 = vmul.f32 0.5, %v1650_v56  ;;  %v2019_v56 = vld [vmem:[#allocation23] ss:$0 sm:$0xff] }
 0xb37   :  { %v1664_v9 = vmul.f32 %v2014_v5, %v1658_v8 }
 0xb38   :  { %v1652_v63 = vsub.f32 1.5, %v1651_v62 }
 0xb39   :  { %v1670_v16 = vadd.f32 %v2015_v15, %v1664_v9 }
 0xb3a   :  { %v1653_v10 = vmul.f32 %v2093_v58, %v1652_v63 }
 0xb3c   :  { %v1657_v32 = vsel %vm1656_vm2, %v2093_v58, %v1653_v10  ;;  %v2018_v58 = vld [vmem:[#allocation21] ss:$0 sm:$0xff] }
 0xb3d   :  { %v1659_v26 = vmul.f32 %v1657_v32, %v1625_v43 }
 0xb3f   :  { %v1665_v11 = vmul.f32 %v2014_v5, %v1659_v26 }
 0xb41   :  { %v1671_v4 = vadd.f32 %v2015_v15, %v1665_v11 }
 0xb43   :  { %v1672_v7 = vpack.c.bf16 %v1671_v4, %v1670_v16 }
 0xb45   :  { %1941 = vmatmul.msk.bf16.vlgmr.msrb.gmra.mxu0 %vm284_vm0, %v1672_v7 }
 0xbc2   :  { %v1705_v20 = vpop.f32.mrf.mxu0 }
 0xbc3   :  { %v1706_v25 = vadd.f32 %v2016_v21, %v1705_v20 }
 0xbc5   :  { %v1710_v27 = vmax.f32 %v1706_v25, 0.0 }
 0xbca   :  { %v1707_v52 = vpop.f32.mrf.mxu0 }
 0xbcb   :  { %v1708_v1 = vadd.f32 %v2016_v21, %v1707_v52 }
 0xbcd   :  { %v1711_v42 = vmax.f32 %v1708_v1, 0.0 }
 0xbcf   :  { %v1712_v12 = vpack.c.bf16 %v1711_v42, %v1710_v27 }
 0xbd1   :  { %1958 = vmatmul.msk.bf16.vlgmr.msrb.gmra.mxu1 %vm1749_vm7, %v1712_v12 }
 0xc4e   :  { %v1762_v28 = vpop.f32.mrf.mxu1 }
 0xc4f   :  { %v1763_v29 = vadd.f32 %v2017_v17, %v1762_v28 }
 0xc51   :  { %v1767_v30 = vadd.f32 %v1763_v29, %v1670_v16 }
 0xc53   :  { %v1769_v31 = vsel %vm284_vm0, %v1767_v30, 0.0 }
 0xc54   :  { %1770 = vadd.xlane.f32.xlu2 %v1769_v31 }
 0xc56   :  { %v1764_v33 = vpop.f32.mrf.mxu1 }
 0xc57   :  { %v1765_v34 = vadd.f32 %v2017_v17, %v1764_v33 }
 0xc59   :  { %v1768_v35 = vadd.f32 %v1765_v34, %v1671_v4 }
 0xc5b   :  { %v1772_v36 = vsel %vm284_vm0, %v1768_v35, 0.0 }
 0xc5c   :  { %1773 = vadd.xlane.f32.xlu0 %v1772_v36 }
 0xcc7   :  { %v1771_v37 = vpop.xlane.xlu2 %1770 }
 0xcc8   :  { %v1775_v38 = vmul.f32 %v1771_v37, %v2817_v24 }
 0xcca   :  { %v1777_v53 = vsub.f32 %v1767_v30, %v1775_v38 }
 0xccc   :  { %v1779_v0 = vmul.f32 %v1777_v53, %v1777_v53 }
 0xcce   :  { %v1781_v39 = vsel %vm284_vm0, %v1779_v0, 0.0 }
 0xccf   :  { %v1774_v40 = vpop.xlane.xlu0 %1773  ;;  %1782 = vadd.xlane.f32.xlu1 %v1781_v39 }
 0xcd0   :  { %v1776_v41 = vmul.f32 %v1774_v40, %v2817_v24 }
 0xcd2   :  { %v1778_v13 = vsub.f32 %v1768_v35, %v1776_v41 }
 0xcd4   :  { %v1780_v43 = vmul.f32 %v1778_v13, %v1778_v13 }
 0xcd6   :  { %v1784_v44 = vsel %vm284_vm0, %v1780_v43, 0.0 }
 0xcd7   :  { %1785 = vadd.xlane.f32.xlu2 %v1784_v44 }
 0xd42   :  { %v1783_v45 = vpop.xlane.xlu1 %1782 }
 0xd43   :  { %v1787_v14 = vmul.f32 %v1783_v45, %v2817_v24 }
 0xd45   :  { %v1789_v46 = vadd.f32 1e-05, %v1787_v14 }
 0xd47   :  { %2094 = vrsqrt.f32 %v1789_v46  ;;  %vm1797_vm9 = vweird.f32 %v1789_v46 }
 0xd4a   :  { %v1786_v47 = vpop.xlane.xlu2 %1785 }
 0xd4b   :  { %v1788_v48 = vmul.f32 %v1786_v47, %v2817_v24 }
 0xd4d   :  { %v2095_v49 = vpop.eup %2094  ;;  %v1790_v22 = vadd.f32 1e-05, %v1788_v48 }
 0xd4e   :  { %v1792_v50 = vmul.f32 %v2095_v49, %v1789_v46  ;;  %vm1798_vm8 = vweird.f32 %v2095_v49 }
 0xd4f   :  { %2096 = vrsqrt.f32 %v1790_v22  ;;  %vm1799_vm10 = vmor %vm1797_vm9, %vm1798_vm8  ;;  %vm1807_vm12 = vweird.f32 %v1790_v22 }
 0xd50   :  { %v1793_v51 = vmul.f32 %v2095_v49, %v1792_v50 }
 0xd52   :  { %v1794_v54 = vmul.f32 0.5, %v1793_v51 }
 0xd54   :  { %v1795_v55 = vsub.f32 1.5, %v1794_v54 }
 0xd55   :  { %v2097_v57 = vpop.eup %2096 }
 0xd56   :  { %v1796_v59 = vmul.f32 %v2095_v49, %v1795_v55  ;;  %v1802_v6 = vmul.f32 %v2097_v57, %v1790_v22  ;;  %vm1808_vm11 = vweird.f32 %v2097_v57 }
 0xd57   :  { %vm1809_vm13 = vmor %vm1807_vm12, %vm1808_vm11 }
 0xd58   :  { %v1800_v23 = vsel %vm1799_vm10, %v2095_v49, %v1796_v59  ;;  %v1803_v60 = vmul.f32 %v2097_v57, %v1802_v6 }
 0xd59   :  { %v1811_v61 = vmul.f32 %v1800_v23, %v1777_v53 }
 0xd5a   :  { %v1804_v62 = vmul.f32 0.5, %v1803_v60 }
 0xd5b   :  { %v1817_v24 = vmul.f32 %v2018_v58, %v1811_v61 }
 0xd5c   :  { %v1805_v63 = vsub.f32 1.5, %v1804_v62 }
 0xd5d   :  { %v1823_v5 = vadd.f32 %v2019_v56, %v1817_v24 }
 0xd5e   :  { %v1806_v8 = vmul.f32 %v2097_v57, %v1805_v63 }
 0xd5f   :  { %1825 = vst.msk [vmem:[%s3070_s22] sm:$0xff] %vm284_vm0, %v1823_v5 }
 0xd60   :  { %v1810_v10 = vsel %vm1809_vm13, %v2097_v57, %v1806_v8 }
 0xd61   :  { %v1812_v32 = vmul.f32 %v1810_v10, %v1778_v13 }
 0xd63   :  { %v1818_v15 = vmul.f32 %v2018_v58, %v1812_v32 }
 0xd65   :  { %v1824_v9 = vadd.f32 %v2019_v56, %v1818_v15 }
 0xd67   :  { %1826 = vst.msk [vmem:[%s3070_s22 + $0x8] sm:$0xff] %vm284_vm0, %v1824_v9 }
 0xd68   :  { %2448 = dma.done.wait [#allocation5], 256  }
 0xd69   :  { %2449 = vsyncadd [#allocation5], 4294967040 }
 0xd6a   :  { %1848 = vsyncpa [#allocation4], 1 }
 0xd6b   :  { %1849 = vsyncpa [#allocation7], 1 }
 0xd6c   :  { %1850 = vsyncpa [#allocation10], 1 }
 0xd6d   :  { %1851 = vsyncpa [#allocation13], 1 }
 0xd6e   :  { %1852 = vsyncpa [#allocation16], 1 }
 0xd6f   :  { %1853 = vsyncpa [#allocation19], 1 }
 0xd70   :  { %1854 = vsyncpa [#allocation22], 1 }
 0xd71   :  { %1855 = vsyncpa [#allocation5], 1 }

// kernel: transformer_decoder.3
= control target key start
LH: loop header
LB: loop body
LE: loop exit
PB: predicated region body
PF: predicated region fallthrough
CT: control target
= control target key end

     0   :  { %s3102_s0 = inlined_call_operand.vmem [shape: f32[16,32], index: 0, kind: input, shape index: {}]   ;;  %s3103_s1 = inlined_call_operand.vmem [shape: f32[16,32], index: 1, kind: input, shape index: {}]   ;;  %s3104_s2 = inlined_call_operand.vmem [shape: bf16[32,96], index: 2, kind: input, shape index: {}]   ;;  %s3105_s3 = inlined_call_operand.vmem [shape: f32[1,96], index: 3, kind: input, shape index: {}]   ;;  %s3106_s4 = inlined_call_operand.vmem [shape: bf16[32,32], index: 4, kind: input, shape index: {}]   ;;  %s3107_s5 = inlined_call_operand.vmem [shape: f32[1,32], index: 5, kind: input, shape index: {}]   ;;  %s3108_s6 = inlined_call_operand.vmem [shape: f32[1,32], index: 6, kind: input, shape index: {}]   ;;  %s3109_s7 = inlined_call_operand.hbm [shape: f32[1,32], index: 7, kind: input, shape index: {}]   ;;  %s3110_s8 = inlined_call_operand.vmem [shape: bf16[32,32], index: 8, kind: input, shape index: {}]   ;;  %s3111_s9 = inlined_call_operand.hbm [shape: f32[1,32], index: 9, kind: input, shape index: {}]   ;;  %s3112_s10 = inlined_call_operand.vmem [shape: bf16[32,64], index: 10, kind: input, shape index: {}]   ;;  %s3113_s11 = inlined_call_operand.hbm [shape: f32[1,64], index: 11, kind: input, shape index: {}]   ;;  %s3114_s12 = inlined_call_operand.hbm [shape: bf16[32,32], index: 12, kind: input, shape index: {}]   ;;  %s3115_s13 = inlined_call_operand.hbm [shape: f32[1,32], index: 13, kind: input, shape index: {}]   ;;  %s3116_s14 = inlined_call_operand.hbm [shape: f32[1,32], index: 14, kind: input, shape index: {}]   ;;  %s3117_s15 = inlined_call_operand.hbm [shape: f32[1,32], index: 15, kind: input, shape index: {}]   ;;  %s3118_s16 = inlined_call_operand.hbm [shape: bf16[32,64], index: 16, kind: input, shape index: {}]   ;;  %s3119_s17 = inlined_call_operand.hbm [shape: f32[1,64], index: 17, kind: input, shape index: {}]   ;;  %s3120_s18 = inlined_call_operand.vmem [shape: bf16[64,32], index: 18, kind: input, shape index: {}]   ;;  %s3121_s19 = inlined_call_operand.hbm [shape: f32[1,32], index: 19, kind: input, shape index: {}]   ;;  %s3122_s20 = inlined_call_operand.hbm [shape: f32[1,32], index: 20, kind: input, shape index: {}]   ;;  %s3123_s21 = inlined_call_operand.hbm [shape: f32[1,32], index: 21, kind: input, shape index: {}]   ;;  %s3124_s22 = inlined_call_operand.vmem [shape: f32[1,32], index: 22, kind: input, shape index: {}]   ;;  %s3125_s23 = inlined_call_operand.vmem [shape: f32[1,32], index: 23, kind: input, shape index: {}]   ;;  %s3126_s24 = inlined_call_operand.vmem [shape: f32[16,32], index: 24, kind: output, shape index: {0}]   ;;  %s3127_s25 = inlined_call_operand.hbm [shape: f32[2,8,8], index: 25, kind: output, shape index: {1}]  }
   0x1   :  { %3133 = sst [smem:[#allocation32_spill]] %s3102_s0 }
   0x2   :  { %3134 = sst [smem:[#allocation33_spill]] %s3103_s1 }
   0x3   :  { %3135 = sst [smem:[#allocation34_spill]] %s3104_s2 }
   0x4   :  { %3136 = sst [smem:[#allocation35_spill]] %s3105_s3 }
   0x5   :  { %3137 = sst [smem:[#allocation36_spill]] %s3106_s4 }
   0x6   :  { %3138 = sst [smem:[#allocation37_spill]] %s3107_s5 }
   0x7   :  { %3139 = sst [smem:[#allocation38_spill]] %s3108_s6 }
   0x8   :  { %3140 = sst [smem:[#allocation39_spill]] %s3109_s7 }
   0x9   :  { %3141 = sst [smem:[#allocation40_spill]] %s3110_s8 }
   0xa   :  { %3142 = sst [smem:[#allocation41_spill]] %s3111_s9 }
   0xb   :  { %31 = vsyncpa [#allocation4], 0 }
   0xc   :  { %32 = vsyncpa [#allocation7], 0 }
   0xd   :  { %33 = vsyncpa [#allocation10], 0 }
   0xe   :  { %34 = vsyncpa [#allocation13], 0 }
   0xf   :  { %35 = vsyncpa [#allocation16], 0 }
  0x10   :  { %36 = vsyncpa [#allocation19], 0 }
  0x11   :  { %37 = vsyncpa [#allocation22], 0  ;;  %s3143_s6 = sld [smem:[#allocation41_spill]] }
  0x17   :  { %s71_s30 = sshll.u32 %s3143_s6, 4  ;;  %s72_s30 = int_to_ptr.hbm [resolvable:$true] %s71_s30 }
  0x18   :  { %38 = vsyncpa [#allocation5], 0  ;;  %s2482_s7 = smov [#allocation6]   ;;  %s94_s8 = sshll.u32 %s3114_s12, 4  ;;  %s95_s8 = int_to_ptr.hbm [resolvable:$true] %s94_s8 }
  0x19   :  { %s73_s3 = sshll.u32 %s2482_s7, 4  ;;  %s2483_s27 = smov [#allocation9]   ;;  %s74_s3 = int_to_ptr.vmem [resolvable:$true] %s73_s3 }
  0x1a   :  { %76 = dma.hbm_to_vmem [thread:$0]  %s72_s30, 16, %s74_s3, [#allocation7]  }
  0x1b   :  { %s96_s4 = sshll.u32 %s2483_s27, 4  ;;  %s2484_s28 = smov 64   ;;  %s97_s4 = int_to_ptr.vmem [resolvable:$true] %s96_s4 }
  0x1c   :  { %s2485_s9 = smov 4   ;;  %s119_s29 = sshll.u32 %s3116_s14, 4  ;;  %s120_s29 = int_to_ptr.hbm [resolvable:$true] %s119_s29 }
  0x1d   :  { %102 = dma.hbm_to_vmem [thread:$0]  %s95_s8, 256, %s97_s4, [#allocation10], %s2484_s28, %s2484_s28, %s2485_s9  }
  0x1e   :  { %s2486_s2 = smov [#allocation12]   ;;  %s140_s30 = sshll.u32 %s3118_s16, 4  ;;  %s141_s30 = int_to_ptr.hbm [resolvable:$true] %s140_s30 }
  0x1f   :  { %s121_s6 = sshll.u32 %s2486_s2, 4  ;;  %s2487_s3 = smov [#allocation15]   ;;  %s122_s6 = int_to_ptr.vmem [resolvable:$true] %s121_s6 }
  0x20   :  { %124 = dma.hbm_to_vmem [thread:$0]  %s120_s29, 16, %s122_s6, [#allocation13]  }
  0x21   :  { %s142_s26 = sshll.u32 %s2487_s3, 4  ;;  %s167_s8 = sshll.u32 %s3121_s19, 4  ;;  %s143_s26 = int_to_ptr.vmem [resolvable:$true] %s142_s26  ;;  %s168_s8 = int_to_ptr.hbm [resolvable:$true] %s167_s8 }
  0x22   :  { %148 = dma.hbm_to_vmem [thread:$0]  %s141_s30, 256, %s143_s26, [#allocation16], %s2484_s28, %s2484_s28, %s2485_s9  }
  0x23   :  { %s3144_s5 = sld [smem:[#allocation39_spill]]  ;;  %s2488_s2 = smov [#allocation18]  }
  0x24   :  { %s169_s7 = sshll.u32 %s2488_s2, 4  ;;  %s2489_s16 = smov [#allocation3]   ;;  %s170_s7 = int_to_ptr.vmem [resolvable:$true] %s169_s7 }
  0x25   :  { %172 = dma.hbm_to_vmem [thread:$0]  %s168_s8, 16, %s170_s7, [#allocation19]  }
  0x26   :  { %s60_s29 = sshll.u32 %s2489_s16, 4  ;;  %s84_s19 = sshll.u32 %s3113_s11, 4  ;;  %s61_s29 = int_to_ptr.vmem [resolvable:$true] %s60_s29  ;;  %s85_s19 = int_to_ptr.hbm [resolvable:$true] %s84_s19 }
  0x27   :  { %s108_s30 = sshll.u32 %s3115_s13, 4  ;;  %s2490_s26 = smov [#allocation8]   ;;  %s109_s30 = int_to_ptr.hbm [resolvable:$true] %s108_s30 }
  0x28   :  { %s86_s1 = sshll.u32 %s2490_s26, 4  ;;  %s2491_s27 = smov [#allocation11]   ;;  %s87_s1 = int_to_ptr.vmem [resolvable:$true] %s86_s1 }
  0x29   :  { %s58_s0 = sshll.u32 %s3144_s5, 4  ;;  %s110_s8 = sshll.u32 %s2491_s27, 4  ;;  %s59_s0 = int_to_ptr.hbm [resolvable:$true] %s58_s0  ;;  %s111_s8 = int_to_ptr.vmem [resolvable:$true] %s110_s8 }
  0x2a   :  { %63 = dma.hbm_to_vmem [thread:$0]  %s59_s0, 16, %s61_s29, [#allocation4]  }
  0x2b   :  { %89 = dma.hbm_to_vmem [thread:$0]  %s85_s19, 16, %s87_s1, [#allocation7]  }
  0x2c   :  { %s130_s5 = sshll.u32 %s3117_s15, 4  ;;  %s154_s2 = sshll.u32 %s3119_s17, 4  ;;  %s131_s5 = int_to_ptr.hbm [resolvable:$true] %s130_s5  ;;  %s155_s2 = int_to_ptr.hbm [resolvable:$true] %s154_s2 }
  0x2d   :  { %113 = dma.hbm_to_vmem [thread:$0]  %s109_s30, 16, %s111_s8, [#allocation10]  }
  0x2e   :  { %s2492_s7 = smov [#allocation14]   ;;  %s2493_s16 = smov [#allocation17]  }
  0x2f   :  { %s132_s13 = sshll.u32 %s2492_s7, 4  ;;  %s156_s29 = sshll.u32 %s2493_s16, 4  ;;  %s133_s13 = int_to_ptr.vmem [resolvable:$true] %s132_s13  ;;  %s157_s29 = int_to_ptr.vmem [resolvable:$true] %s156_s29 }
  0x30   :  { %135 = dma.hbm_to_vmem [thread:$0]  %s131_s5, 16, %s133_s13, [#allocation13]  }
  0x31   :  { %s178_s19 = sshll.u32 %s3122_s20, 4  ;;  %s189_s9 = sshll.u32 %s3123_s21, 4  ;;  %s179_s19 = int_to_ptr.hbm [resolvable:$true] %s178_s19  ;;  %s190_s9 = int_to_ptr.hbm [resolvable:$true] %s189_s9 }
  0x32   :  { %159 = dma.hbm_to_vmem [thread:$0]  %s155_s2, 16, %s157_s29, [#allocation16]  }
  0x33   :  { %s2494_s30 = smov [#allocation20]   ;;  %s2495_s26 = smov [#allocation21]  }
  0x34   :  { %s180_s17 = sshll.u32 %s2494_s30, 4  ;;  %s191_s1 = sshll.u32 %s2495_s26, 4  ;;  %s181_s17 = int_to_ptr.vmem [resolvable:$true] %s180_s17  ;;  %s192_s1 = int_to_ptr.vmem [resolvable:$true] %s191_s1 }
  0x35   :  { %183 = dma.hbm_to_vmem [thread:$0]  %s179_s19, 16, %s181_s17, [#allocation19]  }
  0x36   :  { %194 = dma.hbm_to_vmem [thread:$0]  %s190_s9, 16, %s192_s1, [#allocation22]  }
  0x37   :  { %2466 = dma.done.wait [#allocation4], 16  }
  0x38   :  { %2467 = vsyncadd [#allocation4], 4294967280 }
  0x39   :  { %2468 = dma.done.wait [#allocation7], 32  }
  0x3a   :  { %2469 = vsyncadd [#allocation7], 4294967264 }
  0x3b   :  { %2470 = dma.done.wait [#allocation10], 272  }
  0x3c   :  { %2471 = vsyncadd [#allocation10], 4294967024 }
  0x3d   :  { %2472 = dma.done.wait [#allocation13], 32  }
  0x3e   :  { %2473 = vsyncadd [#allocation13], 4294967264 }
  0x3f   :  { %2474 = dma.done.wait [#allocation16], 272  }
  0x40   :  { %2475 = vsyncadd [#allocation16], 4294967024 }
  0x41   :  { %2476 = dma.done.wait [#allocation19], 32  }
  0x42   :  { %2477 = vsyncadd [#allocation19], 4294967264 }
  0x43   :  { %2478 = dma.done.wait [#allocation22], 16  }
  0x44   :  { %2479 = vsyncadd [#allocation22], 4294967280  ;;  %s3145_s27 = sld [smem:[#allocation34_spill]]  ;;  %vm279_vm0 = vcmask 261120   ;;  %s2496_s29 = smov 120   ;;  %vm304_vm1 = vcmask 64512   ;;  %v252_v38 = vlaneseq }
  0x45   :  { %s3146_s11 = sld [smem:[#allocation32_spill]]  ;;  %s2497_s6 = smov 88   ;;  %v2503_v41 = vmov 0.0   ;;  %vm377_vm3 = vcmask 1043456   ;;  %vm537_vm4 = vcmask 130112   ;;  %vm660_vm5 = vcmask 195712  }
  0x46   :  { %s3147_s16 = sld [smem:[#allocation35_spill]]  ;;  %s2498_s12 = smov 96   ;;  %v253_v39 = vshrl.u32 %v252_v38, 7  ;;  %v255_v40 = vand.u32 127, %v252_v38  ;;  %vm783_vm6 = vcmask 261312  }
  0x47   :  { %s2499_s19 = smov 112   ;;  %s2500_s15 = smov 80  }
  0x48   :  { %s2501_s3 = smov 72   ;;  %s2502_s9 = smov 104   ;;  %vm256_vm2 = vcmp.gt.s32.totalorder %v255_v40, %v253_v39 }
  0x49   :  { %v257_v42 = vsel %vm256_vm2, -1e+09, %v2503_v41  ;;  %s2504_s30 = smov 56   ;;  %s2506_s17 = smov 40  }
  0x4a   :  { %v2011_v0 = vld [vmem:[%s3145_s27 + $0x8] sm:$0xff]  ;;  %v2010_v1 = vld [vmem:[%s3145_s27] sm:$0xff]  ;;  %s2507_s26 = smov 8   ;;  %s2508_s1 = smov 16  }
  0x4b   :  { %v2692_v2 = vld [vmem:[%s3146_s11] sm:$0xff]  ;;  %v2697_v3 = vld [vmem:[%s3146_s11 + $0x8] sm:$0xff]  ;;  %289 = vmatpush.bf16.msra.mxu0 %v2011_v0  ;;  %s2509_s20 = smov 24   ;;  %s3148_s8 = sld [smem:[#allocation36_spill]] }
  0x4c   :  { %v258_v4 = vpack.c.bf16 %v2697_v3, %v2692_v2  ;;  %v2057_v5 = vld [vmem:[%s3147_s16] ss:$0 sm:$0xff]  ;;  %s3149_s0 = sld [smem:[#allocation37_spill]]  ;;  %s1886_s16 = sshll.u32 %s3127_s25, 4  ;;  %s1887_s16 = int_to_ptr.hbm [resolvable:$true] %s1886_s16 }
  0x4d   :  { %s3151_s14 = sld [smem:[#allocation40_spill]] }
  0x4e   :  { %s3152_s2 = sld [smem:[#allocation38_spill]] }
  0x4f   :  { %290 = vmatpush.bf16.msra.mxu0 %v2010_v1 }
  0x52   :  { %1915 = vmatmul.msk.bf16.vlgmr.msra.gmra.mxu0 %vm279_vm0, %v258_v4 }
  0xcf   :  { %v292_v6 = vpop.f32.mrf.mxu0 }
  0xd0   :  { %v293_v7 = vadd.f32 %v2057_v5, %v292_v6 }
  0xd2   :  { %v297_v8 = vpack.c.bf16 %v293_v7, %v293_v7 }
  0xd4   :  { %v300_v9 = vunpack.c.l.b16 %v297_v8 }
  0xd6   :  { %v2705_v10 = vpack.c.b16 %v300_v9, %v300_v9 }
  0xd7   :  { %v294_v11 = vpop.f32.mrf.mxu0 }
  0xd8   :  { %v295_v12 = vadd.f32 %v2057_v5, %v294_v11  ;;  %417 = vrot.lane.b32.xlu2 %v2705_v10, %s2496_s29  ;;  %419 = vrot.lane.b32.xlu1 %v2705_v10, %s2497_s6 }
  0xd9   :  { %302 = vrot.lane.b32.xlu0 %v2705_v10, %s2498_s12 }
  0xda   :  { %v298_v13 = vpack.c.bf16 %v295_v12, %v295_v12 }
  0xdc   :  { %v325_v14 = vunpack.c.l.b16 %v298_v13 }
  0xde   :  { %v2713_v15 = vpack.c.b16 %v325_v14, %v325_v14 }
  0xe0   :  { %440 = vrot.lane.b32.xlu2 %v2713_v15, %s2496_s29  ;;  %442 = vrot.lane.b32.xlu1 %v2713_v15, %s2497_s6 }
  0xe1   :  { %327 = vrot.lane.b32.xlu0 %v2713_v15, %s2498_s12 }
  0xe8   :  { %540 = vrot.lane.b32.xlu2 %v2705_v10, %s2499_s19  ;;  %565 = vrot.lane.b32.xlu1 %v2713_v15, %s2500_s15 }
  0xe9   :  { %542 = vrot.lane.b32.xlu0 %v2705_v10, %s2500_s15 }
  0xf0   :  { %688 = vrot.lane.b32.xlu2 %v2713_v15, %s2501_s3  ;;  %665 = vrot.lane.b32.xlu1 %v2705_v10, %s2501_s3 }
  0xf1   :  { %563 = vrot.lane.b32.xlu0 %v2713_v15, %s2499_s19 }
  0xf8   :  { %686 = vrot.lane.b32.xlu1 %v2713_v15, %s2502_s9 }
  0xf9   :  { %663 = vrot.lane.b32.xlu0 %v2705_v10, %s2502_s9 }
 0x132   :  { %v418_v16 = vpop.permute.xlu2 %417 }
 0x13a   :  { %v441_v21 = vpop.permute.xlu2 %440 }
 0x142   :  { %v541_v26 = vpop.permute.xlu2 %540 }
 0x14a   :  { %v420_v17 = vpop.permute.xlu1 %419  ;;  %v689_v31 = vpop.permute.xlu2 %688 }
 0x14b   :  { %v303_v18 = vpop.permute.xlu0 %302  ;;  %v425_v19 = vsel %vm304_vm1, %v420_v17, 0  ;;  %v694_v34 = vsel %vm304_vm1, %v689_v31, 0 }
 0x14c   :  { %v309_v20 = vsel %vm304_vm1, %v303_v18, 0  ;;  %434 = vmatpush.bf16.xpose.msrb.mxu0 %v425_v19 }
 0x14d   :  { %318 = vmatpush.bf16.xpose.msra.mxu1 %v309_v20 }
 0x152   :  { %v443_v22 = vpop.permute.xlu1 %442 }
 0x153   :  { %v328_v23 = vpop.permute.xlu0 %327  ;;  %1920 = vmatmul.msk.bf16.vlgmr.msrb.gmra.mxu0 %vm304_vm1, %v418_v16  ;;  %v448_v24 = vsel %vm304_vm1, %v443_v22, 0 }
 0x154   :  { %1916 = vmatmul.msk.bf16.vlgmr.msra.gmra.mxu1 %vm304_vm1, %v297_v8  ;;  %v333_v25 = vsel %vm304_vm1, %v328_v23, 0 }
 0x155   :  { %342 = vmatpush.bf16.xpose.msra.mxu2 %v333_v25  ;;  %457 = vmatpush.bf16.xpose.msrb.mxu1 %v448_v24 }
 0x15a   :  { %v566_v27 = vpop.permute.xlu1 %565 }
 0x15b   :  { %v571_v28 = vsel %vm304_vm1, %v566_v27, 0  ;;  %v543_v29 = vpop.permute.xlu0 %542 }
 0x15c   :  { %v548_v30 = vsel %vm304_vm1, %v543_v29, 0  ;;  %1917 = vmatmul.msk.bf16.vlgmr.msra.gmra.mxu2 %vm304_vm1, %v298_v13 }
 0x15d   :  { %580 = vmatpush.bf16.xpose.msra.mxu1 %v571_v28  ;;  %557 = vmatpush.bf16.xpose.msra.mxu0 %v548_v30 }
 0x162   :  { %v666_v32 = vpop.permute.xlu1 %665 }
 0x163   :  { %v671_v33 = vsel %vm304_vm1, %v666_v32, 0  ;;  %v564_v35 = vpop.permute.xlu0 %563 }
 0x164   :  { %1921 = vmatmul.msk.bf16.vlgmr.msrb.gmra.mxu1 %vm304_vm1, %v441_v21  ;;  %1924 = vmatmul.msk.bf16.vlgmr.msra.gmra.mxu0 %vm304_vm1, %v541_v26 }
 0x165   :  { %703 = vmatpush.bf16.xpose.msrb.mxu1 %v694_v34  ;;  %680 = vmatpush.bf16.xpose.msrb.mxu0 %v671_v33 }
 0x16a   :  { %v687_v37 = vpop.permute.xlu1 %686 }
 0x16b   :  { %v664_v36 = vpop.permute.xlu0 %663 }
 0x174   :  { %1925 = vmatmul.msk.bf16.vlgmr.msra.gmra.mxu1 %vm304_vm1, %v564_v35  ;;  %1928 = vmatmul.msk.bf16.vlgmr.msrb.gmra.mxu0 %vm304_vm1, %v664_v36 }
 0x184   :  { %1929 = vmatmul.msk.bf16.vlgmr.msrb.gmra.mxu1 %vm304_vm1, %v687_v37 }
 0x1d0   :  { %v436_v43 = vpop.f32.mrf.mxu0 }
 0x1d1   :  { %v320_v44 = vpop.f32.mrf.mxu1  ;;  %v437_v45 = vadd.f32 %v436_v43, %v257_v42 }
 0x1d2   :  { %v321_v46 = vadd.f32 %v320_v44, %v257_v42 }
 0x1d3   :  { %v463_v47 = vsel %vm304_vm1, %v437_v45, -inf }
 0x1d4   :  { %464 = vmax.xlane.f32.xlu1 %v463_v47  ;;  %v348_v48 = vsel %vm304_vm1, %v321_v46, -inf }
 0x1d5   :  { %349 = vmax.xlane.f32.xlu2 %v348_v48 }
 0x1d8   :  { %v438_v49 = vpop.f32.mrf.mxu0 }
 0x1d9   :  { %v322_v50 = vpop.f32.mrf.mxu1 }
 0x1df   :  { %v344_v51 = vpop.f32.mrf.mxu2 }
 0x1e0   :  { %v345_v52 = vadd.f32 %v344_v51, %v257_v42 }
 0x1e1   :  { %v459_v53 = vpop.f32.mrf.mxu1  ;;  %v559_v54 = vpop.f32.mrf.mxu0 }
 0x1e2   :  { %v460_v55 = vadd.f32 %v459_v53, %v257_v42  ;;  %v2755_v56 = vadd.f32 %v559_v54, %v257_v42  ;;  %v351_v57 = vsel %vm304_vm1, %v345_v52, -inf }
 0x1e3   :  { %352 = vmax.xlane.f32.xlu0 %v351_v57 }
 0x1e4   :  { %v466_v58 = vsel %vm304_vm1, %v460_v55, -inf  ;;  %v586_v12 = vsel %vm304_vm1, %v2755_v56, -inf }
 0x1e5   :  { %467 = vmax.xlane.f32.xlu2 %v466_v58 }
 0x1e7   :  { %v346_v59 = vpop.f32.mrf.mxu2 }
 0x1e9   :  { %v461_v60 = vpop.f32.mrf.mxu1  ;;  %v561_v61 = vpop.f32.mrf.mxu0 }
 0x1ed   :  { %394 = vrot.lane.b32.xlu1 %v2713_v15, %s2484_s28 }
 0x1f1   :  { %v582_v62 = vpop.f32.mrf.mxu1  ;;  %v682_v63 = vpop.f32.mrf.mxu0 }
 0x1f2   :  { %v583_v7 = vadd.f32 %v582_v62, %v257_v42  ;;  %v683_v11 = vadd.f32 %v682_v63, %v257_v42 }
 0x1f4   :  { %v589_v9 = vsel %vm304_vm1, %v583_v7, -inf  ;;  %v709_v13 = vsel %vm304_vm1, %v683_v11, -inf }
 0x1f5   :  { %508 = vrot.lane.b32.xlu1 %v2713_v15, %s2504_s30 }
 0x1f7   :  { %487 = vrot.lane.b32.xlu0 %v2705_v10, %s2504_s30  ;;  %s2512_s30 = smov 128  }
 0x1f9   :  { %v584_v0 = vpop.f32.mrf.mxu1  ;;  %v684_v1 = vpop.f32.mrf.mxu0 }
 0x1fd   :  { %372 = vrot.lane.b32.xlu2 %v2705_v10, %s2484_s28  ;;  %s2505_s28 = smov 48  }
 0x201   :  { %v705_v4 = vpop.f32.mrf.mxu1 }
 0x202   :  { %v706_v6 = vadd.f32 %v705_v4, %v257_v42 }
 0x204   :  { %v712_v8 = vsel %vm304_vm1, %v706_v6, -inf }
 0x209   :  { %v707_v5 = vpop.f32.mrf.mxu1 }
 0x21f   :  { %713 = vmax.xlane.f32.xlu1 %v712_v8 }
 0x221   :  { %590 = vmax.xlane.f32.xlu0 %v589_v9 }
 0x226   :  { %587 = vmax.xlane.f32.xlu2 %v586_v12 }
 0x229   :  { %710 = vmax.xlane.f32.xlu0 %v709_v13 }
 0x247   :  { %v465_v14 = vpop.xlane.xlu1 %464 }
 0x248   :  { %v469_v16 = vsub.f32 %v437_v45, %v465_v14  ;;  %v350_v17 = vpop.xlane.xlu2 %349 }
 0x249   :  { %v354_v18 = vsub.f32 %v321_v46, %v350_v17 }
 0x24a   :  { %v471_v19 = vmul.f32 1.442695, %v469_v16 }
 0x24b   :  { %v356_v20 = vmul.f32 1.442695, %v354_v18 }
 0x24c   :  { %2072 = vpow2.f32 %v471_v19 }
 0x24d   :  { %2074 = vpow2.f32 %v356_v20 }
 0x252   :  { %v2770_v21 = vpop.eup %2072 }
 0x253   :  { %v2772_v22 = vpop.eup %2074  ;;  %v475_v23 = vsel %vm304_vm1, %v2770_v21, 0.0 }
 0x254   :  { %v360_v24 = vsel %vm304_vm1, %v2772_v22, 0.0  ;;  %476 = vadd.xlane.f32.xlu0 %v475_v23 }
 0x255   :  { %361 = vadd.xlane.f32.xlu1 %v360_v24 }
 0x256   :  { %v353_v25 = vpop.xlane.xlu0 %352 }
 0x257   :  { %v355_v26 = vsub.f32 %v345_v52, %v353_v25 }
 0x258   :  { %v468_v27 = vpop.xlane.xlu2 %467 }
 0x259   :  { %v358_v28 = vmul.f32 1.442695, %v355_v26  ;;  %v470_v29 = vsub.f32 %v460_v55, %v468_v27 }
 0x25b   :  { %2076 = vpow2.f32 %v358_v28  ;;  %v473_v30 = vmul.f32 1.442695, %v470_v29 }
 0x25d   :  { %2078 = vpow2.f32 %v473_v30 }
 0x25f   :  { %v395_v31 = vpop.permute.xlu1 %394 }
 0x260   :  { %v373_v32 = vpop.permute.xlu2 %372  ;;  %v400_v33 = vsel %vm377_vm3, %v395_v31, 0 }
 0x261   :  { %v2779_v34 = vpop.eup %2076  ;;  %v379_v35 = vsel %vm377_vm3, %v373_v32, 0 }
 0x262   :  { %388 = vmatpush.bf16.msra.mxu3 %v379_v35  ;;  %v363_v36 = vsel %vm304_vm1, %v2779_v34, 0.0 }
 0x263   :  { %v2784_v37 = vpop.eup %2078  ;;  %364 = vadd.xlane.f32.xlu0 %v363_v36 }
 0x264   :  { %v478_v38 = vsel %vm304_vm1, %v2784_v37, 0.0 }
 0x265   :  { %479 = vadd.xlane.f32.xlu2 %v478_v38 }
 0x266   :  { %409 = vmatpush.bf16.msrb.mxu3 %v400_v33 }
 0x267   :  { %v509_v41 = vpop.permute.xlu1 %508 }
 0x268   :  { %v514_v8 = vsel %vm377_vm3, %v509_v41, 0 }
 0x269   :  { %v488_v39 = vpop.permute.xlu0 %487 }
 0x26a   :  { %v493_v40 = vsel %vm377_vm3, %v488_v39, 0 }
 0x26b   :  { %502 = vmatpush.bf16.msrb.mxu2 %v493_v40 }
 0x26e   :  { %631 = vrot.lane.b32.xlu1 %v2713_v15, %s2505_s28 }
 0x27d   :  { %610 = vrot.lane.b32.xlu2 %v2705_v10, %s2505_s28 }
 0x292   :  { %v714_v42 = vpop.xlane.xlu1 %713 }
 0x293   :  { %v716_v43 = vsub.f32 %v706_v6, %v714_v42 }
 0x294   :  { %v591_v44 = vpop.xlane.xlu0 %590 }
 0x295   :  { %v593_v45 = vsub.f32 %v583_v7, %v591_v44  ;;  %v719_v47 = vmul.f32 1.442695, %v716_v43 }
 0x297   :  { %v596_v46 = vmul.f32 1.442695, %v593_v45 }
 0x299   :  { %2080 = vpow2.f32 %v596_v46  ;;  %v588_v48 = vpop.xlane.xlu2 %587 }
 0x29a   :  { %v592_v49 = vsub.f32 %v2755_v56, %v588_v48  ;;  %2082 = vpow2.f32 %v719_v47 }
 0x29c   :  { %v594_v50 = vmul.f32 1.442695, %v592_v49  ;;  %v711_v51 = vpop.xlane.xlu0 %710 }
 0x29d   :  { %v715_v52 = vsub.f32 %v683_v11, %v711_v51 }
 0x29e   :  { %2084 = vpow2.f32 %v594_v50 }
 0x29f   :  { %v2081_v53 = vpop.eup %2080  ;;  %v717_v54 = vmul.f32 1.442695, %v715_v52 }
 0x2a0   :  { %v601_v55 = vsel %vm304_vm1, %v2081_v53, 0.0  ;;  %v2793_v57 = vpop.eup %2082 }
 0x2a1   :  { %2086 = vpow2.f32 %v717_v54  ;;  %602 = vadd.xlane.f32.xlu0 %v601_v55  ;;  %v724_v60 = vsel %vm304_vm1, %v2793_v57, 0.0 }
 0x2a4   :  { %v2085_v58 = vpop.eup %2084 }
 0x2a5   :  { %v598_v59 = vsel %vm304_vm1, %v2085_v58, 0.0 }
 0x2a6   :  { %599 = vadd.xlane.f32.xlu1 %v598_v59  ;;  %725 = vadd.xlane.f32.xlu2 %v724_v60  ;;  %v2013_v60 = vld [vmem:[%s3148_s8 + $0x8] sm:$0xff] }
 0x2a7   :  { %v2087_v56 = vpop.eup %2086  ;;  %818 = vmatpush.bf16.msra.mxu0 %v2013_v60 }
 0x2a8   :  { %v721_v61 = vsel %vm304_vm1, %v2087_v56, 0.0 }
 0x2a9   :  { %722 = vadd.xlane.f32.xlu0 %v721_v61 }
 0x2bd   :  { %733 = vrot.lane.b32.xlu0 %v2705_v10, %s2506_s17 }
 0x2bf   :  { %754 = vrot.lane.b32.xlu1 %v2713_v15, %s2506_s17  ;;  %s3150_s17 = sld [smem:[#allocation33_spill]] }
 0x2c7   :  { %v477_v62 = vpop.xlane.xlu0 %476 }
 0x2c8   :  { %v362_v63 = vpop.xlane.xlu1 %361  ;;  %2088 = vrcp.f32 %v477_v62 }
 0x2c9   :  { %2090 = vrcp.f32 %v362_v63 }
 0x2ce   :  { %v2089_v0 = vpop.eup %2088 }
 0x2cf   :  { %v2091_v1 = vpop.eup %2090  ;;  %v483_v4 = vmul.f32 %v2089_v0, %v2770_v21 }
 0x2d0   :  { %v368_v5 = vmul.f32 %v2091_v1, %v2772_v22 }
 0x2d1   :  { %v485_v6 = vpack.c.bf16 %v483_v4, %v483_v4 }
 0x2d2   :  { %v370_v7 = vpack.c.bf16 %v368_v5, %v368_v5 }
 0x2d3   :  { %1922 = vmatmul.msk.bf16.vlgmr.msrb.gmra.mxu2 %vm304_vm1, %v485_v6  ;;  %v2058_v6 = vld [vmem:[%s3149_s0] ss:$0 sm:$0xff] }
 0x2d4   :  { %1918 = vmatmul.msk.bf16.vlgmr.msra.gmra.mxu3 %vm304_vm1, %v370_v7 }
 0x2d5   :  { %523 = vmatpush.bf16.msra.mxu3 %v514_v8 }
 0x2d6   :  { %v365_v10 = vpop.xlane.xlu0 %364 }
 0x2d7   :  { %2092 = vrcp.f32 %v365_v10 }
 0x2d8   :  { %v480_v15 = vpop.xlane.xlu2 %479 }
 0x2d9   :  { %2094 = vrcp.f32 %v480_v15 }
 0x2dd   :  { %v2093_v9 = vpop.eup %2092 }
 0x2de   :  { %v369_v11 = vmul.f32 %v2093_v9, %v2779_v34 }
 0x2df   :  { %v2095_v18 = vpop.eup %2094 }
 0x2e0   :  { %v611_v12 = vpop.permute.xlu2 %610  ;;  %v632_v14 = vpop.permute.xlu1 %631  ;;  %v371_v16 = vpack.c.bf16 %v369_v11, %v369_v11  ;;  %v484_v19 = vmul.f32 %v2095_v18, %v2784_v37  ;;  %v2017_v18 = vld [vmem:[%s3112_s10 + $0x8] sm:$0xff] }
 0x2e1   :  { %v616_v13 = vsel %vm377_vm3, %v611_v12, 0  ;;  %v637_v17 = vsel %vm377_vm3, %v632_v14, 0  ;;  %v2510_v14 = vmov 32.0  }
 0x2e2   :  { %625 = vmatpush.bf16.msra.mxu2 %v616_v13  ;;  %v486_v20 = vpack.c.bf16 %v484_v19, %v484_v19 }
 0x2e4   :  { %1919 = vmatmul.msk.bf16.vlgmr.msrb.gmra.mxu3 %vm304_vm1, %v371_v16 }
 0x2e5   :  { %646 = vmatpush.bf16.msrb.mxu3 %v637_v17 }
 0x2f4   :  { %1923 = vmatmul.msk.bf16.vlgmr.msra.gmra.mxu3 %vm304_vm1, %v486_v20  ;;  %v251_v20 = vld [vmem:[%s3150_s17 + $0x8] sm:$0xff] }
 0x314   :  { %v603_v21 = vpop.xlane.xlu0 %602 }
 0x315   :  { %2096 = vrcp.f32 %v603_v21 }
 0x319   :  { %v600_v22 = vpop.xlane.xlu1 %599  ;;  %v726_v28 = vpop.xlane.xlu2 %725 }
 0x31a   :  { %2098 = vrcp.f32 %v600_v22 }
 0x31b   :  { %v2097_v23 = vpop.eup %2096  ;;  %2100 = vrcp.f32 %v726_v28 }
 0x31c   :  { %v607_v24 = vmul.f32 %v2097_v23, %v2081_v53  ;;  %v723_v30 = vpop.xlane.xlu0 %722 }
 0x31d   :  { %2102 = vrcp.f32 %v723_v30 }
 0x31e   :  { %v609_v25 = vpack.c.bf16 %v607_v24, %v607_v24  ;;  %2104 = vrcp.f32 %v2510_v14 }
 0x320   :  { %1927 = vmatmul.msk.bf16.vlgmr.msrb.gmra.mxu3 %vm304_vm1, %v609_v25  ;;  %v2099_v26 = vpop.eup %2098 }
 0x321   :  { %v606_v27 = vmul.f32 %v2099_v26, %v2085_v58  ;;  %v2101_v31 = vpop.eup %2100 }
 0x322   :  { %v730_v34 = vmul.f32 %v2101_v31, %v2793_v57 }
 0x323   :  { %v608_v29 = vpack.c.bf16 %v606_v27, %v606_v27  ;;  %v2103_v32 = vpop.eup %2102 }
 0x324   :  { %v729_v35 = vmul.f32 %v2103_v32, %v2087_v56  ;;  %v732_v39 = vpack.c.bf16 %v730_v34, %v730_v34  ;;  %v2012_v56 = vld [vmem:[%s3148_s8] sm:$0xff]  ;;  %v2105_v16 = vpop.eup %2104 }
 0x325   :  { %1926 = vmatmul.msk.bf16.vlgmr.msra.gmra.mxu2 %vm304_vm1, %v608_v29  ;;  %819 = vmatpush.bf16.msra.mxu0 %v2012_v56  ;;  %v835_v17 = vmul.f32 32.0, %v2105_v16  ;;  %vm839_vm7 = vweird.f32 %v2105_v16 }
 0x326   :  { %v731_v40 = vpack.c.bf16 %v729_v35, %v729_v35  ;;  %v2015_v35 = vld [vmem:[%s3151_s14 + $0x8] sm:$0xff] }
 0x327   :  { %v836_v19 = vsub.f32 1.0, %v835_v17  ;;  %921 = vmatpush.bf16.msra.mxu1 %v2015_v35  ;;  %v2062_v17 = vld [vmem:[#allocation6] ss:$0 sm:$0xff] }
 0x329   :  { %v837_v22 = vmul.f32 %v2105_v16, %v836_v19 }
 0x32b   :  { %v838_v23 = vadd.f32 %v2105_v16, %v837_v22 }
 0x32d   :  { %v2860_v24 = vsel %vm839_vm7, %v2105_v16, %v838_v23 }
 0x32f   :  { %v734_v33 = vpop.permute.xlu0 %733 }
 0x330   :  { %v739_v36 = vsel %vm377_vm3, %v734_v33, 0 }
 0x331   :  { %v755_v37 = vpop.permute.xlu1 %754  ;;  %748 = vmatpush.bf16.msrb.mxu2 %v739_v36 }
 0x332   :  { %v760_v38 = vsel %vm377_vm3, %v755_v37, 0 }
 0x333   :  { %769 = vmatpush.bf16.msra.mxu3 %v760_v38 }
 0x335   :  { %1930 = vmatmul.msk.bf16.vlgmr.msrb.gmra.mxu2 %vm304_vm1, %v731_v40  ;;  %v2061_v40 = vld [vmem:[#allocation8] ss:$0 sm:$0xff] }
 0x336   :  { %1931 = vmatmul.msk.bf16.vlgmr.msra.gmra.mxu3 %vm304_vm1, %v732_v39  ;;  %959 = vmatpush.bf16.msra.mxu2 %v2017_v18  ;;  %v2014_v39 = vld [vmem:[%s3151_s14] sm:$0xff] }
 0x337   :  { %922 = vmatpush.bf16.msra.mxu1 %v2014_v39 }
 0x356   :  { %v504_v41 = vpop.f32.mrf.mxu2 }
 0x357   :  { %v390_v42 = vpop.f32.mrf.mxu3  ;;  %531 = vrot.lane.b32.xlu0 %v504_v41, %s2507_s26 }
 0x358   :  { %415 = vst.msk [vmem:[#allocation2] sm:$0xff] %vm304_vm1, %v390_v42 }
 0x35e   :  { %v506_v43 = vpop.f32.mrf.mxu2 }
 0x35f   :  { %v392_v44 = vpop.f32.mrf.mxu3 }
 0x367   :  { %v411_v45 = vpop.f32.mrf.mxu3 }
 0x368   :  { %416 = vst.msk [vmem:[#allocation2 + $0x8] sm:$0xff] %vm304_vm1, %v411_v45 }
 0x36f   :  { %v413_v46 = vpop.f32.mrf.mxu3 }
 0x377   :  { %v525_v47 = vpop.f32.mrf.mxu3 }
 0x378   :  { %533 = vrot.lane.b32.xlu1 %v525_v47, %s2507_s26 }
 0x37f   :  { %v527_v48 = vpop.f32.mrf.mxu3 }
 0x3a3   :  { %v648_v49 = vpop.f32.mrf.mxu3 }
 0x3a4   :  { %656 = vrot.lane.b32.xlu1 %v648_v49, %s2508_s1 }
 0x3a8   :  { %v627_v50 = vpop.f32.mrf.mxu2 }
 0x3a9   :  { %654 = vrot.lane.b32.xlu0 %v627_v50, %s2508_s1 }
 0x3ab   :  { %v650_v51 = vpop.f32.mrf.mxu3 }
 0x3b0   :  { %v629_v52 = vpop.f32.mrf.mxu2 }
 0x3b8   :  { %v750_v53 = vpop.f32.mrf.mxu2 }
 0x3b9   :  { %v771_v54 = vpop.f32.mrf.mxu3  ;;  %777 = vrot.lane.b32.xlu2 %v750_v53, %s2509_s20 }
 0x3ba   :  { %779 = vrot.lane.b32.xlu0 %v771_v54, %s2509_s20 }
 0x3c0   :  { %v752_v55 = vpop.f32.mrf.mxu2 }
 0x3c1   :  { %v773_v57 = vpop.f32.mrf.mxu3 }
 0x3c9   :  { %v532_v58 = vpop.permute.xlu0 %531 }
 0x3ca   :  { %538 = vst.msk [vmem:[#allocation2] sm:$0xff] %vm537_vm4, %v532_v58 }
 0x3ea   :  { %v534_v59 = vpop.permute.xlu1 %533 }
 0x3eb   :  { %539 = vst.msk [vmem:[#allocation2 + $0x8] sm:$0xff] %vm537_vm4, %v534_v59 }
 0x413   :  { %v778_v63 = vpop.permute.xlu2 %777 }
 0x416   :  { %v657_v61 = vpop.permute.xlu1 %656 }
 0x417   :  { %662 = vst.msk [vmem:[#allocation2 + $0x8] sm:$0xff] %vm660_vm5, %v657_v61 }
 0x41b   :  { %v655_v62 = vpop.permute.xlu0 %654 }
 0x41c   :  { %661 = vst.msk [vmem:[#allocation2] sm:$0xff] %vm660_vm5, %v655_v62 }
 0x41d   :  { %784 = vst.msk [vmem:[#allocation2] sm:$0xff] %vm783_vm6, %v778_v63 }
 0x424   :  { %v786_v1 = vld [vmem:[#allocation2] sm:$0xff] }
 0x42c   :  { %v780_v0 = vpop.permute.xlu0 %779 }
 0x42d   :  { %785 = vst.msk [vmem:[#allocation2 + $0x8] sm:$0xff] %vm783_vm6, %v780_v0 }
 0x434   :  { %v787_v4 = vld [vmem:[#allocation2 + $0x8] sm:$0xff] }
 0x435   :  { %v788_v5 = vpack.c.bf16 %v787_v4, %v786_v1 }
 0x437   :  { %1940 = vmatmul.msk.bf16.vlgmr.msra.gmra.mxu0 %vm279_vm0, %v788_v5 }
 0x4b4   :  { %v821_v7 = vpop.f32.mrf.mxu0 }
 0x4b5   :  { %v822_v8 = vadd.f32 %v2058_v6, %v821_v7 }
 0x4b7   :  { %v826_v10 = vadd.f32 %v822_v8, %v2692_v2  ;;  %v2016_v2 = vld [vmem:[%s3112_s10] sm:$0xff] }
 0x4b8   :  { %960 = vmatpush.bf16.msra.mxu2 %v2016_v2 }
 0x4b9   :  { %v828_v15 = vsel %vm279_vm0, %v826_v10, 0.0 }
 0x4ba   :  { %829 = vadd.xlane.f32.xlu1 %v828_v15  ;;  %v2060_v15 = vld [vmem:[#allocation3] ss:$0 sm:$0xff] }
 0x4bc   :  { %v823_v9 = vpop.f32.mrf.mxu0 }
 0x4bd   :  { %v824_v11 = vadd.f32 %v2058_v6, %v823_v9  ;;  %v2059_v6 = vld [vmem:[%s3152_s2] ss:$0 sm:$0xff] }
 0x4bf   :  { %v827_v12 = vadd.f32 %v824_v11, %v2697_v3  ;;  %v250_v3 = vld [vmem:[%s3150_s17] sm:$0xff] }
 0x4c0   :  { %v929_v21 = vpack.c.bf16 %v251_v20, %v250_v3 }
 0x4c1   :  { %v831_v13 = vsel %vm279_vm0, %v827_v12, 0.0 }
 0x4c2   :  { %832 = vadd.xlane.f32.xlu0 %v831_v13  ;;  %1958 = vmatmul.msk.bf16.vlgmr.msra.gmra.mxu2 %vm279_vm0, %v929_v21 }
 0x52d   :  { %v830_v25 = vpop.xlane.xlu1 %829 }
 0x52e   :  { %v841_v26 = vmul.f32 %v2860_v24, %v830_v25 }
 0x530   :  { %v843_v27 = vsub.f32 %v826_v10, %v841_v26 }
 0x532   :  { %v845_v28 = vmul.f32 %v843_v27, %v843_v27 }
 0x534   :  { %v847_v29 = vsel %vm279_vm0, %v845_v28, 0.0 }
 0x535   :  { %v833_v30 = vpop.xlane.xlu0 %832  ;;  %848 = vadd.xlane.f32.xlu2 %v847_v29 }
 0x536   :  { %v842_v31 = vmul.f32 %v2860_v24, %v833_v30 }
 0x538   :  { %v844_v32 = vsub.f32 %v827_v12, %v842_v31 }
 0x53a   :  { %v846_v33 = vmul.f32 %v844_v32, %v844_v32 }
 0x53c   :  { %v850_v34 = vsel %vm279_vm0, %v846_v33, 0.0 }
 0x53d   :  { %851 = vadd.xlane.f32.xlu1 %v850_v34 }
 0x545   :  { %v962_v41 = vpop.f32.mrf.mxu2 }
 0x546   :  { %v963_v44 = vadd.f32 %v2061_v40, %v962_v41 }
 0x548   :  { %v969_v47 = vpack.c.bf16 %v963_v44, %v963_v44 }
 0x54a   :  { %v975_v49 = vsel %vm304_vm1, %v969_v47, 0  ;;  %v1060_v50 = vunpack.c.l.b16 %v969_v47 }
 0x54b   :  { %984 = vmatpush.bf16.xpose.msrb.mxu3 %v975_v49 }
 0x54c   :  { %v2875_v52 = vpack.c.b16 %v1060_v50, %v1060_v50 }
 0x54d   :  { %v964_v53 = vpop.f32.mrf.mxu2 }
 0x54e   :  { %v965_v55 = vadd.f32 %v2061_v40, %v964_v53  ;;  %1114 = vrot.lane.b32.xlu0 %v2875_v52, %s2496_s29 }
 0x550   :  { %v970_v58 = vpack.c.bf16 %v965_v55, %v965_v55 }
 0x552   :  { %v994_v61 = vsel %vm304_vm1, %v970_v58, 0  ;;  %v1084_v62 = vunpack.c.l.b16 %v970_v58 }
 0x553   :  { %1003 = vmatpush.bf16.xpose.msrb.mxu0 %v994_v61 }
 0x554   :  { %v2880_v0 = vpack.c.b16 %v1084_v62, %v1084_v62 }
 0x556   :  { %1140 = vrot.lane.b32.xlu1 %v2880_v0, %s2496_s29 }
 0x55e   :  { %1267 = vrot.lane.b32.xlu1 %v2875_v52, %s2499_s19 }
 0x5a8   :  { %v849_v36 = vpop.xlane.xlu2 %848 }
 0x5a9   :  { %v853_v37 = vmul.f32 %v849_v36, %v2860_v24 }
 0x5ab   :  { %v855_v38 = vadd.f32 1e-05, %v853_v37 }
 0x5ad   :  { %2106 = vrsqrt.f32 %v855_v38  ;;  %vm863_vm9 = vweird.f32 %v855_v38 }
 0x5b0   :  { %v852_v42 = vpop.xlane.xlu1 %851 }
 0x5b1   :  { %v854_v43 = vmul.f32 %v852_v42, %v2860_v24 }
 0x5b3   :  { %v2107_v45 = vpop.eup %2106  ;;  %v856_v46 = vadd.f32 1e-05, %v854_v43 }
 0x5b4   :  { %v858_v48 = vmul.f32 %v2107_v45, %v855_v38  ;;  %vm864_vm8 = vweird.f32 %v2107_v45 }
 0x5b5   :  { %2108 = vrsqrt.f32 %v856_v46  ;;  %vm865_vm10 = vmor %vm863_vm9, %vm864_vm8  ;;  %vm873_vm12 = vweird.f32 %v856_v46 }
 0x5b6   :  { %v859_v51 = vmul.f32 %v2107_v45, %v858_v48 }
 0x5b8   :  { %v860_v54 = vmul.f32 0.5, %v859_v51 }
 0x5ba   :  { %v861_v57 = vsub.f32 1.5, %v860_v54 }
 0x5bb   :  { %v2109_v59 = vpop.eup %2108 }
 0x5bc   :  { %v862_v60 = vmul.f32 %v2107_v45, %v861_v57  ;;  %v868_v56 = vmul.f32 %v2109_v59, %v856_v46  ;;  %vm874_vm11 = vweird.f32 %v2109_v59 }
 0x5bd   :  { %vm875_vm13 = vmor %vm873_vm12, %vm874_vm11 }
 0x5be   :  { %v869_v63 = vmul.f32 %v2109_v59, %v868_v56  ;;  %v866_v1 = vsel %vm865_vm10, %v2107_v45, %v862_v60 }
 0x5bf   :  { %v877_v7 = vmul.f32 %v866_v1, %v843_v27 }
 0x5c0   :  { %v870_v4 = vmul.f32 0.5, %v869_v63  ;;  %v1115_v23 = vpop.permute.xlu0 %1114 }
 0x5c1   :  { %v883_v9 = vmul.f32 %v2059_v6, %v877_v7  ;;  %v1120_v26 = vsel %vm304_vm1, %v1115_v23, 0 }
 0x5c2   :  { %v871_v5 = vsub.f32 1.5, %v870_v4  ;;  %1129 = vmatpush.bf16.xpose.msra.mxu3 %v1120_v26 }
 0x5c3   :  { %v2889_v13 = vadd.f32 %v2060_v15, %v883_v9 }
 0x5c4   :  { %v872_v8 = vmul.f32 %v2109_v59, %v871_v5 }
 0x5c6   :  { %v876_v10 = vsel %vm875_vm13, %v2109_v59, %v872_v8 }
 0x5c7   :  { %v878_v11 = vmul.f32 %v876_v10, %v844_v32 }
 0x5c8   :  { %v1141_v25 = vpop.permute.xlu1 %1140 }
 0x5c9   :  { %v884_v12 = vmul.f32 %v2059_v6, %v878_v11  ;;  %v1146_v27 = vsel %vm304_vm1, %v1141_v25, 0 }
 0x5ca   :  { %1155 = vmatpush.bf16.xpose.msra.mxu0 %v1146_v27 }
 0x5cb   :  { %v2891_v14 = vadd.f32 %v2060_v15, %v884_v12 }
 0x5cd   :  { %v891_v16 = vpack.c.bf16 %v2891_v14, %v2889_v13 }
 0x5cf   :  { %1949 = vmatmul.msk.bf16.vlgmr.msra.gmra.mxu1 %vm279_vm0, %v891_v16 }
 0x5d0   :  { %v1268_v31 = vpop.permute.xlu1 %1267 }
 0x5d1   :  { %v1273_v32 = vsel %vm304_vm1, %v1268_v31, 0 }
 0x64c   :  { %v924_v18 = vpop.f32.mrf.mxu1 }
 0x64d   :  { %v925_v19 = vadd.f32 %v2062_v17, %v924_v18 }
 0x64f   :  { %v967_v2 = vpack.c.bf16 %v925_v19, %v925_v19 }
 0x651   :  { %v1110_v3 = vunpack.c.l.b16 %v967_v2  ;;  %1959 = vmatmul.msk.bf16.vlgmr.msrb.gmra.mxu3 %vm304_vm1, %v967_v2 }
 0x652   :  { %1282 = vmatpush.bf16.xpose.msrb.mxu3 %v1273_v32 }
 0x653   :  { %v1111_v20 = vpack.c.b16 %v1110_v3, %v1110_v3 }
 0x654   :  { %v926_v21 = vpop.f32.mrf.mxu1 }
 0x655   :  { %v927_v22 = vadd.f32 %v2062_v17, %v926_v21  ;;  %1265 = vrot.lane.b32.xlu1 %v1111_v20, %s2499_s19  ;;  %1112 = vrot.lane.b32.xlu2 %v1111_v20, %s2496_s29 }
 0x657   :  { %v968_v28 = vpack.c.bf16 %v927_v22, %v927_v22 }
 0x659   :  { %v1136_v29 = vunpack.c.l.b16 %v968_v28  ;;  %1960 = vmatmul.msk.bf16.vlgmr.msrb.gmra.mxu0 %vm304_vm1, %v968_v28 }
 0x65b   :  { %v1137_v30 = vpack.c.b16 %v1136_v29, %v1136_v29 }
 0x65d   :  { %1138 = vrot.lane.b32.xlu0 %v1137_v30, %s2496_s29  ;;  %1440 = vrot.lane.b32.xlu1 %v2880_v0, %s2502_s9 }
 0x65e   :  { %1417 = vrot.lane.b32.xlu2 %v2875_v52, %s2502_s9 }
 0x665   :  { %1290 = vrot.lane.b32.xlu0 %v2880_v0, %s2499_s19 }
 0x666   :  { %1438 = vrot.lane.b32.xlu2 %v1137_v30, %s2502_s9 }
 0x66d   :  { %1288 = vrot.lane.b32.xlu0 %v1137_v30, %s2499_s19 }
 0x675   :  { %1415 = vrot.lane.b32.xlu0 %v1111_v20, %s2502_s9 }
 0x6af   :  { %v1113_v33 = vpop.permute.xlu2 %1112 }
 0x6b0   :  { %1963 = vmatmul.msk.bf16.vlgmr.msra.gmra.mxu3 %vm304_vm1, %v1113_v33 }
 0x6b8   :  { %v1418_v34 = vpop.permute.xlu2 %1417 }
 0x6b9   :  { %v1423_v35 = vsel %vm304_vm1, %v1418_v34, 0 }
 0x6ba   :  { %1432 = vmatpush.bf16.xpose.msra.mxu3 %v1423_v35 }
 0x6c0   :  { %v1439_v50 = vpop.permute.xlu2 %1438 }
 0x6c7   :  { %v1266_v36 = vpop.permute.xlu1 %1265 }
 0x6c8   :  { %1967 = vmatmul.msk.bf16.vlgmr.msrb.gmra.mxu3 %vm304_vm1, %v1266_v36 }
 0x6cf   :  { %v1139_v37 = vpop.permute.xlu0 %1138  ;;  %v1441_v40 = vpop.permute.xlu1 %1440 }
 0x6d0   :  { %1964 = vmatmul.msk.bf16.vlgmr.msra.gmra.mxu0 %vm304_vm1, %v1139_v37  ;;  %v1446_v45 = vsel %vm304_vm1, %v1441_v40, 0 }
 0x6d4   :  { %v986_v38 = vpop.f32.mrf.mxu3 }
 0x6d5   :  { %v1009_v39 = vsel %vm304_vm1, %v986_v38, -inf }
 0x6d6   :  { %v1005_v41 = vpop.f32.mrf.mxu0  ;;  %1010 = vmax.xlane.f32.xlu0 %v1009_v39 }
 0x6d7   :  { %v1291_v42 = vpop.permute.xlu0 %1290  ;;  %v1012_v43 = vsel %vm304_vm1, %v1005_v41, -inf }
 0x6d8   :  { %v1296_v44 = vsel %vm304_vm1, %v1291_v42, 0  ;;  %1013 = vmax.xlane.f32.xlu1 %v1012_v43 }
 0x6d9   :  { %1305 = vmatpush.bf16.xpose.msrb.mxu0 %v1296_v44 }
 0x6dc   :  { %v988_v46 = vpop.f32.mrf.mxu3 }
 0x6de   :  { %v1007_v47 = vpop.f32.mrf.mxu0 }
 0x6df   :  { %v1289_v48 = vpop.permute.xlu0 %1288 }
 0x6e0   :  { %1968 = vmatmul.msk.bf16.vlgmr.msrb.gmra.mxu0 %vm304_vm1, %v1289_v48 }
 0x6e1   :  { %1455 = vmatpush.bf16.xpose.msra.mxu0 %v1446_v45 }
 0x6e7   :  { %v1416_v49 = vpop.permute.xlu0 %1415 }
 0x6e8   :  { %1971 = vmatmul.msk.bf16.vlgmr.msra.gmra.mxu3 %vm304_vm1, %v1416_v49 }
 0x6f0   :  { %1972 = vmatmul.msk.bf16.vlgmr.msra.gmra.mxu0 %vm304_vm1, %v1439_v50 }
 0x733   :  { %v1131_v51 = vpop.f32.mrf.mxu3 }
 0x734   :  { %v1161_v53 = vsel %vm304_vm1, %v1131_v51, -inf }
 0x735   :  { %1162 = vmax.xlane.f32.xlu1 %v1161_v53 }
 0x73b   :  { %v1133_v54 = vpop.f32.mrf.mxu3 }
 0x749   :  { %v1011_v55 = vpop.xlane.xlu0 %1010 }
 0x74a   :  { %v1015_v57 = vsub.f32 %v986_v38, %v1011_v55 }
 0x74b   :  { %v1284_v58 = vpop.f32.mrf.mxu3  ;;  %v1014_v59 = vpop.xlane.xlu1 %1013 }
 0x74c   :  { %v1017_v60 = vmul.f32 1.442695, %v1015_v57  ;;  %v1016_v56 = vsub.f32 %v1005_v41, %v1014_v59  ;;  %v1311_v8 = vsel %vm304_vm1, %v1284_v58, -inf }
 0x74d   :  { %v1157_v61 = vpop.f32.mrf.mxu0 }
 0x74e   :  { %2110 = vpow2.f32 %v1017_v60  ;;  %v1019_v62 = vmul.f32 1.442695, %v1016_v56  ;;  %v1164_v63 = vsel %vm304_vm1, %v1157_v61, -inf }
 0x74f   :  { %1165 = vmax.xlane.f32.xlu2 %v1164_v63 }
 0x750   :  { %2112 = vpow2.f32 %v1019_v62 }
 0x753   :  { %v1286_v1 = vpop.f32.mrf.mxu3 }
 0x754   :  { %v2926_v4 = vpop.eup %2110 }
 0x755   :  { %v1159_v5 = vpop.f32.mrf.mxu0  ;;  %v1021_v6 = vsel %vm304_vm1, %v2926_v4, 0.0 }
 0x756   :  { %v2930_v7 = vpop.eup %2112  ;;  %1022 = vadd.xlane.f32.xlu1 %v1021_v6 }
 0x757   :  { %1312 = vmax.xlane.f32.xlu2 %v1311_v8  ;;  %v1024_v10 = vsel %vm304_vm1, %v2930_v7, 0.0 }
 0x758   :  { %1025 = vadd.xlane.f32.xlu0 %v1024_v10 }
 0x75d   :  { %v1307_v15 = vpop.f32.mrf.mxu0 }
 0x75e   :  { %v1314_v9 = vsel %vm304_vm1, %v1307_v15, -inf }
 0x760   :  { %1315 = vmax.xlane.f32.xlu0 %v1314_v9 }
 0x765   :  { %v1309_v11 = vpop.f32.mrf.mxu0 }
 0x76b   :  { %v2936_v12 = vpop.f32.mrf.mxu3 }
 0x76c   :  { %v1461_v16 = vsel %vm304_vm1, %v2936_v12, -inf }
 0x76d   :  { %1462 = vmax.xlane.f32.xlu2 %v1461_v16  ;;  %v2940_v17 = vpop.f32.mrf.mxu0 }
 0x76e   :  { %v1464_v2 = vsel %vm304_vm1, %v2940_v17, -inf }
 0x76f   :  { %1232 = vrot.lane.b32.xlu1 %v2880_v0, %s2497_s6 }
 0x773   :  { %v1436_v18 = vpop.f32.mrf.mxu3 }
 0x774   :  { %1062 = vrot.lane.b32.xlu0 %v2875_v52, %s2498_s12 }
 0x775   :  { %v1459_v19 = vpop.f32.mrf.mxu0 }
 0x77c   :  { %1211 = vrot.lane.b32.xlu0 %v2875_v52, %s2497_s6 }
 0x785   :  { %1086 = vrot.lane.b32.xlu2 %v2880_v0, %s2498_s12 }
 0x799   :  { %1465 = vmax.xlane.f32.xlu1 %v1464_v2 }
 0x7a8   :  { %v1163_v3 = vpop.xlane.xlu1 %1162 }
 0x7a9   :  { %v1167_v20 = vsub.f32 %v1131_v51, %v1163_v3 }
 0x7ab   :  { %v1169_v21 = vmul.f32 1.442695, %v1167_v20 }
 0x7ad   :  { %2114 = vpow2.f32 %v1169_v21 }
 0x7b3   :  { %v2952_v22 = vpop.eup %2114 }
 0x7b4   :  { %v1173_v23 = vsel %vm304_vm1, %v2952_v22, 0.0 }
 0x7b5   :  { %1174 = vadd.xlane.f32.xlu1 %v1173_v23 }
 0x7c2   :  { %v1166_v25 = vpop.xlane.xlu2 %1165 }
 0x7c3   :  { %v1168_v26 = vsub.f32 %v1157_v61, %v1166_v25 }
 0x7c5   :  { %v1171_v27 = vmul.f32 1.442695, %v1168_v26 }
 0x7c7   :  { %2116 = vpow2.f32 %v1171_v27 }
 0x7c9   :  { %v1023_v28 = vpop.xlane.xlu1 %1022 }
 0x7ca   :  { %2118 = vrcp.f32 %v1023_v28  ;;  %v1313_v29 = vpop.xlane.xlu2 %1312  ;;  %v1038_v49 = vand.u32 2147483648, %v1023_v28  ;;  %vm1032_vm15 = vweird.f32 %v1023_v28  ;;  %v1036_v50 = vand.u32 2147483647, %v1023_v28 }
 0x7cb   :  { %v1317_v30 = vsub.f32 %v1284_v58, %v1313_v29  ;;  %v1026_v31 = vpop.xlane.xlu0 %1025 }
 0x7cc   :  { %2120 = vrcp.f32 %v1026_v31  ;;  %v1053_v54 = vand.u32 2147483648, %v1026_v31  ;;  %vm1047_vm8 = vweird.f32 %v1026_v31  ;;  %v1051_v57 = vand.u32 2147483647, %v1026_v31 }
 0x7cd   :  { %v2956_v32 = vpop.eup %2116  ;;  %v1319_v33 = vmul.f32 1.442695, %v1317_v30  ;;  %v1039_v59 = vor.u32 1.1754944e-38, %v1038_v49  ;;  %vm1037_vm10 = vcmp.eq.f32.partialorder %v1036_v50, 8.507059e+37 }
 0x7ce   :  { %v1176_v34 = vsel %vm304_vm1, %v2956_v32, 0.0  ;;  %v1054_v62 = vor.u32 1.1754944e-38, %v1053_v54  ;;  %vm1052_vm11 = vcmp.eq.f32.partialorder %v1051_v57, 8.507059e+37 }
 0x7cf   :  { %2122 = vpow2.f32 %v1319_v33  ;;  %1177 = vadd.xlane.f32.xlu0 %v1176_v34 }
 0x7d0   :  { %v2119_v35 = vpop.eup %2118 }
 0x7d1   :  { %v1028_v36 = vmul.f32 %v2119_v35, %v1023_v28  ;;  %vm1033_vm14 = vweird.f32 %v2119_v35 }
 0x7d2   :  { %v2121_v37 = vpop.eup %2120  ;;  %vm1034_vm7 = vmor %vm1032_vm15, %vm1033_vm14 }
 0x7d3   :  { %v1029_v38 = vsub.f32 1.0, %v1028_v36  ;;  %v1043_v39 = vmul.f32 %v2121_v37, %v1026_v31  ;;  %v1316_v40 = vpop.xlane.xlu0 %1315  ;;  %vm1048_vm2 = vweird.f32 %v2121_v37 }
 0x7d4   :  { %v1318_v41 = vsub.f32 %v1307_v15, %v1316_v40  ;;  %vm1049_vm9 = vmor %vm1047_vm8, %vm1048_vm2 }
 0x7d5   :  { %v2960_v42 = vpop.eup %2122  ;;  %v1044_v43 = vsub.f32 1.0, %v1043_v39  ;;  %v1030_v46 = vmul.f32 %v2119_v35, %v1029_v38 }
 0x7d6   :  { %v1321_v44 = vmul.f32 1.442695, %v1318_v41  ;;  %v1323_v45 = vsel %vm304_vm1, %v2960_v42, 0.0 }
 0x7d7   :  { %1324 = vadd.xlane.f32.xlu2 %v1323_v45  ;;  %v1045_v47 = vmul.f32 %v2121_v37, %v1044_v43  ;;  %v1031_v48 = vadd.f32 %v2119_v35, %v1030_v46 }
 0x7d8   :  { %2124 = vpow2.f32 %v1321_v44 }
 0x7d9   :  { %v1046_v51 = vadd.f32 %v2121_v37, %v1045_v47  ;;  %v1035_v55 = vsel %vm1034_vm7, %v2119_v35, %v1031_v48 }
 0x7da   :  { %v1040_v61 = vsel %vm1037_vm10, %v1039_v59, %v1035_v55 }
 0x7db   :  { %v1050_v56 = vsel %vm1049_vm9, %v2121_v37, %v1046_v51  ;;  %v2969_v1 = vmul.f32 %v2926_v4, %v1040_v61 }
 0x7dc   :  { %v1055_v63 = vsel %vm1052_vm11, %v1054_v62, %v1050_v56 }
 0x7dd   :  { %v2972_v6 = vmul.f32 %v2930_v7, %v1055_v63  ;;  %v1057_v11 = vpack.c.bf16 %v2969_v1, %v2969_v1 }
 0x7de   :  { %v2964_v53 = vpop.eup %2124 }
 0x7df   :  { %v1326_v58 = vsel %vm304_vm1, %v2964_v53, 0.0  ;;  %v1058_v4 = vpack.c.bf16 %v2972_v6, %v2972_v6 }
 0x7e0   :  { %v1463_v60 = vpop.xlane.xlu2 %1462  ;;  %1327 = vadd.xlane.f32.xlu1 %v1326_v58 }
 0x7e1   :  { %v1233_v8 = vpop.permute.xlu1 %1232  ;;  %v1467_v20 = vsub.f32 %v2936_v12, %v1463_v60 }
 0x7e2   :  { %v1238_v16 = vsel %vm377_vm3, %v1233_v8, 0 }
 0x7e3   :  { %v1469_v21 = vmul.f32 1.442695, %v1467_v20 }
 0x7e6   :  { %v1063_v5 = vpop.permute.xlu0 %1062 }
 0x7e7   :  { %v1068_v10 = vsel %vm377_vm3, %v1063_v5, 0 }
 0x7e8   :  { %v1087_v15 = vpop.permute.xlu2 %1086  ;;  %1077 = vmatpush.bf16.msrb.mxu1 %v1068_v10 }
 0x7e9   :  { %v1092_v9 = vsel %vm377_vm3, %v1087_v15, 0 }
 0x7ea   :  { %1101 = vmatpush.bf16.msrb.mxu2 %v1092_v9 }
 0x7eb   :  { %1961 = vmatmul.msk.bf16.vlgmr.msrb.gmra.mxu1 %vm304_vm1, %v1057_v11 }
 0x7ed   :  { %1962 = vmatmul.msk.bf16.vlgmr.msrb.gmra.mxu2 %vm304_vm1, %v1058_v4 }
 0x7ee   :  { %1247 = vmatpush.bf16.msra.mxu2 %v1238_v16  ;;  %v1212_v7 = vpop.permute.xlu0 %1211 }
 0x7ef   :  { %v1217_v18 = vsel %vm377_vm3, %v1212_v7, 0  ;;  %1361 = vrot.lane.b32.xlu2 %v2875_v52, %s2500_s15 }
 0x7f0   :  { %1226 = vmatpush.bf16.msra.mxu1 %v1217_v18 }
 0x7f7   :  { %1511 = vrot.lane.b32.xlu2 %v2875_v52, %s2501_s3 }
 0x7f9   :  { %1382 = vrot.lane.b32.xlu1 %v2880_v0, %s2500_s15 }
 0x80c   :  { %v1466_v19 = vpop.xlane.xlu1 %1465 }
 0x80d   :  { %v1468_v2 = vsub.f32 %v2940_v17, %v1466_v19 }
 0x80f   :  { %v1471_v3 = vmul.f32 1.442695, %v1468_v2 }
 0x811   :  { %2126 = vpow2.f32 %v1471_v3 }
 0x812   :  { %2128 = vpow2.f32 %v1469_v21 }
 0x817   :  { %v2992_v23 = vpop.eup %2126 }
 0x818   :  { %v1476_v25 = vsel %vm304_vm1, %v2992_v23, 0.0  ;;  %v2996_v26 = vpop.eup %2128 }
 0x819   :  { %1477 = vadd.xlane.f32.xlu0 %v1476_v25  ;;  %v1473_v52 = vsel %vm304_vm1, %v2996_v26, 0.0 }
 0x823   :  { %1474 = vadd.xlane.f32.xlu1 %v1473_v52 }
 0x828   :  { %v1175_v27 = vpop.xlane.xlu1 %1174 }
 0x829   :  { %2130 = vrcp.f32 %v1175_v27  ;;  %v1190_v29 = vand.u32 2147483648, %v1175_v27  ;;  %v1188_v31 = vand.u32 2147483647, %v1175_v27  ;;  %vm1184_vm13 = vweird.f32 %v1175_v27 }
 0x82b   :  { %v1191_v34 = vor.u32 1.1754944e-38, %v1190_v29  ;;  %vm1189_vm15 = vcmp.eq.f32.partialorder %v1188_v31, 8.507059e+37 }
 0x82d   :  { %1532 = vrot.lane.b32.xlu0 %v2880_v0, %s2501_s3 }
 0x82f   :  { %v2131_v12 = vpop.eup %2130 }
 0x830   :  { %v1180_v17 = vmul.f32 %v2131_v12, %v1175_v27  ;;  %vm1185_vm12 = vweird.f32 %v2131_v12 }
 0x831   :  { %vm1186_vm14 = vmor %vm1184_vm13, %vm1185_vm12 }
 0x832   :  { %v1181_v28 = vsub.f32 1.0, %v1180_v17 }
 0x834   :  { %v1182_v30 = vmul.f32 %v2131_v12, %v1181_v28 }
 0x836   :  { %v1183_v33 = vadd.f32 %v2131_v12, %v1182_v30 }
 0x838   :  { %v1187_v35 = vsel %vm1186_vm14, %v2131_v12, %v1183_v33 }
 0x839   :  { %v1192_v36 = vsel %vm1189_vm15, %v1191_v34, %v1187_v35 }
 0x83a   :  { %v1193_v37 = vmul.f32 %v2952_v22, %v1192_v36 }
 0x83c   :  { %v1209_v38 = vpack.c.bf16 %v1193_v37, %v1193_v37  ;;  %v1263_v16 = vadd.f32 %v1193_v37, %v2969_v1 }
 0x83e   :  { %1965 = vmatmul.msk.bf16.vlgmr.msra.gmra.mxu1 %vm304_vm1, %v1209_v38 }
 0x842   :  { %v1178_v0 = vpop.xlane.xlu0 %1177 }
 0x843   :  { %2132 = vrcp.f32 %v1178_v0  ;;  %v1205_v44 = vand.u32 2147483648, %v1178_v0  ;;  %v1203_v46 = vand.u32 2147483647, %v1178_v0  ;;  %vm1199_vm7 = vweird.f32 %v1178_v0 }
 0x845   :  { %v1206_v49 = vor.u32 1.1754944e-38, %v1205_v44  ;;  %vm1204_vm9 = vcmp.eq.f32.partialorder %v1203_v46, 8.507059e+37 }
 0x849   :  { %v2133_v39 = vpop.eup %2132 }
 0x84a   :  { %v1195_v40 = vmul.f32 %v2133_v39, %v1178_v0  ;;  %v1325_v41 = vpop.xlane.xlu2 %1324  ;;  %vm1200_vm2 = vweird.f32 %v2133_v39 }
 0x84b   :  { %2134 = vrcp.f32 %v1325_v41  ;;  %vm1201_vm8 = vmor %vm1199_vm7, %vm1200_vm2  ;;  %v1340_v60 = vand.u32 2147483648, %v1325_v41  ;;  %v1338_v61 = vand.u32 2147483647, %v1325_v41  ;;  %vm1334_vm11 = vweird.f32 %v1325_v41 }
 0x84c   :  { %v1196_v43 = vsub.f32 1.0, %v1195_v40 }
 0x84d   :  { %v1341_v5 = vor.u32 1.1754944e-38, %v1340_v60  ;;  %vm1339_vm13 = vcmp.eq.f32.partialorder %v1338_v61, 8.507059e+37 }
 0x84e   :  { %v1197_v45 = vmul.f32 %v2133_v39, %v1196_v43 }
 0x850   :  { %v1198_v47 = vadd.f32 %v2133_v39, %v1197_v45 }
 0x851   :  { %v2135_v48 = vpop.eup %2134 }
 0x852   :  { %v1202_v22 = vsel %vm1201_vm8, %v2133_v39, %v1198_v47  ;;  %v1330_v50 = vmul.f32 %v2135_v48, %v1325_v41  ;;  %v1362_v51 = vpop.permute.xlu2 %1361  ;;  %vm1335_vm10 = vweird.f32 %v2135_v48 }
 0x853   :  { %v1207_v54 = vsel %vm1204_vm9, %v1206_v49, %v1202_v22  ;;  %v1367_v55 = vsel %vm377_vm3, %v1362_v51, 0  ;;  %v1328_v57 = vpop.xlane.xlu1 %1327  ;;  %vm1336_vm12 = vmor %vm1334_vm11, %vm1335_vm10 }
 0x854   :  { %v3006_v58 = vmul.f32 %v2956_v32, %v1207_v54  ;;  %v1331_v59 = vsub.f32 1.0, %v1330_v50  ;;  %2136 = vrcp.f32 %v1328_v57  ;;  %1376 = vmatpush.bf16.msrb.mxu1 %v1367_v55  ;;  %v1355_v20 = vand.u32 2147483648, %v1328_v57 }
 0x855   :  { %vm1349_vm15 = vweird.f32 %v1328_v57  ;;  %v1353_v21 = vand.u32 2147483647, %v1328_v57 }
 0x856   :  { %v1332_v56 = vmul.f32 %v2135_v48, %v1331_v59  ;;  %v1210_v62 = vpack.c.bf16 %v3006_v58, %v3006_v58  ;;  %v1356_v52 = vor.u32 1.1754944e-38, %v1355_v20  ;;  %v1264_v41 = vadd.f32 %v3006_v58, %v2972_v6 }
 0x857   :  { %vm1354_vm7 = vcmp.eq.f32.partialorder %v1353_v21, 8.507059e+37 }
 0x858   :  { %v1333_v63 = vadd.f32 %v2135_v48, %v1332_v56  ;;  %1966 = vmatmul.msk.bf16.vlgmr.msra.gmra.mxu2 %vm304_vm1, %v1210_v62 }
 0x85a   :  { %v2137_v8 = vpop.eup %2136  ;;  %v1337_v10 = vsel %vm1336_vm12, %v2135_v48, %v1333_v63  ;;  %v1512_v32 = vpop.permute.xlu2 %1511 }
 0x85b   :  { %v1342_v15 = vsel %vm1339_vm13, %v1341_v5, %v1337_v10  ;;  %v1345_v9 = vmul.f32 %v2137_v8, %v1328_v57  ;;  %v1517_v11 = vsel %vm377_vm3, %v1512_v32, 0  ;;  %vm1350_vm14 = vweird.f32 %v2137_v8 }
 0x85c   :  { %v1343_v4 = vmul.f32 %v2960_v42, %v1342_v15  ;;  %1526 = vmatpush.bf16.msra.mxu1 %v1517_v11  ;;  %vm1351_vm2 = vmor %vm1349_vm15, %vm1350_vm14 }
 0x85d   :  { %v1346_v7 = vsub.f32 1.0, %v1345_v9 }
 0x85e   :  { %v3014_v18 = vadd.f32 %v1343_v4, %v1263_v16  ;;  %v1359_v19 = vpack.c.bf16 %v1343_v4, %v1343_v4 }
 0x85f   :  { %v1347_v2 = vmul.f32 %v2137_v8, %v1346_v7 }
 0x860   :  { %1969 = vmatmul.msk.bf16.vlgmr.msrb.gmra.mxu1 %vm304_vm1, %v1359_v19 }
 0x861   :  { %v1348_v3 = vadd.f32 %v2137_v8, %v1347_v2 }
 0x863   :  { %v1352_v25 = vsel %vm1351_vm2, %v2137_v8, %v1348_v3 }
 0x864   :  { %v1357_v1 = vsel %vm1354_vm7, %v1356_v52, %v1352_v25  ;;  %v2019_v25 = vld [vmem:[#allocation9 + $0x8] sm:$0xff]  ;;  %v2018_v52 = vld [vmem:[#allocation9] sm:$0xff]  ;;  %vm1744_vm7 = vcmask 523264  }
 0x865   :  { %v1358_v42 = vmul.f32 %v2964_v53, %v1357_v1  ;;  %1601 = vmatpush.bf16.msrb.mxu3 %v2019_v25 }
 0x867   :  { %v1360_v28 = vpack.c.bf16 %v1358_v42, %v1358_v42  ;;  %v1414_v46 = vadd.f32 %v1358_v42, %v1264_v41 }
 0x868   :  { %v1079_v27 = vpop.f32.mrf.mxu1 }
 0x869   :  { %1107 = vst.msk [vmem:[#allocation2] sm:$0xff] %vm304_vm1, %v1079_v27  ;;  %1602 = vmatpush.bf16.msrb.mxu3 %v2018_v52 }
 0x86b   :  { %v1383_v12 = vpop.permute.xlu1 %1382 }
 0x86c   :  { %v1388_v17 = vsel %vm377_vm3, %v1383_v12, 0 }
 0x86d   :  { %1397 = vmatpush.bf16.msrb.mxu2 %v1388_v17 }
 0x870   :  { %v1081_v29 = vpop.f32.mrf.mxu1  ;;  %v1103_v30 = vpop.f32.mrf.mxu2  ;;  %1970 = vmatmul.msk.bf16.vlgmr.msrb.gmra.mxu2 %vm304_vm1, %v1360_v28  ;;  %v2063_v28 = vld [vmem:[#allocation11] ss:$0 sm:$0xff] }
 0x871   :  { %1108 = vst.msk [vmem:[#allocation2 + $0x8] sm:$0xff] %vm304_vm1, %v1103_v30 }
 0x878   :  { %v1105_v31 = vpop.f32.mrf.mxu2 }
 0x88c   :  { %v1478_v33 = vpop.xlane.xlu0 %1477 }
 0x88d   :  { %2138 = vrcp.f32 %v1478_v33  ;;  %v1505_v38 = vand.u32 2147483648, %v1478_v33  ;;  %v1503_v0 = vand.u32 2147483647, %v1478_v33  ;;  %vm1499_vm9 = vweird.f32 %v1478_v33 }
 0x88f   :  { %v1506_v40 = vor.u32 1.1754944e-38, %v1505_v38  ;;  %vm1504_vm11 = vcmp.eq.f32.partialorder %v1503_v0, 8.507059e+37 }
 0x893   :  { %v2139_v34 = vpop.eup %2138 }
 0x894   :  { %v1495_v35 = vmul.f32 %v2139_v34, %v1478_v33  ;;  %vm1500_vm8 = vweird.f32 %v2139_v34 }
 0x895   :  { %vm1501_vm10 = vmor %vm1499_vm9, %vm1500_vm8 }
 0x896   :  { %v1496_v36 = vsub.f32 1.0, %v1495_v35  ;;  %v1475_v37 = vpop.xlane.xlu1 %1474 }
 0x897   :  { %2140 = vrcp.f32 %v1475_v37  ;;  %v1488_v54 = vand.u32 2147483647, %v1475_v37  ;;  %v1490_v55 = vand.u32 2147483648, %v1475_v37  ;;  %vm1484_vm13 = vweird.f32 %v1475_v37 }
 0x898   :  { %v1497_v53 = vmul.f32 %v2139_v34, %v1496_v36 }
 0x899   :  { %vm1489_vm15 = vcmp.eq.f32.partialorder %v1488_v54, 8.507059e+37 }
 0x89a   :  { %v1498_v39 = vadd.f32 %v2139_v34, %v1497_v53 }
 0x89c   :  { %v1502_v43 = vsel %vm1501_vm10, %v2139_v34, %v1498_v39 }
 0x89d   :  { %v2141_v44 = vpop.eup %2140  ;;  %v1507_v45 = vsel %vm1504_vm11, %v1506_v40, %v1502_v43 }
 0x89e   :  { %v1508_v47 = vmul.f32 %v2992_v23, %v1507_v45  ;;  %v1480_v48 = vmul.f32 %v2141_v44, %v1475_v37  ;;  %vm1485_vm12 = vweird.f32 %v2141_v44  ;;  %v1491_v23 = vor.u32 1.1754944e-38, %v1490_v55 }
 0x89f   :  { %v1533_v49 = vpop.permute.xlu0 %1532  ;;  %vm1486_vm14 = vmor %vm1484_vm13, %vm1485_vm12 }
 0x8a0   :  { %v1564_v22 = vadd.f32 %v1508_v47, %v1414_v46  ;;  %v1481_v50 = vsub.f32 1.0, %v1480_v48  ;;  %v1538_v51 = vsel %vm377_vm3, %v1533_v49, 0  ;;  %v1510_v6 = vpack.c.bf16 %v1508_v47, %v1508_v47  ;;  %v2020_v49 = vld [vmem:[#allocation15] sm:$0xff] }
 0x8a1   :  { %1547 = vmatpush.bf16.msra.mxu2 %v1538_v51 }
 0x8a2   :  { %v1568_v57 = vmul.f32 0.25, %v1564_v22  ;;  %v1482_v59 = vmul.f32 %v2141_v44, %v1481_v50 }
 0x8a4   :  { %1570 = vst.msk [vmem:[#allocation23 + $0x8] sm:$0xff] %vm304_vm1, %v1568_v57  ;;  %v1483_v58 = vadd.f32 %v2141_v44, %v1482_v59  ;;  %1974 = vmatmul.msk.bf16.vlgmr.msra.gmra.mxu2 %vm304_vm1, %v1510_v6 }
 0x8a6   :  { %v1487_v60 = vsel %vm1486_vm14, %v2141_v44, %v1483_v58 }
 0x8a7   :  { %v1492_v56 = vsel %vm1489_vm15, %v1491_v23, %v1487_v60 }
 0x8a8   :  { %v1493_v61 = vmul.f32 %v2996_v26, %v1492_v56 }
 0x8aa   :  { %v1563_v62 = vadd.f32 %v1493_v61, %v3014_v18  ;;  %v1509_v63 = vpack.c.bf16 %v1493_v61, %v1493_v61 }
 0x8ac   :  { %v1567_v5 = vmul.f32 0.25, %v1563_v62  ;;  %1973 = vmatmul.msk.bf16.vlgmr.msra.gmra.mxu1 %vm304_vm1, %v1509_v63 }
 0x8ae   :  { %1569 = vst.msk [vmem:[#allocation23] sm:$0xff] %vm304_vm1, %v1567_v5  ;;  %v2064_v5 = vld [vmem:[#allocation12] ss:$0 sm:$0xff] }
 0x8bb   :  { %v1228_v8 = vpop.f32.mrf.mxu1 }
 0x8bc   :  { %1255 = vrot.lane.b32.xlu0 %v1228_v8, %s2507_s26 }
 0x8c3   :  { %v1230_v10 = vpop.f32.mrf.mxu1 }
 0x8db   :  { %v1249_v32 = vpop.f32.mrf.mxu2 }
 0x8dc   :  { %1257 = vrot.lane.b32.xlu1 %v1249_v32, %s2507_s26 }
 0x8dd   :  { %v1378_v15 = vpop.f32.mrf.mxu1 }
 0x8de   :  { %1405 = vrot.lane.b32.xlu2 %v1378_v15, %s2508_s1  ;;  %v2065_v15 = vld [vmem:[#allocation14] ss:$0 sm:$0xff] }
 0x8e3   :  { %v1251_v9 = vpop.f32.mrf.mxu2 }
 0x8e5   :  { %v1380_v26 = vpop.f32.mrf.mxu1 }
 0x8f3   :  { %v1399_v11 = vpop.f32.mrf.mxu2 }
 0x8f4   :  { %1407 = vrot.lane.b32.xlu0 %v1399_v11, %s2508_s1 }
 0x8fb   :  { %v1401_v16 = vpop.f32.mrf.mxu2 }
 0x927   :  { %v1549_v4 = vpop.f32.mrf.mxu2 }
 0x928   :  { %1557 = vrot.lane.b32.xlu0 %v1549_v4, %s2509_s20 }
 0x929   :  { %v1528_v7 = vpop.f32.mrf.mxu1 }
 0x92a   :  { %1555 = vrot.lane.b32.xlu2 %v1528_v7, %s2509_s20 }
 0x92e   :  { %v1256_v18 = vpop.permute.xlu0 %1255 }
 0x92f   :  { %1261 = vst.msk [vmem:[#allocation2] sm:$0xff] %vm537_vm4, %v1256_v18  ;;  %v1551_v19 = vpop.f32.mrf.mxu2  ;;  %v2025_v18 = vld [vmem:[%s3120_s18 + $0x18] sm:$0xff] }
 0x930   :  { %1752 = vmatpush.bf16.msrb.mxu1 %v2025_v18  ;;  %v2024_v19 = vld [vmem:[%s3120_s18 + $0x10] sm:$0xff] }
 0x931   :  { %v1530_v2 = vpop.f32.mrf.mxu1 }
 0x932   :  { %v2023_v2 = vld [vmem:[%s3120_s18 + $0x8] sm:$0xff] }
 0x934   :  { %1753 = vmatpush.bf16.msrb.mxu1 %v2024_v19 }
 0x938   :  { %v1406_v3 = vpop.permute.xlu2 %1405  ;;  %1754 = vmatpush.bf16.msrb.mxu1 %v2023_v2 }
 0x939   :  { %1411 = vst.msk [vmem:[#allocation2] sm:$0xff] %vm660_vm5, %v1406_v3  ;;  %v2022_v3 = vld [vmem:[%s3120_s18] sm:$0xff]  ;;  %s2511_s18 = smov [#allocation23]  }
 0x93a   :  { %s1884_s20 = sshll.u32 %s2511_s18, 4  ;;  %s1885_s20 = int_to_ptr.vmem [resolvable:$true] %s1884_s20 }
 0x93b   :  { %1892 = dma.vmem_to_hbm [thread:$0]  %s1885_s20, 256, %s1887_s16, [#allocation5], %s2512_s30, %s2512_s30, %s2507_s26  }
 0x93c   :  { %1755 = vmatpush.bf16.msrb.mxu1 %v2022_v3 }
 0x94e   :  { %v1258_v20 = vpop.permute.xlu1 %1257 }
 0x94f   :  { %1262 = vst.msk [vmem:[#allocation2 + $0x8] sm:$0xff] %vm537_vm4, %v1258_v20 }
 0x966   :  { %v1408_v21 = vpop.permute.xlu0 %1407 }
 0x967   :  { %1412 = vst.msk [vmem:[#allocation2 + $0x8] sm:$0xff] %vm660_vm5, %v1408_v21  ;;  %v2066_v21 = vld [vmem:[#allocation17] ss:$0 sm:$0xff] }
 0x984   :  { %v1556_v1 = vpop.permute.xlu2 %1555 }
 0x985   :  { %1561 = vst.msk [vmem:[#allocation2] sm:$0xff] %vm783_vm6, %v1556_v1 }
 0x98c   :  { %v1565_v42 = vld [vmem:[#allocation2] sm:$0xff] }
 0x99a   :  { %v1558_v27 = vpop.permute.xlu0 %1557 }
 0x99b   :  { %1562 = vst.msk [vmem:[#allocation2 + $0x8] sm:$0xff] %vm783_vm6, %v1558_v27 }
 0x9a2   :  { %v1566_v12 = vld [vmem:[#allocation2 + $0x8] sm:$0xff] }
 0x9a3   :  { %v1571_v17 = vpack.c.bf16 %v1566_v12, %v1565_v42 }
 0x9a5   :  { %1983 = vmatmul.msk.bf16.vlgmr.msrb.gmra.mxu3 %vm279_vm0, %v1571_v17  ;;  %v2067_v17 = vld [vmem:[#allocation18] ss:$0 sm:$0xff] }
 0xa28   :  { %v1604_v29 = vpop.f32.mrf.mxu3 }
 0xa29   :  { %v1605_v30 = vadd.f32 %v2063_v28, %v1604_v29 }
 0xa2b   :  { %v1609_v31 = vadd.f32 %v1605_v30, %v2889_v13 }
 0xa2d   :  { %v1611_v33 = vsel %vm279_vm0, %v1609_v31, 0.0 }
 0xa2e   :  { %1612 = vadd.xlane.f32.xlu2 %v1611_v33 }
 0xa30   :  { %v1606_v34 = vpop.f32.mrf.mxu3 }
 0xa31   :  { %v1607_v35 = vadd.f32 %v2063_v28, %v1606_v34 }
 0xa33   :  { %v1610_v36 = vadd.f32 %v1607_v35, %v2891_v14  ;;  %v2021_v14 = vld [vmem:[#allocation15 + $0x8] sm:$0xff] }
 0xa34   :  { %1697 = vmatpush.bf16.msrb.mxu0 %v2021_v14 }
 0xa35   :  { %v1614_v37 = vsel %vm279_vm0, %v1610_v36, 0.0 }
 0xa36   :  { %1615 = vadd.xlane.f32.xlu0 %v1614_v37 }
 0xa38   :  { %1698 = vmatpush.bf16.msrb.mxu0 %v2020_v49 }
 0xaa1   :  { %v1613_v38 = vpop.xlane.xlu2 %1612 }
 0xaa2   :  { %v1617_v53 = vmul.f32 %v1613_v38, %v2860_v24 }
 0xaa4   :  { %v1619_v0 = vsub.f32 %v1609_v31, %v1617_v53 }
 0xaa6   :  { %v1621_v39 = vmul.f32 %v1619_v0, %v1619_v0 }
 0xaa8   :  { %v1623_v40 = vsel %vm279_vm0, %v1621_v39, 0.0 }
 0xaa9   :  { %v1616_v41 = vpop.xlane.xlu0 %1615  ;;  %1624 = vadd.xlane.f32.xlu1 %v1623_v40 }
 0xaaa   :  { %v1618_v13 = vmul.f32 %v1616_v41, %v2860_v24 }
 0xaac   :  { %v1620_v43 = vsub.f32 %v1610_v36, %v1618_v13 }
 0xaae   :  { %v1622_v44 = vmul.f32 %v1620_v43, %v1620_v43 }
 0xab0   :  { %v1626_v45 = vsel %vm279_vm0, %v1622_v44, 0.0 }
 0xab1   :  { %1627 = vadd.xlane.f32.xlu2 %v1626_v45 }
 0xb1c   :  { %v1625_v46 = vpop.xlane.xlu1 %1624 }
 0xb1d   :  { %v1629_v47 = vmul.f32 %v1625_v46, %v2860_v24 }
 0xb1f   :  { %v1631_v48 = vadd.f32 1e-05, %v1629_v47 }
 0xb21   :  { %2142 = vrsqrt.f32 %v1631_v48  ;;  %vm1639_vm3 = vweird.f32 %v1631_v48 }
 0xb24   :  { %v1628_v22 = vpop.xlane.xlu2 %1627 }
 0xb25   :  { %v1630_v50 = vmul.f32 %v1628_v22, %v2860_v24 }
 0xb27   :  { %v2143_v51 = vpop.eup %2142  ;;  %v1632_v54 = vadd.f32 1e-05, %v1630_v50 }
 0xb28   :  { %v1634_v55 = vmul.f32 %v2143_v51, %v1631_v48  ;;  %vm1640_vm1 = vweird.f32 %v2143_v51 }
 0xb29   :  { %2144 = vrsqrt.f32 %v1632_v54  ;;  %vm1641_vm4 = vmor %vm1639_vm3, %vm1640_vm1  ;;  %vm1649_vm6 = vweird.f32 %v1632_v54 }
 0xb2a   :  { %v1635_v57 = vmul.f32 %v2143_v51, %v1634_v55 }
 0xb2c   :  { %v1636_v59 = vmul.f32 0.5, %v1635_v57 }
 0xb2e   :  { %v1637_v6 = vsub.f32 1.5, %v1636_v59 }
 0xb2f   :  { %v2145_v58 = vpop.eup %2144 }
 0xb30   :  { %v1638_v23 = vmul.f32 %v2143_v51, %v1637_v6  ;;  %v1644_v60 = vmul.f32 %v2145_v58, %v1632_v54  ;;  %vm1650_vm5 = vweird.f32 %v2145_v58 }
 0xb31   :  { %vm1651_vm2 = vmor %vm1649_vm6, %vm1650_vm5 }
 0xb32   :  { %v1645_v56 = vmul.f32 %v2145_v58, %v1644_v60  ;;  %v1642_v61 = vsel %vm1641_vm4, %v2143_v51, %v1638_v23 }
 0xb33   :  { %v1653_v8 = vmul.f32 %v1642_v61, %v1619_v0  ;;  %v2069_v61 = vld [vmem:[#allocation21] ss:$0 sm:$0xff] }
 0xb34   :  { %v1646_v62 = vmul.f32 0.5, %v1645_v56 }
 0xb35   :  { %v1659_v9 = vmul.f32 %v2064_v5, %v1653_v8 }
 0xb36   :  { %v1647_v63 = vsub.f32 1.5, %v1646_v62 }
 0xb37   :  { %v1665_v16 = vadd.f32 %v2065_v15, %v1659_v9 }
 0xb38   :  { %v1648_v10 = vmul.f32 %v2145_v58, %v1647_v63 }
 0xb3a   :  { %v1652_v32 = vsel %vm1651_vm2, %v2145_v58, %v1648_v10  ;;  %v2068_v58 = vld [vmem:[#allocation20] ss:$0 sm:$0xff] }
 0xb3b   :  { %v1654_v26 = vmul.f32 %v1652_v32, %v1620_v43 }
 0xb3d   :  { %v1660_v11 = vmul.f32 %v2064_v5, %v1654_v26 }
 0xb3f   :  { %v1666_v4 = vadd.f32 %v2065_v15, %v1660_v11 }
 0xb41   :  { %v1667_v7 = vpack.c.bf16 %v1666_v4, %v1665_v16 }
 0xb43   :  { %1992 = vmatmul.msk.bf16.vlgmr.msrb.gmra.mxu0 %vm279_vm0, %v1667_v7 }
 0xbc0   :  { %v1700_v20 = vpop.f32.mrf.mxu0 }
 0xbc1   :  { %v1701_v25 = vadd.f32 %v2066_v21, %v1700_v20 }
 0xbc3   :  { %v1705_v27 = vmax.f32 %v1701_v25, 0.0 }
 0xbc8   :  { %v1702_v52 = vpop.f32.mrf.mxu0 }
 0xbc9   :  { %v1703_v1 = vadd.f32 %v2066_v21, %v1702_v52 }
 0xbcb   :  { %v1706_v42 = vmax.f32 %v1703_v1, 0.0 }
 0xbcd   :  { %v1707_v12 = vpack.c.bf16 %v1706_v42, %v1705_v27 }
 0xbcf   :  { %2009 = vmatmul.msk.bf16.vlgmr.msrb.gmra.mxu1 %vm1744_vm7, %v1707_v12 }
 0xc4c   :  { %v1757_v28 = vpop.f32.mrf.mxu1 }
 0xc4d   :  { %v1758_v29 = vadd.f32 %v2067_v17, %v1757_v28 }
 0xc4f   :  { %v1762_v30 = vadd.f32 %v1758_v29, %v1665_v16 }
 0xc51   :  { %v1764_v31 = vsel %vm279_vm0, %v1762_v30, 0.0 }
 0xc52   :  { %1765 = vadd.xlane.f32.xlu2 %v1764_v31 }
 0xc54   :  { %v1759_v33 = vpop.f32.mrf.mxu1 }
 0xc55   :  { %v1760_v34 = vadd.f32 %v2067_v17, %v1759_v33 }
 0xc57   :  { %v1763_v35 = vadd.f32 %v1760_v34, %v1666_v4 }
 0xc59   :  { %v1767_v36 = vsel %vm279_vm0, %v1763_v35, 0.0 }
 0xc5a   :  { %1768 = vadd.xlane.f32.xlu0 %v1767_v36 }
 0xcc5   :  { %v1766_v37 = vpop.xlane.xlu2 %1765 }
 0xcc6   :  { %v1770_v38 = vmul.f32 %v1766_v37, %v2860_v24 }
 0xcc8   :  { %v1772_v53 = vsub.f32 %v1762_v30, %v1770_v38  ;;  %v2070_v38 = vld [vmem:[%s3124_s22] ss:$0 sm:$0xff] }
 0xcca   :  { %v1774_v0 = vmul.f32 %v1772_v53, %v1772_v53 }
 0xccc   :  { %v1776_v39 = vsel %vm279_vm0, %v1774_v0, 0.0 }
 0xccd   :  { %v1769_v40 = vpop.xlane.xlu0 %1768  ;;  %1777 = vadd.xlane.f32.xlu1 %v1776_v39 }
 0xcce   :  { %v1771_v41 = vmul.f32 %v1769_v40, %v2860_v24 }
 0xcd0   :  { %v1773_v13 = vsub.f32 %v1763_v35, %v1771_v41 }
 0xcd2   :  { %v1775_v43 = vmul.f32 %v1773_v13, %v1773_v13 }
 0xcd4   :  { %v1779_v44 = vsel %vm279_vm0, %v1775_v43, 0.0 }
 0xcd5   :  { %1780 = vadd.xlane.f32.xlu2 %v1779_v44 }
 0xd40   :  { %v1778_v45 = vpop.xlane.xlu1 %1777 }
 0xd41   :  { %v1782_v14 = vmul.f32 %v1778_v45, %v2860_v24 }
 0xd43   :  { %v1784_v46 = vadd.f32 1e-05, %v1782_v14 }
 0xd45   :  { %2146 = vrsqrt.f32 %v1784_v46  ;;  %vm1792_vm9 = vweird.f32 %v1784_v46 }
 0xd48   :  { %v1781_v47 = vpop.xlane.xlu2 %1780 }
 0xd49   :  { %v1783_v48 = vmul.f32 %v1781_v47, %v2860_v24 }
 0xd4b   :  { %v2147_v49 = vpop.eup %2146  ;;  %v1785_v22 = vadd.f32 1e-05, %v1783_v48 }
 0xd4c   :  { %v1787_v50 = vmul.f32 %v2147_v49, %v1784_v46  ;;  %vm1793_vm8 = vweird.f32 %v2147_v49 }
 0xd4d   :  { %2148 = vrsqrt.f32 %v1785_v22  ;;  %vm1794_vm10 = vmor %vm1792_vm9, %vm1793_vm8  ;;  %vm1802_vm12 = vweird.f32 %v1785_v22 }
 0xd4e   :  { %v1788_v51 = vmul.f32 %v2147_v49, %v1787_v50 }
 0xd50   :  { %v1789_v54 = vmul.f32 0.5, %v1788_v51 }
 0xd52   :  { %v1790_v55 = vsub.f32 1.5, %v1789_v54 }
 0xd53   :  { %v2149_v57 = vpop.eup %2148 }
 0xd54   :  { %v1791_v59 = vmul.f32 %v2147_v49, %v1790_v55  ;;  %v1797_v6 = vmul.f32 %v2149_v57, %v1785_v22  ;;  %vm1803_vm11 = vweird.f32 %v2149_v57 }
 0xd55   :  { %vm1804_vm13 = vmor %vm1802_vm12, %vm1803_vm11 }
 0xd56   :  { %v1798_v23 = vmul.f32 %v2149_v57, %v1797_v6  ;;  %v1795_v60 = vsel %vm1794_vm10, %v2147_v49, %v1791_v59 }
 0xd57   :  { %v1806_v56 = vmul.f32 %v1795_v60, %v1772_v53 }
 0xd58   :  { %v1799_v62 = vmul.f32 0.5, %v1798_v23 }
 0xd59   :  { %v1812_v63 = vmul.f32 %v2068_v58, %v1806_v56 }
 0xd5a   :  { %v1800_v5 = vsub.f32 1.5, %v1799_v62 }
 0xd5b   :  { %v1818_v8 = vadd.f32 %v2069_v61, %v1812_v63 }
 0xd5c   :  { %v1801_v10 = vmul.f32 %v2149_v57, %v1800_v5 }
 0xd5d   :  { %v1820_v32 = vsel %vm279_vm0, %v1818_v8, 0.0 }
 0xd5e   :  { %1821 = vadd.xlane.f32.xlu0 %v1820_v32  ;;  %v1805_v15 = vsel %vm1804_vm13, %v2149_v57, %v1801_v10 }
 0xd5f   :  { %v1807_v9 = vmul.f32 %v1805_v15, %v1773_v13 }
 0xd61   :  { %v1813_v26 = vmul.f32 %v2068_v58, %v1807_v9 }
 0xd63   :  { %v1819_v11 = vadd.f32 %v2069_v61, %v1813_v26 }
 0xd65   :  { %v1823_v16 = vsel %vm279_vm0, %v1819_v11, 0.0 }
 0xd66   :  { %1824 = vadd.xlane.f32.xlu1 %v1823_v16 }
 0xdd1   :  { %v1822_v4 = vpop.xlane.xlu0 %1821 }
 0xdd2   :  { %v1826_v7 = vmul.f32 %v1822_v4, %v2860_v24 }
 0xdd4   :  { %v1828_v18 = vsub.f32 %v1818_v8, %v1826_v7 }
 0xdd6   :  { %v1830_v19 = vmul.f32 %v1828_v18, %v1828_v18 }
 0xdd8   :  { %v1832_v2 = vsel %vm279_vm0, %v1830_v19, 0.0 }
 0xdd9   :  { %1833 = vadd.xlane.f32.xlu2 %v1832_v2  ;;  %v1825_v3 = vpop.xlane.xlu1 %1824 }
 0xdda   :  { %v1827_v20 = vmul.f32 %v1825_v3, %v2860_v24 }
 0xddc   :  { %v1829_v21 = vsub.f32 %v1819_v11, %v1827_v20 }
 0xdde   :  { %v1831_v25 = vmul.f32 %v1829_v21, %v1829_v21 }
 0xde0   :  { %v1835_v52 = vsel %vm279_vm0, %v1831_v25, 0.0 }
 0xde1   :  { %1836 = vadd.xlane.f32.xlu0 %v1835_v52 }
 0xe4c   :  { %v1834_v1 = vpop.xlane.xlu2 %1833 }
 0xe4d   :  { %v1838_v27 = vmul.f32 %v1834_v1, %v2860_v24 }
 0xe4f   :  { %v1840_v42 = vadd.f32 1e-05, %v1838_v27 }
 0xe51   :  { %2150 = vrsqrt.f32 %v1840_v42  ;;  %vm1848_vm15 = vweird.f32 %v1840_v42 }
 0xe54   :  { %v1837_v12 = vpop.xlane.xlu0 %1836 }
 0xe55   :  { %v1839_v17 = vmul.f32 %v1837_v12, %v2860_v24  ;;  %v2071_v24 = vld [vmem:[%s3125_s23] ss:$0 sm:$0xff] }
 0xe57   :  { %v2151_v28 = vpop.eup %2150  ;;  %v1841_v29 = vadd.f32 1e-05, %v1839_v17 }
 0xe58   :  { %v1843_v30 = vmul.f32 %v2151_v28, %v1840_v42  ;;  %vm1849_vm14 = vweird.f32 %v2151_v28 }
 0xe59   :  { %2152 = vrsqrt.f32 %v1841_v29  ;;  %vm1850_vm1 = vmor %vm1848_vm15, %vm1849_vm14  ;;  %vm1858_vm4 = vweird.f32 %v1841_v29 }
 0xe5a   :  { %v1844_v31 = vmul.f32 %v2151_v28, %v1843_v30 }
 0xe5c   :  { %v1845_v33 = vmul.f32 0.5, %v1844_v31 }
 0xe5e   :  { %v1846_v34 = vsub.f32 1.5, %v1845_v33 }
 0xe5f   :  { %v2153_v35 = vpop.eup %2152 }
 0xe60   :  { %v1847_v36 = vmul.f32 %v2151_v28, %v1846_v34  ;;  %v1853_v37 = vmul.f32 %v2153_v35, %v1841_v29  ;;  %vm1859_vm3 = vweird.f32 %v2153_v35 }
 0xe61   :  { %vm1860_vm5 = vmor %vm1858_vm4, %vm1859_vm3 }
 0xe62   :  { %v1851_v53 = vsel %vm1850_vm1, %v2151_v28, %v1847_v36  ;;  %v1854_v0 = vmul.f32 %v2153_v35, %v1853_v37 }
 0xe63   :  { %v1862_v39 = vmul.f32 %v1851_v53, %v1828_v18 }
 0xe64   :  { %v1855_v40 = vmul.f32 0.5, %v1854_v0 }
 0xe65   :  { %v1868_v41 = vmul.f32 %v2070_v38, %v1862_v39 }
 0xe66   :  { %v1856_v13 = vsub.f32 1.5, %v1855_v40 }
 0xe67   :  { %v1874_v43 = vadd.f32 %v2071_v24, %v1868_v41 }
 0xe68   :  { %v1857_v44 = vmul.f32 %v2153_v35, %v1856_v13 }
 0xe69   :  { %1876 = vst.msk [vmem:[%s3126_s24] sm:$0xff] %vm279_vm0, %v1874_v43 }
 0xe6a   :  { %v1861_v45 = vsel %vm1860_vm5, %v2153_v35, %v1857_v44 }
 0xe6b   :  { %v1863_v14 = vmul.f32 %v1861_v45, %v1829_v21 }
 0xe6d   :  { %v1869_v46 = vmul.f32 %v2070_v38, %v1863_v14 }
 0xe6f   :  { %v1875_v47 = vadd.f32 %v2071_v24, %v1869_v46 }
 0xe71   :  { %1877 = vst.msk [vmem:[%s3126_s24 + $0x8] sm:$0xff] %vm279_vm0, %v1875_v47 }
 0xe72   :  { %2480 = dma.done.wait [#allocation5], 256  }
 0xe73   :  { %2481 = vsyncadd [#allocation5], 4294967040 }
 0xe74   :  { %1899 = vsyncpa [#allocation4], 1 }
 0xe75   :  { %1900 = vsyncpa [#allocation7], 1 }
 0xe76   :  { %1901 = vsyncpa [#allocation10], 1 }
 0xe77   :  { %1902 = vsyncpa [#allocation13], 1 }
 0xe78   :  { %1903 = vsyncpa [#allocation16], 1 }
 0xe79   :  { %1904 = vsyncpa [#allocation19], 1 }
 0xe7a   :  { %1905 = vsyncpa [#allocation22], 1 }
 0xe7b   :  { %1906 = vsyncpa [#allocation5], 1 }

</bundles_post_ra>
